<compile_context>
chip_gen: v7x
topology: tpu7x:2x2x1
jax: 0.10.0
libtpu: 0.0.40
codegen_flags: <defaults>
</compile_context>

<pallas_src>
import jax
import jax.numpy as jnp
from jax import lax
from jax.experimental import pallas as pl
from jax.experimental.pallas import tpu as pltpu


# ----------------------------------------------------------------------------- kernel
def bottleneck_kernel(x_ref, s0_ref, b0_ref, w1_ref, b1_ref,
                      w2_ref, b2_ref, w3_ref, alpha_ref, o_ref):
    H, W, Cin = x_ref.shape
    Pp = w1_ref.shape[1]          # padded `planes`
    Cout = w3_ref.shape[1]
    HW = H * W
    alpha = alpha_ref[0]

    def prelu(t):                 # f32 pointwise (keep off bf16: v5e VPU/EUP)
        return jnp.where(t > 0, t, alpha * t)

    # ---- bn0 (folded affine) + PReLU -> conv1 (1x1, bn1 scale folded into w1) ----
    a0 = prelu(x_ref[...].astype(jnp.float32) * s0_ref[...] + b0_ref[...])   # (H,W,Cin)
    a0 = a0.reshape(HW, Cin).astype(jnp.bfloat16)
    h1 = jnp.dot(a0, w1_ref[...], preferred_element_type=jnp.float32)        # (HW,Pp)

    # ---- bn1 bias + PReLU ----
    t1 = prelu(h1 + b1_ref[...])                                             # (HW,Pp) f32

    # ---- conv2: 3x3 / stride 1 / pad 1 as a ky-split accumulation ---------------
    # Width taps: sublane roll (XLU) + column mask (VPU).  In the flattened (HW,Pp)
    # view, x-1 / x+1 are row +-1; the wrap-around rows are exactly the masked ones.
    w_idx = lax.broadcasted_iota(jnp.int32, (HW, 1), 0) % W
    x_m1 = jnp.where(w_idx == 0, 0.0, pltpu.roll(t1, 1, axis=0))        # value at x-1
    x_p1 = jnp.where(w_idx == W - 1, 0.0, pltpu.roll(t1, HW - 1, axis=0))  # value at x+1

    # One lane-aligned concat (Pp is a multiple of 128): kx-major channel layout.
    t3 = jnp.concatenate([x_m1.astype(jnp.bfloat16),
                          t1.astype(jnp.bfloat16),
                          x_p1.astype(jnp.bfloat16)], axis=1)           # (HW, 3*Pp)

    # Height padding once along the (leading-in-row-order) H axis: W zero rows
    # on each side; slab for ky is a cheap static sublane slice.
    zrows = jnp.zeros((W, 3 * Pp), jnp.bfloat16)
    hp = jnp.concatenate([zrows, t3, zrows], axis=0)                    # ((H+2)*W, 3*Pp)

    h2 = jnp.zeros((HW, Pp), jnp.float32)
    for ky in range(3):                                                 # unrolled
        slab = hp[ky * W: ky * W + HW]                                  # row y+ky-1 taps
        h2 = h2 + jnp.dot(slab, w2_ref[ky],
                          preferred_element_type=jnp.float32)           # (HW,Pp)

    # ---- bn2 bias + PReLU -> conv3 (1x1) ----
    a2 = prelu(h2 + b2_ref[...]).astype(jnp.bfloat16)
    h3 = jnp.dot(a2, w3_ref[...], preferred_element_type=jnp.float32)   # (HW,Cout)

    # ---- residual add: re-read x_ref here (short live range) ----
    o_ref[...] = (h3.reshape(H, W, Cout)
                  + x_ref[...].astype(jnp.float32)).astype(o_ref.dtype)


# ------------------------------------------------------------------------ preparation
def _round_up(x, m):
    return (x + m - 1) // m * m


def fold_bn(gamma, beta, mean, var, eps=1e-5):
    scale = gamma / jnp.sqrt(var + eps)
    return scale, beta - mean * scale


def prepare_operands(params, lane=128):
    """Fold BN scales into conv weights, zero-pad `planes` to a lane multiple, bf16 weights.

    Expected layouts: w1 (Cin, planes), w2 (3, 3, planes, planes) HWIO,
    w3 (planes, 4*planes).  (PyTorch Conv2d OIHW weights must be transposed on import.)
    """
    Cin, planes = params["w1"].shape
    Cout = params["w3"].shape[1]
    Pp = _round_up(planes, lane)
    pad = Pp - planes

    s0, b0 = fold_bn(*params["bn0"])
    s1, b1 = fold_bn(*params["bn1"])
    s2, b2 = fold_bn(*params["bn2"])

    w1 = params["w1"] * s1[None, :]                       # fold bn1 scale
    w2 = params["w2"] * s2[None, None, None, :]           # fold bn2 scale (HWIO)
    w3 = params["w3"]

    # Zero-padding the internal `planes` dim is exact: padded channels get 0 weight,
    # 0 bias, prelu(0) = 0, and contribute 0 downstream.
    w1 = jnp.pad(w1, ((0, 0), (0, pad)))                                  # (Cin, Pp)
    b1 = jnp.pad(b1, ((0, pad),))
    w2 = jnp.pad(w2, ((0, 0), (0, 0), (0, pad), (0, pad)))                # (3,3,Pp,Pp)
    b2 = jnp.pad(b2, ((0, pad),))
    w3 = jnp.pad(w3, ((0, pad), (0, 0)))                                  # (Pp, Cout)

    return dict(
        s0=s0.reshape(1, Cin).astype(jnp.float32),
        b0=b0.reshape(1, Cin).astype(jnp.float32),
        b1=b1.reshape(1, Pp).astype(jnp.float32),
        b2=b2.reshape(1, Pp).astype(jnp.float32),
        w1=w1.astype(jnp.bfloat16),                                       # (Cin, Pp)
        w2=w2.reshape(3, 3 * Pp, Pp).astype(jnp.bfloat16),                # ky major, (kx,ci) rows
        w3=w3.astype(jnp.bfloat16),                                       # (Pp, Cout)
        alpha=params["alpha"].astype(jnp.float32))


def _const_spec(shape, index_map):
    """Grid-invariant operand: fetched once; single-buffered to halve its VMEM."""
    try:
        return pl.BlockSpec(shape, index_map, pipeline_mode=pl.Buffered(1))
    except TypeError:   # older jax without pipeline_mode support
        return pl.BlockSpec(shape, index_map)


def _vmem_limit_bytes(H, W, Cin, Cout, Pp, ops):
    hw = H * W
    weight_bytes = 2 * (ops["w1"].size + ops["w2"].size + ops["w3"].size)   # bf16, single-buf
    small_bytes = 4 * (ops["s0"].size + ops["b0"].size + ops["b1"].size + ops["b2"].size)
    io_bytes = 2 * hw * (Cin + Cout) * 4                  # double-buffered in/out f32 blocks
    act_bytes = hw * (2 * Cin + 4 * Cout + 30 * Pp)       # generous peak intermediates
    need = int(1.25 * (weight_bytes + small_bytes + io_bytes + act_bytes))
    try:
        cap = int(pltpu.get_tpu_info().vmem_capacity_bytes)
    except Exception:
        cap = 64 * 1024 * 1024                            # assume v7x (smallest) if unknown
    return min(int(0.75 * cap), max(need, 32 * 1024 * 1024))


# --------------------------------------------------------------------------- wrappers
def bottleneck_forward(x_nhwc, params):
    """NHWC-in / NHWC-out Pallas Bottleneck.  x_nhwc: (N, H, W, Cin) f32 or bf16."""
    N, H, W, Cin = x_nhwc.shape
    ops = prepare_operands(params)
    Pp = ops["w1"].shape[1]
    Cout = ops["w3"].shape[1]
    assert Cout == Cin, "identity residual requires inplanes == planes * expansion"

    vmem_limit = _vmem_limit_bytes(H, W, Cin, Cout, Pp, ops)

    out = pl.pallas_call(
        bottleneck_kernel,
        out_shape=jax.ShapeDtypeStruct((N, H, W, Cout), x_nhwc.dtype),
        grid=(N,),
        in_specs=[
            pl.BlockSpec((None, H, W, Cin), lambda n: (n, 0, 0, 0)),
            _const_spec(ops["s0"].shape, lambda n: (0, 0)),
            _const_spec(ops["b0"].shape, lambda n: (0, 0)),
            _const_spec(ops["w1"].shape, lambda n: (0, 0)),
            _const_spec(ops["b1"].shape, lambda n: (0, 0)),
            _const_spec(ops["w2"].shape, lambda n: (0, 0, 0)),
            _const_spec(ops["b2"].shape, lambda n: (0, 0)),
            _const_spec(ops["w3"].shape, lambda n: (0, 0)),
            pl.BlockSpec(memory_space=pltpu.MemorySpace.SMEM),      # PReLU alpha scalar
        ],
        out_specs=pl.BlockSpec((None, H, W, Cout), lambda n: (n, 0, 0, 0)),
        compiler_params=pltpu.CompilerParams(
            dimension_semantics=("parallel",),
            vmem_limit_bytes=int(vmem_limit)),
    )(x_nhwc, ops["s0"], ops["b0"], ops["w1"], ops["b1"],
      ops["w2"], ops["b2"], ops["w3"], ops["alpha"])
    return out


def bottleneck_forward_nchw(x_nchw, params):
    """Drop-in PyTorch-layout (NCHW) interface.

    NOTE: each transpose below is a full-tensor HBM read+write; prefer the NHWC
    entry point `bottleneck_forward` in an NHWC pipeline.
    """
    x = jnp.transpose(x_nchw, (0, 2, 3, 1))
    y = bottleneck_forward(x, params)
    return jnp.transpose(y, (0, 3, 1, 2))


# -------------------------------------------------------------------------- reference
def bottleneck_reference(x_nhwc, params, eps=1e-5):
    """Pure-JAX f32 reference (inference BN), same math as the PyTorch module."""
    def bn(t, p):
        g, b, m, v = p
        return (t - m) * (g / jnp.sqrt(v + eps)) + b

    alpha = params["alpha"][0]
    prelu = lambda t: jnp.where(t > 0, t, alpha * t)

    out = prelu(bn(x_nhwc, params["bn0"]))
    out = jnp.einsum("nhwc,cd->nhwd", out, params["w1"])
    out = prelu(bn(out, params["bn1"]))
    out = lax.conv_general_dilated(out, params["w2"], (1, 1), "SAME",
                                   dimension_numbers=("NHWC", "HWIO", "NHWC"))
    out = prelu(bn(out, params["bn2"]))
    out = jnp.einsum("nhwc,cd->nhwd", out, params["w3"])
    return out + x_nhwc


def make_params(key, inplanes, planes):
    expansion = 4
    cout = planes * expansion
    ks = jax.random.split(key, 6)

    def bn_params(k, c):
        k1, k2, k3, k4 = jax.random.split(k, 4)
        gamma = 1.0 + 0.1 * jax.random.normal(k1, (c,), jnp.float32)
        beta = 0.1 * jax.random.normal(k2, (c,), jnp.float32)
        mean = 0.05 * jax.random.normal(k3, (c,), jnp.float32)
        var = jnp.abs(0.5 + 0.1 * jax.random.normal(k4, (c,), jnp.float32))
        return (gamma, beta, mean, var)

    return {
        "bn0": bn_params(ks[0], inplanes),
        "w1": 0.1 * jax.random.normal(ks[1], (inplanes, planes), jnp.float32),
        "bn1": bn_params(ks[2], planes),
        "w2": 0.1 * jax.random.normal(ks[3], (3, 3, planes, planes), jnp.float32),  # HWIO
        "bn2": bn_params(ks[4], planes),
        "w3": 0.1 * jax.random.normal(ks[5], (planes, cout), jnp.float32),
        "alpha": jnp.full((1,), 0.25, jnp.float32),      # nn.PReLU() default init
    }


if __name__ == "__main__":
    N, planes = 2, 4
    inplanes = planes * 4          # residual requires inplanes == planes * expansion
    H = W = 16

    key = jax.random.PRNGKey(0)
    kx, kp = jax.random.split(key)
    x = jax.random.normal(kx, (N, H, W, inplanes), jnp.float32)   # NHWC boundary
    params = make_params(kp, inplanes, planes)

    out = jax.block_until_ready(bottleneck_forward(x, params))
    ref = jax.block_until_ready(bottleneck_reference(x, params))
    assert out.shape == ref.shape == (N, H, W, inplanes)
    # bf16 matmul inputs (f32 accumulate) are an intentional precision deviation
    # from the f32 PyTorch module; tolerance reflects that.
    err = float(jnp.max(jnp.abs(out - ref)))
    assert err < 3e-2, f"NHWC path max abs err {err}"

    # PyTorch-layout (NCHW) drop-in wrapper: same kernel, layout plumbing only.
    x_nchw = jnp.transpose(x, (0, 3, 1, 2))
    out_nchw = jax.block_until_ready(bottleneck_forward_nchw(x_nchw, params))
    err_nchw = float(jnp.max(jnp.abs(out_nchw - jnp.transpose(ref, (0, 3, 1, 2)))))
    assert err_nchw < 3e-2, f"NCHW path max abs err {err_nchw}"

    print("KERNEL_OK")
</pallas_src>

<mosaic_0001>
module attributes {stable_mosaic.version = 11 : i64} {
  func.func @bottleneck_kernel(%arg0: i32, %arg1: memref<1x16x16x16xf32, #tpu.memory_space<vmem>>, %arg2: memref<1x16xf32, #tpu.memory_space<vmem>>, %arg3: memref<1x16xf32, #tpu.memory_space<vmem>>, %arg4: memref<16x128xbf16, #tpu.memory_space<vmem>>, %arg5: memref<1x128xf32, #tpu.memory_space<vmem>>, %arg6: memref<3x384x128xbf16, #tpu.memory_space<vmem>>, %arg7: memref<1x128xf32, #tpu.memory_space<vmem>>, %arg8: memref<128x16xbf16, #tpu.memory_space<vmem>>, %arg9: memref<1xf32, #tpu.memory_space<smem>>, %arg10: memref<1x16x16x16xf32, #tpu.memory_space<vmem>>) attributes {dimension_semantics = [#tpu.dimension_semantics<parallel>], iteration_bounds = array<i64: 2>, scalar_prefetch = 0 : i64, scratch_operands = 0 : i64, tpu.core_type = #tpu.core_type<tc>, window_params = [{transform_indices = @transform_0, window_bounds = array<i64: 1, 16, 16, 16>}, {pipeline_mode = #tpu.pipeline_mode<synchronous>, transform_indices = @transform_1, window_bounds = array<i64: 1, 16>}, {pipeline_mode = #tpu.pipeline_mode<synchronous>, transform_indices = @transform_2, window_bounds = array<i64: 1, 16>}, {pipeline_mode = #tpu.pipeline_mode<synchronous>, transform_indices = @transform_3, window_bounds = array<i64: 16, 128>}, {pipeline_mode = #tpu.pipeline_mode<synchronous>, transform_indices = @transform_4, window_bounds = array<i64: 1, 128>}, {pipeline_mode = #tpu.pipeline_mode<synchronous>, transform_indices = @transform_5, window_bounds = array<i64: 3, 384, 128>}, {pipeline_mode = #tpu.pipeline_mode<synchronous>, transform_indices = @transform_6, window_bounds = array<i64: 1, 128>}, {pipeline_mode = #tpu.pipeline_mode<synchronous>, transform_indices = @transform_7, window_bounds = array<i64: 128, 16>}, {transform_indices = @transform_8, window_bounds = array<i64: 1>}, {transform_indices = @transform_9, window_bounds = array<i64: 1, 16, 16, 16>}]} {
    %c0 = arith.constant 0 : index
    %0 = memref.load %arg9[%c0] : memref<1xf32, #tpu.memory_space<smem>>
    %c0_0 = arith.constant 0 : index
    %c0_1 = arith.constant 0 : index
    %c0_2 = arith.constant 0 : index
    %c0_3 = arith.constant 0 : index
    %1 = vector.load %arg1[%c0_0, %c0_1, %c0_2, %c0_3] : memref<1x16x16x16xf32, #tpu.memory_space<vmem>>, vector<1x16x16x16xf32>
    %2 = vector.shape_cast %1 : vector<1x16x16x16xf32> to vector<16x16x16xf32>
    %c0_4 = arith.constant 0 : index
    %c0_5 = arith.constant 0 : index
    %3 = vector.load %arg2[%c0_4, %c0_5] : memref<1x16xf32, #tpu.memory_space<vmem>>, vector<1x16xf32>
    %4 = vector.shape_cast %3 : vector<1x16xf32> to vector<1x1x16xf32>
    %5 = vector.broadcast %4 : vector<1x1x16xf32> to vector<16x16x16xf32>
    %6 = arith.mulf %2, %5 : vector<16x16x16xf32>
    %c0_6 = arith.constant 0 : index
    %c0_7 = arith.constant 0 : index
    %7 = vector.load %arg3[%c0_6, %c0_7] : memref<1x16xf32, #tpu.memory_space<vmem>>, vector<1x16xf32>
    %8 = vector.shape_cast %7 : vector<1x16xf32> to vector<1x1x16xf32>
    %9 = vector.broadcast %8 : vector<1x1x16xf32> to vector<16x16x16xf32>
    %10 = arith.addf %6, %9 : vector<16x16x16xf32>
    %cst = arith.constant 0.000000e+00 : f32
    %11 = vector.broadcast %cst : f32 to vector<16x16x16xf32>
    %12 = arith.cmpf ogt, %10, %11 : vector<16x16x16xf32>
    %13 = vector.broadcast %0 : f32 to vector<16x16x16xf32>
    %14 = arith.mulf %13, %10 : vector<16x16x16xf32>
    %15 = arith.select %12, %10, %14 : vector<16x16x16xi1>, vector<16x16x16xf32>
    %16 = vector.shape_cast %15 : vector<16x16x16xf32> to vector<256x16xf32>
    %17 = arith.truncf %16 : vector<256x16xf32> to vector<256x16xbf16>
    %c0_8 = arith.constant 0 : index
    %c0_9 = arith.constant 0 : index
    %18 = vector.load %arg4[%c0_8, %c0_9] : memref<16x128xbf16, #tpu.memory_space<vmem>>, vector<16x128xbf16>
    %cst_10 = arith.constant dense<0.000000e+00> : vector<256x128xf32>
    %19 = tpu.matmul %17, %18, %cst_10 {dimension_numbers = #tpu.dot_dimension_numbers<[1], [0], [0], [1], [0, 0, 1, 1], [], []>} : vector<256x16xbf16>, vector<16x128xbf16>, vector<256x128xf32> -> vector<256x128xf32>
    %c0_11 = arith.constant 0 : index
    %c0_12 = arith.constant 0 : index
    %20 = vector.load %arg5[%c0_11, %c0_12] : memref<1x128xf32, #tpu.memory_space<vmem>>, vector<1x128xf32>
    %21 = vector.broadcast %20 : vector<1x128xf32> to vector<256x128xf32>
    %22 = arith.addf %19, %21 : vector<256x128xf32>
    %cst_13 = arith.constant 0.000000e+00 : f32
    %23 = vector.broadcast %cst_13 : f32 to vector<256x128xf32>
    %24 = arith.cmpf ogt, %22, %23 : vector<256x128xf32>
    %25 = vector.broadcast %0 : f32 to vector<256x128xf32>
    %26 = arith.mulf %25, %22 : vector<256x128xf32>
    %27 = arith.select %24, %22, %26 : vector<256x128xi1>, vector<256x128xf32>
    %28 = tpu.iota {dimensions = array<i32: 0>} : vector<256x1xi32>
    %c16_i32 = arith.constant 16 : i32
    %c0_i32 = arith.constant 0 : i32
    %29 = arith.cmpi eq, %c16_i32, %c0_i32 : i32
    %c1_i32 = arith.constant 1 : i32
    %30 = arith.select %29, %c1_i32, %c16_i32 : i32
    %31 = vector.broadcast %30 : i32 to vector<256x1xi32>
    %32 = arith.remsi %28, %31 : vector<256x1xi32>
    %c0_i32_14 = arith.constant 0 : i32
    %33 = vector.broadcast %c0_i32_14 : i32 to vector<256x1xi32>
    %34 = arith.cmpi ne, %32, %33 : vector<256x1xi32>
    %c0_i32_15 = arith.constant 0 : i32
    %35 = vector.broadcast %c0_i32_15 : i32 to vector<256x1xi32>
    %36 = arith.cmpi slt, %32, %35 : vector<256x1xi32>
    %c0_i32_16 = arith.constant 0 : i32
    %37 = arith.cmpi slt, %30, %c0_i32_16 : i32
    %38 = vector.broadcast %37 : i1 to vector<256x1xi1>
    %39 = vector.broadcast %38 : vector<256x1xi1> to vector<256x1xi1>
    %40 = arith.xori %36, %39 : vector<256x1xi1>
    %41 = arith.andi %40, %34 : vector<256x1xi1>
    %42 = vector.broadcast %30 : i32 to vector<256x1xi32>
    %43 = arith.addi %32, %42 : vector<256x1xi32>
    %44 = arith.select %41, %43, %32 : vector<256x1xi1>, vector<256x1xi32>
    %c0_i32_17 = arith.constant 0 : i32
    %45 = vector.broadcast %c0_i32_17 : i32 to vector<256x1xi32>
    %46 = arith.cmpi eq, %44, %45 : vector<256x1xi32>
    %c1_i32_18 = arith.constant 1 : i32
    %47 = tpu.dynamic_rotate %27 by %c1_i32_18 dim 0 : vector<256x128xf32>, i32 -> vector<256x128xf32>
    %cst_19 = arith.constant 0.000000e+00 : f32
    %48 = vector.shape_cast %46 : vector<256x1xi1> to vector<256x1xi1>
    %49 = vector.broadcast %48 : vector<256x1xi1> to vector<256x128xi1>
    %50 = vector.broadcast %cst_19 : f32 to vector<256x128xf32>
    %51 = arith.select %49, %50, %47 : vector<256x128xi1>, vector<256x128xf32>
    %c15_i32 = arith.constant 15 : i32
    %52 = vector.broadcast %c15_i32 : i32 to vector<256x1xi32>
    %53 = arith.cmpi eq, %44, %52 : vector<256x1xi32>
    %c255_i32 = arith.constant 255 : i32
    %54 = tpu.dynamic_rotate %27 by %c255_i32 dim 0 : vector<256x128xf32>, i32 -> vector<256x128xf32>
    %cst_20 = arith.constant 0.000000e+00 : f32
    %55 = vector.shape_cast %53 : vector<256x1xi1> to vector<256x1xi1>
    %56 = vector.broadcast %55 : vector<256x1xi1> to vector<256x128xi1>
    %57 = vector.broadcast %cst_20 : f32 to vector<256x128xf32>
    %58 = arith.select %56, %57, %54 : vector<256x128xi1>, vector<256x128xf32>
    %59 = arith.truncf %51 : vector<256x128xf32> to vector<256x128xbf16>
    %60 = arith.truncf %27 : vector<256x128xf32> to vector<256x128xbf16>
    %61 = arith.truncf %58 : vector<256x128xf32> to vector<256x128xbf16>
    %62 = tpu.concatenate %59, %60, %61 in 1 : vector<256x128xbf16>, vector<256x128xbf16>, vector<256x128xbf16> -> vector<256x384xbf16>
    %cst_21 = arith.constant 0.000000e+00 : bf16
    %63 = vector.broadcast %cst_21 : bf16 to vector<16x384xbf16>
    %64 = tpu.concatenate %63, %62, %63 in 0 : vector<16x384xbf16>, vector<256x384xbf16>, vector<16x384xbf16> -> vector<288x384xbf16>
    %cst_22 = arith.constant 0.000000e+00 : f32
    %65 = vector.broadcast %cst_22 : f32 to vector<256x128xf32>
    %66 = vector.extract_strided_slice %64 {offsets = [0, 0], sizes = [256, 384], strides = [1, 1]} : vector<288x384xbf16> to vector<256x384xbf16>
    %c0_23 = arith.constant 0 : index
    %c0_24 = arith.constant 0 : index
    %c0_25 = arith.constant 0 : index
    %67 = vector.load %arg6[%c0_23, %c0_24, %c0_25] : memref<3x384x128xbf16, #tpu.memory_space<vmem>>, vector<1x384x128xbf16>
    %68 = vector.shape_cast %67 : vector<1x384x128xbf16> to vector<384x128xbf16>
    %cst_26 = arith.constant dense<0.000000e+00> : vector<256x128xf32>
    %69 = tpu.matmul %66, %68, %cst_26 {dimension_numbers = #tpu.dot_dimension_numbers<[1], [0], [0], [1], [0, 0, 1, 1], [], []>} : vector<256x384xbf16>, vector<384x128xbf16>, vector<256x128xf32> -> vector<256x128xf32>
    %70 = arith.addf %65, %69 : vector<256x128xf32>
    %71 = vector.extract_strided_slice %64 {offsets = [16, 0], sizes = [256, 384], strides = [1, 1]} : vector<288x384xbf16> to vector<256x384xbf16>
    %c1 = arith.constant 1 : index
    %c0_27 = arith.constant 0 : index
    %c0_28 = arith.constant 0 : index
    %72 = vector.load %arg6[%c1, %c0_27, %c0_28] : memref<3x384x128xbf16, #tpu.memory_space<vmem>>, vector<1x384x128xbf16>
    %73 = vector.shape_cast %72 : vector<1x384x128xbf16> to vector<384x128xbf16>
    %cst_29 = arith.constant dense<0.000000e+00> : vector<256x128xf32>
    %74 = tpu.matmul %71, %73, %cst_29 {dimension_numbers = #tpu.dot_dimension_numbers<[1], [0], [0], [1], [0, 0, 1, 1], [], []>} : vector<256x384xbf16>, vector<384x128xbf16>, vector<256x128xf32> -> vector<256x128xf32>
    %75 = arith.addf %70, %74 : vector<256x128xf32>
    %76 = vector.extract_strided_slice %64 {offsets = [32, 0], sizes = [256, 384], strides = [1, 1]} : vector<288x384xbf16> to vector<256x384xbf16>
    %c2 = arith.constant 2 : index
    %c0_30 = arith.constant 0 : index
    %c0_31 = arith.constant 0 : index
    %77 = vector.load %arg6[%c2, %c0_30, %c0_31] : memref<3x384x128xbf16, #tpu.memory_space<vmem>>, vector<1x384x128xbf16>
    %78 = vector.shape_cast %77 : vector<1x384x128xbf16> to vector<384x128xbf16>
    %cst_32 = arith.constant dense<0.000000e+00> : vector<256x128xf32>
    %79 = tpu.matmul %76, %78, %cst_32 {dimension_numbers = #tpu.dot_dimension_numbers<[1], [0], [0], [1], [0, 0, 1, 1], [], []>} : vector<256x384xbf16>, vector<384x128xbf16>, vector<256x128xf32> -> vector<256x128xf32>
    %80 = arith.addf %75, %79 : vector<256x128xf32>
    %c0_33 = arith.constant 0 : index
    %c0_34 = arith.constant 0 : index
    %81 = vector.load %arg7[%c0_33, %c0_34] : memref<1x128xf32, #tpu.memory_space<vmem>>, vector<1x128xf32>
    %82 = vector.broadcast %81 : vector<1x128xf32> to vector<256x128xf32>
    %83 = arith.addf %80, %82 : vector<256x128xf32>
    %cst_35 = arith.constant 0.000000e+00 : f32
    %84 = vector.broadcast %cst_35 : f32 to vector<256x128xf32>
    %85 = arith.cmpf ogt, %83, %84 : vector<256x128xf32>
    %86 = vector.broadcast %0 : f32 to vector<256x128xf32>
    %87 = arith.mulf %86, %83 : vector<256x128xf32>
    %88 = arith.select %85, %83, %87 : vector<256x128xi1>, vector<256x128xf32>
    %89 = arith.truncf %88 : vector<256x128xf32> to vector<256x128xbf16>
    %c0_36 = arith.constant 0 : index
    %c0_37 = arith.constant 0 : index
    %90 = vector.load %arg8[%c0_36, %c0_37] : memref<128x16xbf16, #tpu.memory_space<vmem>>, vector<128x16xbf16>
    %cst_38 = arith.constant dense<0.000000e+00> : vector<256x16xf32>
    %91 = tpu.matmul %89, %90, %cst_38 {dimension_numbers = #tpu.dot_dimension_numbers<[1], [0], [0], [1], [0, 0, 1, 1], [], []>} : vector<256x128xbf16>, vector<128x16xbf16>, vector<256x16xf32> -> vector<256x16xf32>
    %92 = vector.shape_cast %91 : vector<256x16xf32> to vector<16x16x16xf32>
    %c0_39 = arith.constant 0 : index
    %c0_40 = arith.constant 0 : index
    %c0_41 = arith.constant 0 : index
    %c0_42 = arith.constant 0 : index
    %93 = vector.load %arg1[%c0_39, %c0_40, %c0_41, %c0_42] : memref<1x16x16x16xf32, #tpu.memory_space<vmem>>, vector<1x16x16x16xf32>
    %94 = vector.shape_cast %93 : vector<1x16x16x16xf32> to vector<16x16x16xf32>
    %95 = arith.addf %92, %94 : vector<16x16x16xf32>
    %c0_43 = arith.constant 0 : index
    %c0_44 = arith.constant 0 : index
    %c0_45 = arith.constant 0 : index
    %c0_46 = arith.constant 0 : index
    %96 = vector.load %arg10[%c0_43, %c0_44, %c0_45, %c0_46] : memref<1x16x16x16xf32, #tpu.memory_space<vmem>>, vector<1x16x16x16xf32>
    %97 = vector.shape_cast %96 : vector<1x16x16x16xf32> to vector<16x16x16xf32>
    %98 = vector.shape_cast %95 : vector<16x16x16xf32> to vector<1x16x16x16xf32>
    tpu.vector_store %arg10[%c0_43, %c0_44, %c0_45, %c0_46], %98 {strides = array<i32>} : memref<1x16x16x16xf32, #tpu.memory_space<vmem>>, vector<1x16x16x16xf32>,
    return
  }
  func.func @transform_0(%arg0: i32) -> (i32, i32, i32, i32) {
    %c0_i32 = arith.constant 0 : i32
    %c0_i32_0 = arith.constant 0 : i32
    %c0_i32_1 = arith.constant 0 : i32
    %c0_i32_2 = arith.constant 0 : i32
    return %arg0, %c0_i32, %c0_i32_0, %c0_i32_1 : i32, i32, i32, i32
  }
  func.func @transform_1(%arg0: i32) -> (i32, i32) {
    %c0_i32 = arith.constant 0 : i32
    %c0_i32_0 = arith.constant 0 : i32
    %c0_i32_1 = arith.constant 0 : i32
    return %c0_i32, %c0_i32_0 : i32, i32
  }
  func.func @transform_2(%arg0: i32) -> (i32, i32) {
    %c0_i32 = arith.constant 0 : i32
    %c0_i32_0 = arith.constant 0 : i32
    %c0_i32_1 = arith.constant 0 : i32
    return %c0_i32, %c0_i32_0 : i32, i32
  }
  func.func @transform_3(%arg0: i32) -> (i32, i32) {
    %c0_i32 = arith.constant 0 : i32
    %c0_i32_0 = arith.constant 0 : i32
    %c0_i32_1 = arith.constant 0 : i32
    return %c0_i32, %c0_i32_0 : i32, i32
  }
  func.func @transform_4(%arg0: i32) -> (i32, i32) {
    %c0_i32 = arith.constant 0 : i32
    %c0_i32_0 = arith.constant 0 : i32
    %c0_i32_1 = arith.constant 0 : i32
    return %c0_i32, %c0_i32_0 : i32, i32
  }
  func.func @transform_5(%arg0: i32) -> (i32, i32, i32) {
    %c0_i32 = arith.constant 0 : i32
    %c0_i32_0 = arith.constant 0 : i32
    %c0_i32_1 = arith.constant 0 : i32
    %c0_i32_2 = arith.constant 0 : i32
    return %c0_i32, %c0_i32_0, %c0_i32_1 : i32, i32, i32
  }
  func.func @transform_6(%arg0: i32) -> (i32, i32) {
    %c0_i32 = arith.constant 0 : i32
    %c0_i32_0 = arith.constant 0 : i32
    %c0_i32_1 = arith.constant 0 : i32
    return %c0_i32, %c0_i32_0 : i32, i32
  }
  func.func @transform_7(%arg0: i32) -> (i32, i32) {
    %c0_i32 = arith.constant 0 : i32
    %c0_i32_0 = arith.constant 0 : i32
    %c0_i32_1 = arith.constant 0 : i32
    return %c0_i32, %c0_i32_0 : i32, i32
  }
  func.func @transform_8(%arg0: i32) -> i32 {
    %c0_i32 = arith.constant 0 : i32
    %c0_i32_0 = arith.constant 0 : i32
    return %c0_i32 : i32
  }
  func.func @transform_9(%arg0: i32) -> (i32, i32, i32, i32) {
    %c0_i32 = arith.constant 0 : i32
    %c0_i32_0 = arith.constant 0 : i32
    %c0_i32_1 = arith.constant 0 : i32
    %c0_i32_2 = arith.constant 0 : i32
    return %arg0, %c0_i32, %c0_i32_0, %c0_i32_1 : i32, i32, i32, i32
  }
}

</mosaic_0001>

<bundles_post_ra>
// kernel: tpu_custom_call.1
= control target key start
LH: loop header
LB: loop body
LE: loop exit
PB: predicated region body
PF: predicated region fallthrough
CT: control target
= control target key end

     0   :  { %s7835_s0 = inlined_call_operand.hbm [shape: f32[2,16,16,16], index: 0, kind: input, shape index: {}]   ;;  %s7836_s1 = inlined_call_operand.vmem [shape: f32[1,16], index: 1, kind: input, shape index: {}]   ;;  %s7837_s2 = inlined_call_operand.vmem [shape: f32[1,16], index: 2, kind: input, shape index: {}]   ;;  %s7838_s3 = inlined_call_operand.vmem [shape: bf16[16,128], index: 3, kind: input, shape index: {}]   ;;  %s7839_s4 = inlined_call_operand.vmem [shape: f32[1,128], index: 4, kind: input, shape index: {}]   ;;  %s7840_s5 = inlined_call_operand.hbm [shape: bf16[3,384,128], index: 5, kind: input, shape index: {}]   ;;  %s7841_s6 = inlined_call_operand.vmem [shape: f32[1,128], index: 6, kind: input, shape index: {}]   ;;  %s7842_s7 = inlined_call_operand.vmem [shape: bf16[128,16], index: 7, kind: input, shape index: {}]   ;;  %s7843_s8 = inlined_call_operand.<no memory space> [shape: f32[1], index: 8, kind: input, shape index: {}]   ;;  %s7844_s9 = inlined_call_operand.hbm [shape: f32[2,16,16,16], index: 9, kind: output, shape index: {}]  }
   0x1   :  { %14 = sst [smem:[#allocation2]] %s7843_s8 }
   0x2   :  { %15 = vsyncpa [#allocation4], 0 }
   0x3   :  { %17 = vsyncpa [#allocation4 + $0x1], 0 }
   0x4   :  { %18 = vsyncpa [#allocation7], 0 }
   0x5   :  { %19 = vsyncpa [#allocation5], 0 }
   0x6   :  { %21 = vsyncpa [#allocation5 + $0x1], 0  ;;  %s5605_s11 = smov 0   ;;  %s5607_s12 = smov 0  }
   0x7   :  { %s5609_s13 = smov 0   ;;  %s5611_s14 = smov 0  }
   0x8 LB: > { %s5626_s8 = sadd.s32 4294967295, %s5539_s14   ;;  %s3877_s15 = sadd.s32 4294967294, %s5539_s14   ;;  %s5539_s14 = sphi %s5611_s14, %s8285_s14   ;;  %s5535_s13 = sphi %s5609_s13, %s8288_s13   ;;  %s5531_s12 = sphi %s5607_s12, %s8287_s12   ;;  %s5527_s11 = sphi %s5605_s11, %s8286_s11  }
   0x9   : > { %p47_p0 = scmp.ne.s32.totalorder %s5531_s12, %s5527_s11  ;;  %p7845_p1 = scmp.eq.s32.totalorder %s5626_s8, 0 }
   0xa   : > { %p245_p3 = scmp.eq.s32.totalorder %s3877_s15, 1  ;;  %p3878_p5 = scmp.ge.s32.totalorder %s5539_s14, 1 }
   0xb   : > { %p5635_p4 = por %p7845_p1, %p47_p0  ;;  %p252_p7 = scmp.lt.s32.totalorder %s5539_s14, 3 }
   0xc   : > { %p5640_p6 = por %p245_p3, %p47_p0  ;;  %s5541_s19 = smov [#allocation6]  }
   0xd   : > { %s7942_s16 = scalar_select %p5635_p4, 1, 0 }
   0xe   : > { %s7943_s17 = scalar_select %p5640_p6, 1, 0 }
   0xf   : > { %p5645_p8 = pnand %p3878_p5, %p252_p7  ;;  %s276_s20 = sshll.u32 %s5541_s19, 4  ;;  %s5649_s20 = int_to_ptr.vmem [resolvable:$true] %s276_s20 }
  0x10   : > { %s5661_s22 = sadd.s32 1, %s5539_s14   ;;  %s34_s23 = sadd.s32 1, %s5535_s13 }
  0x11   : > { %s7944_s18 = scalar_select %p5645_p8, 1, 0 }
  0x12   : > { %p5241_p9 = pneg %p5645_p8  ;;  %7946 = sst [smem:[#allocation12_spill]] %s5661_s22 }
  0x13   : > { %s31_s24 = ssub.s32 %s5539_s14, %s5661_s22  ;;  %s5411_s27 = scalar_lea.hbm %s7840_s5, 9216 }
  0x14   : > { %p5656_p11 = pnand %p5241_p9, %p7845_p1  ;;  %p5412_p12 = scmp.ne.s32.totalorder %s7840_s5, %s5411_s27 }
  0x15   : > { %p5418_p5 = scmp.lt.u32.totalorder %s5411_s27, %s7840_s5 }
  0x16   : > { %p5413_p13 = pneg %p5656_p11 }
  0x18   : > { %p5414_p0 = pnand %p5413_p13, %p5412_p12 }
  0x1a   : > { %p5415_p3 = pneg %p5414_p0 }
  0x1c   : > { %p5420_p7 = pnand %p5418_p5, %p5415_p3 }
  0x1e   : > { %5423 = shalt.err (!%p5420_p7)
}
  0x1f   : > { %s5424_s15 = scalar_lea.vmem %s5649_s20, 9216  ;;  %p5432_p2 = scmp.lt.s32.totalorder %s5649_s20, %s5649_s20 }
  0x20   : > { %p5425_p9 = scmp.ne.s32.totalorder %s5649_s20, %s5424_s15  ;;  %p5433_p6 = scmp.lt.s32.totalorder %s5424_s15, %s5424_s15 }
  0x22   : > { %p5427_p10 = pnand %p5425_p9, %p5413_p13  ;;  %p5434_p4 = por %p5433_p6, %p5432_p2 }
  0x24   : > { %p5428_p1 = pneg %p5427_p10 }
  0x26   : > { %p5435_p8 = pnand %p5434_p4, %p5428_p1 }
  0x28   : > { %5438 = shalt.err (!%p5435_p8)
}
  0x29   : > { %s5542_s19 = smov 64   ;;  %s5543_s25 = smov 4  }
  0x2a   : > { %5244 = dma.hbm_to_vmem [thread:$0]  (!%p5656_p11), %s7840_s5, 9216, %s5649_s20, [#allocation7], %s5542_s19, %s5542_s19, %s5543_s25  }
  0x2b   : > { %p32_p2 = scmp.eq.s32.totalorder %s31_s24, 0  ;;  %p41_p1 = scmp.ne.s32.totalorder %s5535_s13, %s5531_s12 }
  0x2c   : > { %p42_p4 = scmp.eq.s32.totalorder %s5539_s14, 0  ;;  %p5254_p6 = scmp.lt.s32.totalorder %s5539_s14, 2 }
  0x2d   : > { %s5692_s28 = scalar_select %p32_p2, %s5535_s13, %s34_s23  }
  0x2e   : > { %p43_p8 = por %p42_p4, %p41_p1  ;;  %p7947_p10 = scmp.eq.s32.totalorder %s5626_s8, 1 }
  0x2f   : > { %s299_s30 = sand.u32 1, %s5535_s13   ;;  %s4362_s10 = sshll.u32 %s5539_s14, 12 }
  0x30   : > { %p5696_p12 = por %p7947_p10, %p41_p1  ;;  %s3881_s15 = sshll.u32 %s299_s30, 8 }
  0x31   : > { %s5705_s26 = scalar_lea.hbm %s7835_s0, %s4362_s10  ;;  %s303_s20 = scalar_lea.vmem [#allocation3], %s3881_s15 }
  0x32   : > { %s310_s23 = sshll.u32 %s303_s20, 4  ;;  %p5707_p11 = pnand %p5254_p6, %p43_p8  ;;  %s5711_s23 = int_to_ptr.vmem [resolvable:$true] %s310_s23 }
  0x33   : > { %s5713_s19 = scalar_lea.sflag [#allocation4], %s299_s30  ;;  %s5439_s25 = scalar_lea.hbm %s5705_s26, 4096 }
  0x34   : > { %p5440_p13 = scmp.ne.s32.totalorder %s5705_s26, %s5439_s25  ;;  %p5441_p0 = pneg %p5707_p11 }
  0x35   : > { %s5444_s10 = scalar_lea.hbm %s7835_s0, 8192  ;;  %p5445_p7 = scmp.lt.u32.totalorder %s5705_s26, %s7835_s0 }
  0x36   : > { %p5442_p3 = pnand %p5441_p0, %p5440_p13  ;;  %p5446_p9 = scmp.lt.u32.totalorder %s5444_s10, %s5439_s25 }
  0x37   : > { %p5448_p1 = scmp.lt.u32.totalorder %s5439_s25, %s5705_s26 }
  0x38   : > { %p5443_p5 = pneg %p5442_p3  ;;  %p5447_p2 = por %p5446_p9, %p5445_p7 }
  0x3a   : > { %p5449_p4 = por %p5448_p1, %p5447_p2 }
  0x3c   : > { %p5450_p6 = pnand %p5449_p4, %p5443_p5 }
  0x3e   : > { %5453 = shalt.err (!%p5450_p6)
}
  0x3f   : > { %s5454_s30 = scalar_lea.vmem %s5711_s23, 4096  ;;  %s5544_s20 = smov [#allocation3]  }
  0x40   : > { %p5455_p8 = scmp.ne.s32.totalorder %s5711_s23, %s5454_s30  ;;  %s5459_s22 = sshll.u32 %s5544_s20, 4  ;;  %s5460_s22 = int_to_ptr.vmem [resolvable:$false] %s5459_s22 }
  0x41   : > { %s5461_s27 = scalar_lea.vmem %s5460_s22, 8192  ;;  %p5462_p3 = scmp.lt.s32.totalorder %s5711_s23, %s5460_s22 }
  0x42   : > { %p5457_p10 = pnand %p5455_p8, %p5441_p0  ;;  %p5463_p7 = scmp.lt.s32.totalorder %s5461_s27, %s5454_s30 }
  0x44   : > { %p5458_p13 = pneg %p5457_p10  ;;  %p5464_p9 = por %p5463_p7, %p5462_p3 }
  0x46   : > { %p5465_p2 = pnand %p5464_p9, %p5458_p13 }
  0x48   : > { %5468 = shalt.err (!%p5465_p2)
}
  0x49   : > { %s5545_s25 = smov 128   ;;  %s5546_s10 = smov 8  }
  0x4a   : > { %5248 = dma.hbm_to_vmem [thread:$0]  (!%p5707_p11), %s5705_s26, 4096, %s5711_s23, %s5713_s19, %s5545_s25, %s5545_s25, %s5546_s10  }
  0x4b   : > { %p7950_p0 = scmp.ne.s32.totalorder %s7944_s18, 0 }
  0x4d   : > { %322 = sbr.rel (%p7950_p0) target bundleno = 1152 (0x480), region = 56 }
  0x54   : > { %s5744_s15 = sand.u32 1, %s5531_s12   ;;  %p7951_p5 = scmp.ne.s32.totalorder %s7942_s16, 0 }
  0x55   : > { %s3885_s21 = sshll.u32 %s5744_s15, 8  ;;  %s325_s30 = scalar_lea.sflag [#allocation4], %s5744_s15 }
  0x56   : > { %s5750_s20 = scalar_lea.vmem [#allocation3], %s3885_s21 }
  0x57   : > { %5514 = dma.done.wait (%p7951_p5), %s325_s30, 4096  }
  0x58   : > { %5516 = vsyncadd (%p7951_p5), %s325_s30, 4294963200  ;;  %p7952_p11 = scmp.eq.s32.totalorder %s5626_s8, 0 }
  0x5a   : > { %5518 = dma.done.wait (%p7952_p11), [#allocation7], 9216   ;;  %p7953_p1 = pmov %p7952_p11 }
  0x5b   : > { %s368_s18 = sld [smem:[#allocation2]]  ;;  %v5298_v0 = vld [vmem:[%s7838_s3] sm:$0xff]   ;;  %v370_v2 = vld [vmem:[%s5750_s20 + $0x8] sm:$0xff]  ;;  %vm7878_vm0 = vcmask 130048   ;;  %v371_v12 = vld [vmem:[%s5750_s20 + $0x10] sm:$0xff]  ;;  %s7688_s19 = scalar_lea.vmem [#allocation8], %s3885_s21 }
  0x5c   : > { %5520 = vsyncadd (%p7953_p1), [#allocation7], 4294958080  ;;  %v369_v1 = vld [vmem:[%s5750_s20] sm:$0xff]  ;;  %4845 = vmatprep.subr.bf16.mxu0 %v5298_v0  ;;  %5071 = vmatprep.subr.bf16.mxu1 %v5298_v0  ;;  %v386_v8 = vld [vmem:[%s5750_s20 + $0x88] sm:$0xff]  ;;  %s4363_s21 = sshll.u32 %s5626_s8, 12  ;;  %s3794_s22 = sshll.u32 %s7688_s19, 4  ;;  %s7784_s22 = int_to_ptr.vmem [resolvable:$true] %s3794_s22 }
  0x5d   : > { %v5768_v3 = vld [vmem:[%s7836_s1] ss:$0 sm:$0xff]  ;;  %4846 = vmatpush3.bf16.msra.mxu0 %v5298_v0  ;;  %5072 = vmatpush3.bf16.msra.mxu1 %v5298_v0  ;;  %v372_v13 = vld [vmem:[%s5750_s20 + $0x18] sm:$0xff]  ;;  %v387_v14 = vld [vmem:[%s5750_s20 + $0x90] sm:$0xff]  ;;  %s7782_s8 = scalar_lea.hbm %s7844_s9, %s4363_s21  ;;  %s3781_s10 = scalar_lea.sflag [#allocation5], %s5744_s15 }
  0x5e   : > { %v408_v4 = vmul.f32 %v5768_v3, %v369_v1  ;;  %v409_v5 = vmul.f32 %v5768_v3, %v370_v2  ;;  %v5775_v6 = vld [vmem:[%s7837_s2] ss:$0 sm:$0xff]  ;;  %v425_v11 = vmul.f32 %v5768_v3, %v386_v8  ;;  %v410_v17 = vmul.f32 %v5768_v3, %v371_v12  ;;  %v388_v19 = vld [vmem:[%s5750_s20 + $0x98] sm:$0xff]  ;;  %v374_v37 = vld [vmem:[%s5750_s20 + $0x28] sm:$0xff]  ;;  %s5469_s30 = scalar_lea.vmem %s7784_s22, 4096 }
  0x5f   : > { %v385_v7 = vld [vmem:[%s5750_s20 + $0x80] sm:$0xff]  ;;  %v411_v18 = vmul.f32 %v5768_v3, %v372_v13  ;;  %v426_v22 = vmul.f32 %v5768_v3, %v387_v14  ;;  %v427_v23 = vmul.f32 %v5768_v3, %v388_v19  ;;  %v390_v44 = vld [vmem:[%s5750_s20 + $0xa8] sm:$0xff]  ;;  %v375_v45 = vld [vmem:[%s5750_s20 + $0x30] sm:$0xff]  ;;  %v413_v48 = vmul.f32 %v5768_v3, %v374_v37  ;;  %p5470_p4 = scmp.ne.s32.totalorder %s7784_s22, %s5469_s30 }
  0x60   : > { %v424_v10 = vmul.f32 %v5768_v3, %v385_v7  ;;  %v447_v15 = vadd.f32 %v5775_v6, %v408_v4  ;;  %v448_v16 = vadd.f32 %v5775_v6, %v409_v5  ;;  %v464_v21 = vadd.f32 %v5775_v6, %v425_v11  ;;  %v373_v36 = vld [vmem:[%s5750_s20 + $0x20] sm:$0xff]  ;;  %v376_v50 = vld [vmem:[%s5750_s20 + $0x38] sm:$0xff]  ;;  %v391_v59 = vld [vmem:[%s5750_s20 + $0xb0] sm:$0xff] }
  0x61   : > { %v5779_v9 = vstv %s368_s18  ;;  %v449_v30 = vadd.f32 %v5775_v6, %v410_v17  ;;  %v450_v31 = vadd.f32 %v5775_v6, %v411_v18  ;;  %v465_v35 = vadd.f32 %v5775_v6, %v426_v22  ;;  %v389_v38 = vld [vmem:[%s5750_s20 + $0xa0] sm:$0xff]  ;;  %v5300_v0 = vld [vmem:[#allocation6 + $0x148] sm:$0xff]   ;;  %v392_v4 = vld [vmem:[%s5750_s20 + $0xb8] sm:$0xff]  ;;  %p5471_p6 = pnand %p5470_p4, %p5696_p12  ;;  %s5549_s18 = smov [#allocation8]  }
  0x62   : > { %7954 = vst [vmem:[#allocation13_spill] sm:$0xff] %v5779_v9  ;;  %v463_v20 = vadd.f32 %v5775_v6, %v424_v10  ;;  %vm479_vm1 = vcmp.gt.f32.partialorder %v447_v15, 0.0  ;;  %vm480_vm2 = vcmp.gt.f32.partialorder %v448_v16, 0.0  ;;  %v512_v24 = vmul.f32 %v5779_v9, %v447_v15  ;;  %v5299_v54 = vld [vmem:[#allocation6 + $0x140] sm:$0xff]   ;;  %v378_v11 = vld [vmem:[%s5750_s20 + $0x48] sm:$0xff]  ;;  %v380_v37 = vld [vmem:[%s5750_s20 + $0x58] sm:$0xff] }
  0x63   : > { %v513_v25 = vmul.f32 %v5779_v9, %v448_v16  ;;  %vm496_vm4 = vcmp.gt.f32.partialorder %v464_v21, 0.0  ;;  %v529_v27 = vmul.f32 %v5779_v9, %v464_v21  ;;  %vm481_vm5 = vcmp.gt.f32.partialorder %v449_v30, 0.0  ;;  %4879 = vmatprep.subr.bf16.mxu0 %v5299_v54  ;;  %v377_v10 = vld [vmem:[%s5750_s20 + $0x40] sm:$0xff]  ;;  %p5472_p8 = pneg %p5471_p6  ;;  %s5473_s26 = sshll.u32 %s5549_s18, 4  ;;  %s5474_s26 = int_to_ptr.vmem [resolvable:$false] %s5473_s26 }
  0x64   : > { %vm495_vm3 = vcmp.gt.f32.partialorder %v463_v20, 0.0  ;;  %v528_v26 = vmul.f32 %v5779_v9, %v463_v20  ;;  %v544_v28 = vsel %vm479_vm1, %v447_v15, %v512_v24  ;;  %vm482_vm6 = vcmp.gt.f32.partialorder %v450_v31, 0.0  ;;  %v393_v19 = vld [vmem:[%s5750_s20 + $0xc0] sm:$0xff]  ;;  %v5302_v24 = vld [vmem:[#allocation6 + $0x158] sm:$0xff]   ;;  %s5475_s23 = scalar_lea.vmem %s5474_s26, 8192  ;;  %p5476_p10 = scmp.lt.s32.totalorder %s7784_s22, %s5474_s26 }
  0x65   : > { %v545_v29 = vsel %vm480_vm2, %v448_v16, %v513_v25  ;;  %v561_v34 = vsel %vm496_vm4, %v464_v21, %v529_v27  ;;  %v514_v40 = vmul.f32 %v5779_v9, %v449_v30  ;;  %v515_v41 = vmul.f32 %v5779_v9, %v450_v31  ;;  %p5477_p13 = scmp.lt.s32.totalorder %s5475_s23, %s5469_s30 }
  0x66   : > { %v576_v32 = vpack.c.bf16 %v545_v29, %v544_v28  ;;  %v560_v33 = vsel %vm495_vm3, %v463_v20, %v528_v26  ;;  %v466_v42 = vadd.f32 %v5775_v6, %v427_v23  ;;  %vm497_vm7 = vcmp.gt.f32.partialorder %v465_v35, 0.0  ;;  %v5301_v20 = vld [vmem:[#allocation6 + $0x150] sm:$0xff]   ;;  %v394_v23 = vld [vmem:[%s5750_s20 + $0xc8] sm:$0xff] }
  0x67   : > { %v584_v39 = vpack.c.bf16 %v561_v34, %v560_v33  ;;  %v530_v43 = vmul.f32 %v5779_v9, %v465_v35  ;;  %v546_v46 = vsel %vm481_vm5, %v449_v30, %v514_v40  ;;  %v412_v47 = vmul.f32 %v5768_v3, %v373_v36  ;;  %v379_v33 = vld [vmem:[%s5750_s20 + $0x50] sm:$0xff]  ;;  %p5478_p3 = por %p5477_p13, %p5476_p10 }
  0x68   : > { %4847 = vmatprep.mubr.msk.bf16.mxu0 %vm7878_vm0, %v576_v32  ;;  %v428_v49 = vmul.f32 %v5768_v3, %v389_v38  ;;  %v547_v51 = vsel %vm482_vm6, %v450_v31, %v515_v41  ;;  %vm498_vm8 = vcmp.gt.f32.partialorder %v466_v42, 0.0  ;;  %v531_v52 = vmul.f32 %v5779_v9, %v466_v42 }
  0x69   : > { %4863 = vmatprep.mubr.msk.bf16.mxu1 %vm7878_vm0, %v584_v39  ;;  %v562_v53 = vsel %vm497_vm7, %v465_v35, %v530_v43  ;;  %v577_v55 = vpack.c.bf16 %v547_v51, %v546_v46  ;;  %v451_v56 = vadd.f32 %v5775_v6, %v412_v47  ;;  %v452_v57 = vadd.f32 %v5775_v6, %v413_v48  ;;  %v396_v48 = vld [vmem:[%s5750_s20 + $0xd8] sm:$0xff]  ;;  %p5479_p7 = pnand %p5478_p3, %p5472_p8 }
  0x6a   : > { %v429_v58 = vmul.f32 %v5768_v3, %v390_v44  ;;  %v563_v60 = vsel %vm498_vm8, %v466_v42, %v531_v52  ;;  %v467_v61 = vadd.f32 %v5775_v6, %v428_v49  ;;  %v414_v62 = vmul.f32 %v5768_v3, %v375_v45  ;;  %v395_v45 = vld [vmem:[%s5750_s20 + $0xd0] sm:$0xff]  ;;  %v381_v49 = vld [vmem:[%s5750_s20 + $0x60] sm:$0xff] }
  0x6b   : > { %v415_v63 = vmul.f32 %v5768_v3, %v376_v50  ;;  %4848 = vmatmul.mubr.msk.bf16.vlgmr.msra.gmra.mrb[0].mxu0 %vm7878_vm0, %v577_v55  ;;  %v585_v1 = vpack.c.bf16 %v563_v60, %v562_v53  ;;  %vm483_vm9 = vcmp.gt.f32.partialorder %v451_v56, 0.0  ;;  %vm484_vm10 = vcmp.gt.f32.partialorder %v452_v57, 0.0  ;;  %v382_v50 = vld [vmem:[%s5750_s20 + $0x68] sm:$0xff] }
  0x6c   : > { %v516_v2 = vmul.f32 %v5779_v9, %v451_v56  ;;  %v517_v5 = vmul.f32 %v5779_v9, %v452_v57  ;;  %v468_v7 = vadd.f32 %v5775_v6, %v429_v58  ;;  %vm499_vm11 = vcmp.gt.f32.partialorder %v467_v61, 0.0  ;;  %4880 = vmatpush3.bf16.msra.mxu0 %v5299_v54 }
  0x6d   : > { %v532_v8 = vmul.f32 %v5779_v9, %v467_v61  ;;  %4864 = vmatmul.mubr.msk.bf16.vlgmr.msra.gmra.mrb[0].mxu1 %vm7878_vm0, %v585_v1  ;;  %v453_v13 = vadd.f32 %v5775_v6, %v414_v62  ;;  %v454_v14 = vadd.f32 %v5775_v6, %v415_v63  ;;  %v430_v15 = vmul.f32 %v5768_v3, %v391_v59 }
  0x6e   : > { %v548_v12 = vsel %vm483_vm9, %v451_v56, %v516_v2  ;;  %v549_v16 = vsel %vm484_vm10, %v452_v57, %v517_v5  ;;  %vm500_vm12 = vcmp.gt.f32.partialorder %v468_v7, 0.0  ;;  %v533_v17 = vmul.f32 %v5779_v9, %v468_v7  ;;  %4881 = vmatprep.subr.bf16.mxu0 %v5300_v0 }
  0x6f   : > { %v564_v18 = vsel %vm499_vm11, %v467_v61, %v532_v8  ;;  %v578_v21 = vpack.c.bf16 %v549_v16, %v548_v12  ;;  %vm485_vm13 = vcmp.gt.f32.partialorder %v453_v13, 0.0  ;;  %vm486_vm14 = vcmp.gt.f32.partialorder %v454_v14, 0.0  ;;  %v397_v61 = vld [vmem:[%s5750_s20 + $0xe0] sm:$0xff]  ;;  %v383_v16 = vld [vmem:[%s5750_s20 + $0x70] sm:$0xff] }
  0x70   : > { %v518_v22 = vmul.f32 %v5779_v9, %v453_v13  ;;  %v565_v25 = vsel %vm500_vm12, %v468_v7, %v533_v17  ;;  %v519_v26 = vmul.f32 %v5779_v9, %v454_v14  ;;  %v431_v27 = vmul.f32 %v5768_v3, %v392_v4  ;;  %4882 = vmatpush3.bf16.msra.mxu0 %v5300_v0  ;;  %v384_v17 = vld [vmem:[%s5750_s20 + $0x78] sm:$0xff] }
  0x71   : > { %v469_v28 = vadd.f32 %v5775_v6, %v430_v15  ;;  %4851 = vmatprep.mubr.msk.bf16.mxu0 %vm7878_vm0, %v578_v21  ;;  %v586_v29 = vpack.c.bf16 %v565_v25, %v564_v18  ;;  %v416_v31 = vmul.f32 %v5768_v3, %v377_v10  ;;  %v417_v32 = vmul.f32 %v5768_v3, %v378_v11  ;;  %v398_v11 = vld [vmem:[%s5750_s20 + $0xe8] sm:$0xff] }
  0x72   : > { %v550_v30 = vsel %vm485_vm13, %v453_v13, %v518_v22  ;;  %v551_v34 = vsel %vm486_vm14, %v454_v14, %v519_v26  ;;  %v470_v35 = vadd.f32 %v5775_v6, %v431_v27  ;;  %4883 = vmatprep.subr.bf16.mxu0 %v5301_v20  ;;  %v432_v41 = vmul.f32 %v5768_v3, %v393_v19  ;;  %v399_v26 = vld [vmem:[%s5750_s20 + $0xf0] sm:$0xff] }
  0x73   : > { %vm501_vm15 = vcmp.gt.f32.partialorder %v469_v28, 0.0  ;;  %v534_v36 = vmul.f32 %v5779_v9, %v469_v28  ;;  %4867 = vmatprep.mubr.msk.bf16.mxu1 %vm7878_vm0, %v586_v29  ;;  %v579_v38 = vpack.c.bf16 %v551_v34, %v550_v30  ;;  %v455_v39 = vadd.f32 %v5775_v6, %v416_v31  ;;  %v400_v31 = vld [vmem:[%s5750_s20 + $0xf8] sm:$0xff] }
  0x74   : > { %v456_v40 = vadd.f32 %v5775_v6, %v417_v32  ;;  %vm502_vm1 = vcmp.gt.f32.partialorder %v470_v35, 0.0  ;;  %v535_v42 = vmul.f32 %v5779_v9, %v470_v35  ;;  %v433_v44 = vmul.f32 %v5768_v3, %v394_v23  ;;  %4884 = vmatpush3.bf16.msra.mxu0 %v5301_v20 }
  0x75   : > { %v566_v43 = vsel %vm501_vm15, %v469_v28, %v534_v36  ;;  %4852 = vmatmul.mubr.msk.bf16.gmra.mrb[4].mxu0 %vm7878_vm0, %v579_v38  ;;  %vm487_vm2 = vcmp.gt.f32.partialorder %v455_v39, 0.0  ;;  %v520_v46 = vmul.f32 %v5779_v9, %v455_v39  ;;  %4885 = vmatprep.subr.bf16.mxu0 %v5302_v24  ;;  %v471_v52 = vadd.f32 %v5775_v6, %v432_v41 }
  0x76   : > { %vm488_vm3 = vcmp.gt.f32.partialorder %v456_v40, 0.0  ;;  %v521_v47 = vmul.f32 %v5779_v9, %v456_v40  ;;  %v567_v51 = vsel %vm502_vm1, %v470_v35, %v535_v42  ;;  %v472_v53 = vadd.f32 %v5775_v6, %v433_v44 }
  0x77   : > { %v418_v54 = vmul.f32 %v5768_v3, %v379_v33  ;;  %v587_v55 = vpack.c.bf16 %v567_v51, %v566_v43  ;;  %v552_v56 = vsel %vm487_vm2, %v455_v39, %v520_v46  ;;  %v419_v58 = vmul.f32 %v5768_v3, %v380_v37 }
  0x78   : > { %v553_v57 = vsel %vm488_vm3, %v456_v40, %v521_v47  ;;  %vm503_vm4 = vcmp.gt.f32.partialorder %v471_v52, 0.0  ;;  %vm504_vm5 = vcmp.gt.f32.partialorder %v472_v53, 0.0  ;;  %v536_v60 = vmul.f32 %v5779_v9, %v471_v52  ;;  %4886 = vmatpush3.bf16.msra.mxu0 %v5302_v24 }
  0x79   : > { %v580_v59 = vpack.c.bf16 %v553_v57, %v552_v56  ;;  %4868 = vmatmul.mubr.msk.bf16.gmra.mrb[4].mxu1 %vm7878_vm0, %v587_v55  ;;  %v537_v62 = vmul.f32 %v5779_v9, %v472_v53  ;;  %v457_v63 = vadd.f32 %v5775_v6, %v418_v54  ;;  %v458_v0 = vadd.f32 %v5775_v6, %v419_v58 }
  0x7a   : > { %v434_v1 = vmul.f32 %v5768_v3, %v395_v45  ;;  %v568_v2 = vsel %vm503_vm4, %v471_v52, %v536_v60  ;;  %v435_v4 = vmul.f32 %v5768_v3, %v396_v48  ;;  %v420_v5 = vmul.f32 %v5768_v3, %v381_v49 }
  0x7b   : > { %4855 = vmatprep.mubr.msk.bf16.mxu0 %vm7878_vm0, %v580_v59  ;;  %v421_v7 = vmul.f32 %v5768_v3, %v382_v50  ;;  %v569_v8 = vsel %vm504_vm5, %v472_v53, %v537_v62  ;;  %vm489_vm6 = vcmp.gt.f32.partialorder %v457_v63, 0.0  ;;  %vm490_vm7 = vcmp.gt.f32.partialorder %v458_v0, 0.0  ;;  %v5304_v62 = vld [vmem:[#allocation6 + $0x100] sm:$0xff]  }
  0x7c   : > { %v522_v10 = vmul.f32 %v5779_v9, %v457_v63  ;;  %v588_v12 = vpack.c.bf16 %v569_v8, %v568_v2  ;;  %v523_v13 = vmul.f32 %v5779_v9, %v458_v0  ;;  %v473_v14 = vadd.f32 %v5775_v6, %v434_v1  ;;  %4413 = vmatprep.subr.bf16.mxu1 %v5304_v62  ;;  %v5308_v1 = vld [vmem:[#allocation6 + $0xc8] sm:$0xff]   ;;  %v5309_v2 = vld [vmem:[#allocation6 + $0x170] sm:$0xff]   ;;  %v5313_v8 = vld [vmem:[#allocation6 + $0x118] sm:$0xff]  }
  0x7d   : > { %v474_v15 = vadd.f32 %v5775_v6, %v435_v4  ;;  %v459_v19 = vadd.f32 %v5775_v6, %v420_v5  ;;  %v460_v20 = vadd.f32 %v5775_v6, %v421_v7  ;;  %v436_v21 = vmul.f32 %v5768_v3, %v397_v61  ;;  %v5303_v61 = vld [vmem:[#allocation6 + $0x160] sm:$0xff]   ;;  %v5310_v4 = vld [vmem:[#allocation6 + $0x110] sm:$0xff]   ;;  %v5312_v7 = vld [vmem:[#allocation6 + $0x178] sm:$0xff]  }
  0x7e   : > { %v554_v18 = vsel %vm489_vm6, %v457_v63, %v522_v10  ;;  %4871 = vmatprep.mubr.msk.bf16.mxu1 %vm7878_vm0, %v588_v12  ;;  %v555_v22 = vsel %vm490_vm7, %v458_v0, %v523_v13  ;;  %vm505_vm8 = vcmp.gt.f32.partialorder %v473_v14, 0.0  ;;  %v538_v23 = vmul.f32 %v5779_v9, %v473_v14  ;;  %v5306_v63 = vld [vmem:[#allocation6 + $0x168] sm:$0xff]   ;;  %4887 = vmatprep.subr.bf16.mxu0 %v5303_v61  ;;  %v5311_v5 = vld [vmem:[#allocation6 + $0xd0] sm:$0xff]   ;;  %v5314_v10 = vld [vmem:[#allocation6 + $0xd8] sm:$0xff]  }
  0x7f   : > { %vm506_vm9 = vcmp.gt.f32.partialorder %v474_v15, 0.0  ;;  %v581_v24 = vpack.c.bf16 %v555_v22, %v554_v18  ;;  %v539_v25 = vmul.f32 %v5779_v9, %v474_v15  ;;  %vm491_vm10 = vcmp.gt.f32.partialorder %v459_v19, 0.0  ;;  %4888 = vmatpush3.bf16.msra.mxu0 %v5303_v61  ;;  %v5307_v0 = vld [vmem:[#allocation6 + $0x108] sm:$0xff]   ;;  %v5318_v12 = vld [vmem:[#allocation6 + $0xe0] sm:$0xff]   ;;  %v5325_v18 = vld [vmem:[#allocation6 + $0x138] sm:$0xff]  }
  0x80   : > { %vm492_vm11 = vcmp.gt.f32.partialorder %v460_v20, 0.0  ;;  %v570_v27 = vsel %vm505_vm8, %v473_v14, %v538_v23  ;;  %v524_v28 = vmul.f32 %v5779_v9, %v459_v19  ;;  %v525_v29 = vmul.f32 %v5779_v9, %v460_v20  ;;  %4889 = vmatprep.subr.bf16.mxu0 %v5306_v63  ;;  %v5315_v13 = vld [vmem:[#allocation6 + $0x40] sm:$0xff]   ;;  %v5319_v14 = vld [vmem:[#allocation6 + $0x128] sm:$0xff]  }
  0x81   : > { %v437_v30 = vmul.f32 %v5768_v3, %v398_v11  ;;  %4856 = vmatmul.mubr.msk.bf16.gmra.mrb[8].mxu0 %vm7878_vm0, %v581_v24  ;;  %v571_v32 = vsel %vm506_vm9, %v474_v15, %v539_v25  ;;  %v475_v33 = vadd.f32 %v5775_v6, %v436_v21  ;;  %v422_v34 = vmul.f32 %v5768_v3, %v383_v16  ;;  %v5317_v11 = vld [vmem:[#allocation6 + $0x120] sm:$0xff]   ;;  %v5320_v15 = vld [vmem:[#allocation6 + $0xe8] sm:$0xff]   ;;  %v5323_v16 = vld [vmem:[#allocation6 + $0x130] sm:$0xff]  }
  0x82   : > { %v423_v35 = vmul.f32 %v5768_v3, %v384_v17  ;;  %v589_v36 = vpack.c.bf16 %v571_v32, %v570_v27  ;;  %v556_v37 = vsel %vm491_vm10, %v459_v19, %v524_v28  ;;  %v557_v38 = vsel %vm492_vm11, %v460_v20, %v525_v29  ;;  %v5324_v17 = vld [vmem:[#allocation6 + $0xf0] sm:$0xff]   ;;  %v5326_v19 = vld [vmem:[#allocation6 + $0xf8] sm:$0xff]   ;;  %v5339_v20 = vld [vmem:[#allocation6 + $0x1c0] sm:$0xff]  }
  0x83   : > { %v476_v39 = vadd.f32 %v5775_v6, %v437_v30  ;;  %v582_v40 = vpack.c.bf16 %v557_v38, %v556_v37  ;;  %vm507_vm12 = vcmp.gt.f32.partialorder %v475_v33, 0.0  ;;  %v540_v41 = vmul.f32 %v5779_v9, %v475_v33  ;;  %4890 = vmatpush3.bf16.msra.mxu0 %v5306_v63 }
  0x84   : > { %v461_v42 = vadd.f32 %v5775_v6, %v422_v34  ;;  %4872 = vmatmul.mubr.msk.bf16.gmra.mrb[8].mxu1 %vm7878_vm0, %v589_v36  ;;  %v462_v44 = vadd.f32 %v5775_v6, %v423_v35  ;;  %v438_v45 = vmul.f32 %v5768_v3, %v399_v26  ;;  %v439_v48 = vmul.f32 %v5768_v3, %v400_v31 }
  0x85   : > { %vm508_vm13 = vcmp.gt.f32.partialorder %v476_v39, 0.0  ;;  %v541_v43 = vmul.f32 %v5779_v9, %v476_v39  ;;  %4859 = vmatprep.mubr.msk.bf16.mxu0 %vm7878_vm0, %v582_v40  ;;  %v572_v46 = vsel %vm507_vm12, %v475_v33, %v540_v41  ;;  %4891 = vmatprep.subr.bf16.mxu0 %v5309_v2  ;;  %v913_v21 = vlaneseq  ;;  %v5954_v33 = vld [vmem:[%s7839_s4] ss:$0 sm:$0xff] }
  0x86   : > { %vm493_vm14 = vcmp.gt.f32.partialorder %v461_v42, 0.0  ;;  %v526_v47 = vmul.f32 %v5779_v9, %v461_v42  ;;  %vm494_vm15 = vcmp.gt.f32.partialorder %v462_v44, 0.0  ;;  %v527_v50 = vmul.f32 %v5779_v9, %v462_v44 }
  0x87   : > { %v573_v49 = vsel %vm508_vm13, %v476_v39, %v541_v43  ;;  %v477_v51 = vadd.f32 %v5775_v6, %v438_v45  ;;  %v478_v54 = vadd.f32 %v5775_v6, %v439_v48  ;;  %v5305_v6 = vld [vmem:[#allocation6 + $0xc0] sm:$0xff]   ;;  %4892 = vmatpush3.bf16.msra.mxu0 %v5309_v2  ;;  %v5919_v22 = vshrl.u32 %v913_v21, 7 }
  0x88   : > { %v590_v52 = vpack.c.bf16 %v573_v49, %v572_v46  ;;  %v558_v53 = vsel %vm493_vm14, %v461_v42, %v526_v47  ;;  %v559_v55 = vsel %vm494_vm15, %v462_v44, %v527_v50  ;;  %4414 = vmatpush3.bf16.msra.mxu1 %v5305_v6  ;;  %4893 = vmatprep.subr.bf16.mxu0 %v5312_v7  ;;  %v5322_v42 = vld [vmem:[#allocation6 + $0x8] sm:$0xff]  }
  0x89   : > { %vm509_vm1 = vcmp.gt.f32.partialorder %v477_v51, 0.0  ;;  %v542_v56 = vmul.f32 %v5779_v9, %v477_v51  ;;  %v583_v57 = vpack.c.bf16 %v559_v55, %v558_v53  ;;  %vm510_vm2 = vcmp.gt.f32.partialorder %v478_v54, 0.0  ;;  %4415 = vmatprep.subr.bf16.mxu1 %v5307_v0 }
  0x8a   : > { %4875 = vmatprep.mubr.msk.bf16.mxu1 %vm7878_vm0, %v590_v52  ;;  %v543_v3 = vmul.f32 %v5779_v9, %v478_v54  ;;  %v5922_v23 = vadd.s32 8, %v5919_v22  ;;  %v5925_v24 = vadd.s32 24, %v5919_v22  ;;  %v5928_v25 = vadd.s32 40, %v5919_v22 }
  0x8b   : > { %v574_v58 = vsel %vm509_vm1, %v477_v51, %v542_v56  ;;  %4860 = vmatmul.mubr.msk.bf16.gmra.mrb[12].mxu0 %vm7878_vm0, %v583_v57  ;;  %v5931_v26 = vadd.s32 56, %v5919_v22  ;;  %v5934_v27 = vadd.s32 72, %v5919_v22  ;;  %v5937_v28 = vadd.s32 88, %v5919_v22 }
  0x8c   : > { %v575_v59 = vsel %vm510_vm2, %v478_v54, %v543_v3  ;;  %4416 = vmatpush3.bf16.msra.mxu1 %v5308_v1  ;;  %4894 = vmatpush3.bf16.msra.mxu0 %v5312_v7  ;;  %v5940_v29 = vadd.s32 104, %v5919_v22  ;;  %v5943_v30 = vadd.s32 120, %v5919_v22  ;;  %v5946_v31 = vadd.s32 16, %v5919_v22 }
  0x8d   : > { %v591_v60 = vpack.c.bf16 %v575_v59, %v574_v58  ;;  %4417 = vmatprep.subr.bf16.mxu1 %v5310_v4  ;;  %4549 = vmatprep.subr.bf16.mxu0 %v5315_v13  ;;  %v5949_v32 = vadd.s32 136, %v5919_v22  ;;  %v957_v34 = vand.u32 15, %v5922_v23  ;;  %vm7886_vm3 = vcmp.lt.s32.totalorder %v5919_v22, 7 }
  0x8e   : > { %v971_v35 = vand.u32 15, %v5925_v24  ;;  %v985_v36 = vand.u32 15, %v5928_v25  ;;  %vm7885_vm4 = vcmp.lt.s32.totalorder %v5919_v22, 1  ;;  %v5971_v48 = vadd.s32 152, %v5919_v22 }
  0x8f   : > { %4876 = vmatmul.mubr.msk.bf16.gmra.mrb[12].mxu1 %vm7878_vm0, %v591_v60  ;;  %v5975_v52 = vadd.s32 32, %v5919_v22  ;;  %v5978_v53 = vadd.s32 168, %v5919_v22  ;;  %v5981_v54 = vadd.s32 184, %v5919_v22  ;;  %v5986_v58 = vadd.s32 48, %v5919_v22 }
  0x90   : > { %4418 = vmatpush3.bf16.msra.mxu1 %v5311_v5  ;;  %v5991_v62 = vadd.s32 200, %v5919_v22  ;;  %vm6013_vm10 = vcmp.ne.s32.totalorder %v957_v34, 15  ;;  %vm6026_vm11 = vcmp.ne.s32.totalorder %v971_v35, 15 }
  0x91   : > { %4419 = vmatprep.subr.bf16.mxu1 %v5313_v8  ;;  %7955 = vst [vmem:[#allocation14_spill] sm:$0xff] %v5981_v54 }
  0x92   : > { %7956 = vst [vmem:[#allocation15_spill] sm:$0xff] %v5991_v62 }
  0x94   : > { %4420 = vmatpush3.bf16.msra.mxu1 %v5314_v10 }
  0x95   : > { %4421 = vmatprep.subr.bf16.mxu1 %v5317_v11 }
  0x98   : > { %4422 = vmatpush3.bf16.msra.mxu1 %v5318_v12 }
  0x99   : > { %4423 = vmatprep.subr.bf16.mxu1 %v5319_v14 }
  0x9c   : > { %4424 = vmatpush3.bf16.msra.mxu1 %v5320_v15 }
  0x9d   : > { %4425 = vmatprep.subr.bf16.mxu1 %v5323_v16 }
  0xa0   : > { %4426 = vmatpush3.bf16.msra.mxu1 %v5324_v17 }
  0xa1   : > { %4427 = vmatprep.subr.bf16.mxu1 %v5325_v18  ;;  %v5316_v18 = vld [vmem:[#allocation6] sm:$0xff]  }
  0xa4   : > { %4428 = vmatpush3.bf16.msra.mxu1 %v5326_v19 }
  0xa5   : > { %4685 = vmatprep.subr.bf16.mxu1 %v5339_v20 }
 0x13e   : > { %v4849_v39 = vpop.f32.mrb[0].mxu0 }
 0x13f   : > { %v699_v44 = vadd.f32 %v4849_v39, %v5954_v33  ;;  %v690_v45 = vpop.f32.mrb[1].mxu0 }
 0x140   : > { %v691_v49 = vadd.f32 %v5954_v33, %v690_v45  ;;  %v4850_v50 = vpop.f32.mrb[2].mxu0  ;;  %v4865_v51 = vpop.f32.mrb[0].mxu1 }
 0x141   : > { %vm819_vm5 = vcmp.gt.f32.partialorder %v699_v44, 0.0  ;;  %v851_v55 = vmul.f32 %v699_v44, %v5779_v9  ;;  %v702_v56 = vadd.f32 %v4850_v50, %v5954_v33  ;;  %v693_v57 = vpop.f32.mrb[3].mxu0  ;;  %v754_v3 = vpop.f32.mrb[1].mxu1  ;;  %v763_v0 = vadd.f32 %v4865_v51, %v5954_v33 }
 0x142   : > { %vm817_vm6 = vcmp.gt.f32.partialorder %v691_v49, 0.0  ;;  %v849_v59 = vmul.f32 %v691_v49, %v5779_v9  ;;  %v694_v60 = vadd.f32 %v5954_v33, %v693_v57  ;;  %v4866_v61 = vpop.f32.mrb[2].mxu1  ;;  %v755_v11 = vadd.f32 %v5954_v33, %v754_v3 }
 0x143   : > { %v5993_v6 = vsel %vm819_vm5, %v699_v44, %v851_v55  ;;  %vm820_vm7 = vcmp.gt.f32.partialorder %v702_v56, 0.0  ;;  %v852_v63 = vmul.f32 %v702_v56, %v5779_v9  ;;  %v757_v1 = vpop.f32.mrb[3].mxu1  ;;  %vm835_vm9 = vcmp.gt.f32.partialorder %v763_v0, 0.0  ;;  %v5321_v44 = vld [vmem:[#allocation6 + $0x48] sm:$0xff]  }
 0x144   : > { %vm818_vm8 = vcmp.gt.f32.partialorder %v694_v60, 0.0  ;;  %v6000_v7 = vsel %vm817_vm6, %v691_v49, %v849_v59  ;;  %v850_v10 = vmul.f32 %v694_v60, %v5779_v9  ;;  %v1557_v12 = vrot.slane %v5993_v6, 1 }
 0x145   : > { %v6002_v8 = vsel %vm820_vm7, %v702_v56, %v852_v63  ;;  %v867_v17 = vmul.f32 %v763_v0, %v5779_v9  ;;  %v7852_v20 = vrot.slane %v6000_v7, 7  ;;  %v865_v50 = vmul.f32 %v755_v11, %v5779_v9 }
 0x146   : > { %v1558_v13 = vrot.slane %v6002_v8, 1  ;;  %v6010_v16 = vsel %vm818_vm8, %v694_v60, %v850_v10  ;;  %v766_v51 = vadd.f32 %v4866_v61, %v5954_v33  ;;  %v7851_v55 = vrot.slane %v6000_v7, 1 }
 0x147   : > { %v7850_v23 = vrot.slane %v6010_v16, 7  ;;  %v6024_v39 = vpack.c.bf16 %v6010_v16, %v6000_v7  ;;  %vm833_vm12 = vcmp.gt.f32.partialorder %v755_v11, 0.0  ;;  %v6048_v61 = vsel %vm835_vm9, %v763_v0, %v867_v17 }
 0x148   : > { %v1616_v21 = vsel %vm7886_vm3, %v1557_v12, %v1558_v13  ;;  %v4853_v24 = vpop.f32.mrb[4].mxu0  ;;  %v1556_v63 = vrot.slane %v6010_v16, 1  ;;  %v6054_v14 = vsel %vm833_vm12, %v755_v11, %v865_v50  ;;  %vm836_vm15 = vcmp.gt.f32.partialorder %v766_v51, 0.0 }
 0x149   : > { %7959 = vst [vmem:[#allocation16_spill] sm:$0xff] %v6024_v39  ;;  %v715_v45 = vadd.f32 %v4853_v24, %v5954_v33  ;;  %v706_v49 = vpop.f32.mrb[5].mxu0  ;;  %v6041_v35 = vsel %vm7885_vm4, %v7852_v20, %v7850_v23  ;;  %2037 = vmatprep.mubr.bf16.mxu1 %v6024_v39  ;;  %v758_v15 = vadd.f32 %v5954_v33, %v757_v1  ;;  %vm7889_vm5 = vmmov 1  }
 0x14a   : > { %v707_v56 = vadd.f32 %v5954_v33, %v706_v49  ;;  %v4854_v57 = vpop.f32.mrb[6].mxu0  ;;  %v868_v11 = vmul.f32 %v766_v51, %v5779_v9  ;;  %vm6089_vm6 = vmpackc.low %vm6013_vm10, %vm7889_vm5  ;;  %vm6144_vm12 = vcmp.ne.s32.totalorder %v985_v36, 15 }
 0x14b   : > { %vm823_vm13 = vcmp.gt.f32.partialorder %v715_v45, 0.0  ;;  %v855_v3 = vmul.f32 %v715_v45, %v5779_v9  ;;  %v718_v59 = vadd.f32 %v4854_v57, %v5954_v33  ;;  %v709_v60 = vpop.f32.mrb[7].mxu0  ;;  %vm6102_vm7 = vmpackc.low %vm6026_vm11, %vm7889_vm5  ;;  %vm834_vm8 = vcmp.gt.f32.partialorder %v758_v15, 0.0 }
 0x14c   : > { %vm821_vm14 = vcmp.gt.f32.partialorder %v707_v56, 0.0  ;;  %v853_v10 = vmul.f32 %v707_v56, %v5779_v9  ;;  %v710_v24 = vadd.f32 %v5954_v33, %v709_v60  ;;  %v4869_v49 = vpop.f32.mrb[4].mxu1 }
 0x14d   : > { %v770_v57 = vpop.f32.mrb[5].mxu1  ;;  %v6057_v5 = vsel %vm823_vm13, %v715_v45, %v855_v3  ;;  %v856_v60 = vmul.f32 %v718_v59, %v5779_v9  ;;  %vm824_vm2 = vcmp.gt.f32.partialorder %v718_v59, 0.0 }
 0x14e   : > { %v6059_v0 = vsel %vm821_vm14, %v707_v56, %v853_v10  ;;  %vm822_vm1 = vcmp.gt.f32.partialorder %v710_v24, 0.0  ;;  %v4870_v2 = vpop.f32.mrb[6].mxu1  ;;  %v854_v23 = vmul.f32 %v710_v24, %v5779_v9  ;;  %v1617_v56 = vsel %vm7886_vm3, %v1556_v63, %v1557_v12 }
 0x14f   : > { %v7854_v4 = vrot.slane %v6059_v0, 1  ;;  %v773_v50 = vpop.f32.mrb[7].mxu1  ;;  %v7853_v34 = vrot.slane %v6057_v5, 1  ;;  %v1618_v12 = vsel %vm7886_vm3, %v7851_v55, %v1556_v63  ;;  %v7967_v63 = vmov 0 }
 0x150   : > { %v6075_v17 = vsel %vm822_vm1, %v710_v24, %v854_v23  ;;  %v6093_v23 = vsel %vm824_vm2, %v718_v59, %v856_v60  ;;  %v6095_v24 = vpack.c.bf16 %v1617_v56, %v1618_v12  ;;  %v7968_v63 = vsel %vm6102_vm7, 4294967295, %v7967_v63 }
 0x151   : > { %v1615_v10 = vsel %vm7886_vm3, %v1558_v13, %v7854_v4  ;;  %v7855_v1 = vrot.slane %v6075_v17, 1  ;;  %v7963_v13 = vmov 0  ;;  %7969 = vst [vmem:[#allocation20_spill] sm:$0xff] %v7968_v63  ;;  %v771_v3 = vadd.f32 %v5954_v33, %v770_v57 }
 0x152   : > { %v6079_v19 = vpack.c.bf16 %v1615_v10, %v1616_v21  ;;  %v7964_v13 = vsel %vm6089_vm6, 4294967295, %v7963_v13  ;;  %7966 = vst [vmem:[#allocation19_spill] sm:$0xff] %v6095_v24  ;;  %v866_v21 = vmul.f32 %v758_v15, %v5779_v9  ;;  %v779_v10 = vadd.f32 %v4869_v49, %v5954_v33  ;;  %4895 = vmatprep.mubr.msk.bf16.mxu0 %vm6089_vm6, %v6095_v24 }
 0x153   : > { %7965 = vst [vmem:[#allocation18_spill] sm:$0xff] %v7964_v13  ;;  %v6108_v59 = vadd.f32 %v4870_v2, %v5954_v33  ;;  %v6116_v49 = vsel %vm7886_vm3, %v7855_v1, %v7853_v34  ;;  %v6119_v60 = vsel %vm836_vm15, %v766_v51, %v868_v11  ;;  %v869_v12 = vmul.f32 %v771_v3, %v5779_v9 }
 0x154   : > { %7962 = vst [vmem:[#allocation17_spill] sm:$0xff] %v6079_v19  ;;  %v4857_v55 = vpop.f32.mrb[8].mxu0  ;;  %vm839_vm9 = vcmp.gt.f32.partialorder %v779_v10, 0.0  ;;  %v871_v2 = vmul.f32 %v779_v10, %v5779_v9  ;;  %4896 = vmatmul.mubr.msk.bf16.vlgmr.msra.gmra.mrb[16].mxu0 %vm6102_vm7, %v6079_v19  ;;  %v6134_v11 = vsel %vm834_vm8, %v758_v15, %v866_v21  ;;  %vm837_vm11 = vcmp.gt.f32.partialorder %v771_v3, 0.0  ;;  %v5327_v21 = vld [vmem:[#allocation6 + $0x50] sm:$0xff]  }
 0x155   : > { %v731_v57 = vadd.f32 %v4857_v55, %v5954_v33  ;;  %v722_v56 = vpop.f32.mrb[9].mxu0  ;;  %4550 = vmatpush3.bf16.msra.mxu0 %v5316_v18  ;;  %v6160_v38 = vsel %vm837_vm11, %v771_v3, %v869_v12  ;;  %vm840_vm15 = vcmp.gt.f32.partialorder %v6108_v59, 0.0  ;;  %v872_v25 = vmul.f32 %v6108_v59, %v5779_v9  ;;  %vm6208_vm11 = vmpackc.low %vm6144_vm12, %vm7889_vm5 }
 0x156   : > { %v723_v45 = vadd.f32 %v5954_v33, %v722_v56  ;;  %v4858_v51 = vpop.f32.mrb[10].mxu0  ;;  %v6137_v20 = vsel %vm839_vm9, %v779_v10, %v871_v2  ;;  %4551 = vmatprep.subr.bf16.mxu0 %v5321_v44  ;;  %v774_v56 = vadd.f32 %v5954_v33, %v773_v50  ;;  %v5328_v50 = vld [vmem:[#allocation6 + $0x10] sm:$0xff]   ;;  %v7993_v19 = vrot.slane %v6093_v23, 1 }
 0x157   : > { %v859_v55 = vmul.f32 %v731_v57, %v5779_v9  ;;  %v725_v46 = vpop.f32.mrb[11].mxu0  ;;  %v4873_v47 = vpop.f32.mrb[8].mxu1  ;;  %vm827_vm10 = vcmp.gt.f32.partialorder %v731_v57, 0.0  ;;  %v734_v2 = vadd.f32 %v4858_v51, %v5954_v33 }
 0x158   : > { %v786_v43 = vpop.f32.mrb[9].mxu1  ;;  %v857_v18 = vmul.f32 %v723_v45, %v5779_v9  ;;  %vm825_vm13 = vcmp.gt.f32.partialorder %v723_v45, 0.0  ;;  %v726_v40 = vadd.f32 %v5954_v33, %v725_v46  ;;  %v795_v10 = vadd.f32 %v4873_v47, %v5954_v33 }
 0x159   : > { %v4874_v34 = vpop.f32.mrb[10].mxu1  ;;  %v6156_v44 = vsel %vm827_vm10, %v731_v57, %v859_v55  ;;  %vm828_vm14 = vcmp.gt.f32.partialorder %v734_v2, 0.0  ;;  %4552 = vmatpush3.bf16.msra.mxu0 %v5322_v42  ;;  %v860_v51 = vmul.f32 %v734_v2, %v5779_v9  ;;  %v5329_v57 = vld [vmem:[#allocation6 + $0x58] sm:$0xff]   ;;  %v787_v3 = vadd.f32 %v5954_v33, %v786_v43 }
 0x15a   : > { %v789_v36 = vpop.f32.mrb[11].mxu1  ;;  %4553 = vmatprep.subr.bf16.mxu0 %v5327_v21  ;;  %v6167_v55 = vsel %vm825_vm13, %v723_v45, %v857_v18  ;;  %v798_v42 = vadd.f32 %v4874_v34, %v5954_v33  ;;  %vm826_vm1 = vcmp.gt.f32.partialorder %v726_v40, 0.0  ;;  %v858_v41 = vmul.f32 %v726_v40, %v5779_v9  ;;  %v5330_v34 = vld [vmem:[#allocation6 + $0x18] sm:$0xff]   ;;  %v5331_v21 = vld [vmem:[#allocation6 + $0x60] sm:$0xff]  }
 0x15b   : > { %v6172_v12 = vsel %vm828_vm14, %v734_v2, %v860_v51  ;;  %v870_v37 = vmul.f32 %v774_v56, %v5779_v9  ;;  %v6181_v47 = vsel %vm840_vm15, %v6108_v59, %v872_v25  ;;  %vm838_vm2 = vcmp.gt.f32.partialorder %v774_v56, 0.0  ;;  %v5332_v18 = vld [vmem:[#allocation6 + $0x20] sm:$0xff]  }
 0x15c   : > { %v6190_v25 = vsel %vm826_vm1, %v726_v40, %v858_v41  ;;  %vm843_vm8 = vcmp.gt.f32.partialorder %v795_v10, 0.0  ;;  %vm841_vm9 = vcmp.gt.f32.partialorder %v787_v3, 0.0  ;;  %vm844_vm10 = vcmp.gt.f32.partialorder %v798_v42, 0.0 }
 0x15d   : > { %4554 = vmatpush3.bf16.msra.mxu0 %v5328_v50  ;;  %v875_v50 = vmul.f32 %v795_v10, %v5779_v9  ;;  %v6195_v2 = vsel %vm838_vm2, %v774_v56, %v870_v37  ;;  %v876_v1 = vmul.f32 %v798_v42, %v5779_v9  ;;  %v7972_v40 = vrot.slane %v6075_v17, 1 }
 0x15e   : > { %v4861_v4 = vpop.f32.mrb[12].mxu0  ;;  %4555 = vmatprep.subr.bf16.mxu0 %v5329_v57  ;;  %v873_v57 = vmul.f32 %v787_v3, %v5779_v9  ;;  %v7973_v41 = vrot.slane %v6059_v0, 1  ;;  %v7974_v37 = vmov 0  ;;  %v790_v24 = vadd.f32 %v5954_v33, %v789_v36 }
 0x15f   : > { %v738_v43 = vpop.f32.mrb[13].mxu0  ;;  %v7975_v37 = vsel %vm6208_vm11, 4294967295, %v7974_v37  ;;  %v747_v39 = vadd.f32 %v4861_v4, %v5954_v33  ;;  %v8004_v15 = vrot.slane %v6190_v25, 1 }
 0x160   : > { %v4862_v46 = vpop.f32.mrb[14].mxu0  ;;  %v1614_v59 = vsel %vm7886_vm3, %v7973_v41, %v7972_v40  ;;  %7976 = vst [vmem:[#allocation21_spill] sm:$0xff] %v7975_v37  ;;  %v7978_v40 = vand.u32 15, %v5931_v26  ;;  %v6233_v4 = vsel %vm841_vm9, %v787_v3, %v873_v57  ;;  %v6236_v26 = vsel %vm844_vm10, %v798_v42, %v876_v1  ;;  %v5334_v3 = vld [vmem:[#allocation6 + $0x28] sm:$0xff]  }
 0x161   : > { %v741_v45 = vpop.f32.mrb[15].mxu0  ;;  %4556 = vmatpush3.bf16.msra.mxu0 %v5330_v34  ;;  %v6214_v13 = vpack.c.bf16 %v6116_v49, %v1614_v59  ;;  %v5333_v34 = vld [vmem:[#allocation6 + $0x68] sm:$0xff]   ;;  %v6229_v49 = vsel %vm843_vm8, %v795_v10, %v875_v50  ;;  %vm842_vm12 = vcmp.gt.f32.partialorder %v790_v24, 0.0  ;;  %v7981_v59 = vand.u32 15, %v5934_v27 }
 0x162   : > { %v4877_v63 = vpop.f32.mrb[12].mxu1  ;;  %vm6220_vm13 = vcmp.ne.s32.totalorder %v7978_v40, 15  ;;  %4557 = vmatprep.subr.bf16.mxu0 %v5331_v21  ;;  %v874_v21 = vmul.f32 %v790_v24, %v5779_v9  ;;  %vm831_vm15 = vcmp.gt.f32.partialorder %v747_v39, 0.0  ;;  %v739_v50 = vadd.f32 %v5954_v33, %v738_v43  ;;  %v5335_v40 = vld [vmem:[#allocation6 + $0x70] sm:$0xff]  }
 0x163   : > { %v802_v51 = vpop.f32.mrb[13].mxu1  ;;  %7977 = vst [vmem:[#allocation22_spill] sm:$0xff] %v6214_v13  ;;  %v811_v36 = vadd.f32 %v4877_v63, %v5954_v33  ;;  %4899 = vmatprep.mubr.msk.bf16.mxu0 %vm6208_vm11, %v6214_v13  ;;  %vm6244_vm14 = vcmp.ne.s32.totalorder %v7981_v59, 15  ;;  %v863_v63 = vmul.f32 %v747_v39, %v5779_v9  ;;  %v750_v27 = vadd.f32 %v4862_v46, %v5954_v33 }
 0x164   : > { %v4878_v56 = vpop.f32.mrb[14].mxu1  ;;  %v803_v57 = vadd.f32 %v5954_v33, %v802_v51  ;;  %v6257_v62 = vsel %vm842_vm12, %v790_v24, %v874_v21  ;;  %vm829_vm8 = vcmp.gt.f32.partialorder %v739_v50, 0.0  ;;  %v861_v24 = vmul.f32 %v739_v50, %v5779_v9  ;;  %v5336_v21 = vld [vmem:[#allocation6 + $0x30] sm:$0xff]  }
 0x165   : > { %v6224_v41 = vpop.f32.mrb[15].mxu1  ;;  %vm847_vm1 = vcmp.gt.f32.partialorder %v811_v36, 0.0  ;;  %v879_v1 = vmul.f32 %v811_v36, %v5779_v9  ;;  %4558 = vmatpush3.bf16.msra.mxu0 %v5332_v18  ;;  %v6259_v37 = vsel %vm831_vm15, %v747_v39, %v863_v63  ;;  %v7985_v18 = vand.u32 15, %v5919_v22 }
 0x166   : > { %4559 = vmatprep.subr.bf16.mxu0 %v5333_v34  ;;  %7984 = vst [vmem:[#allocation23_spill] sm:$0xff] %v6259_v37  ;;  %vm845_vm9 = vcmp.gt.f32.partialorder %v803_v57, 0.0  ;;  %v877_v39 = vmul.f32 %v803_v57, %v5779_v9  ;;  %vm832_vm10 = vcmp.gt.f32.partialorder %v750_v27, 0.0  ;;  %v864_v63 = vmul.f32 %v750_v27, %v5779_v9 }
 0x167   : > { %vm6263_vm2 = vcmp.ne.s32.totalorder %v7985_v18, 0  ;;  %v6271_v34 = vsel %vm847_vm1, %v811_v36, %v879_v1  ;;  %v814_v18 = vadd.f32 %v4878_v56, %v5954_v33  ;;  %v742_v43 = vadd.f32 %v5954_v33, %v741_v45  ;;  %v5337_v1 = vld [vmem:[#allocation6 + $0x78] sm:$0xff]  }
 0x168   : > { %v7988_v51 = vand.u32 15, %v5937_v28  ;;  %v6284_v46 = vsel %vm829_vm8, %v739_v50, %v861_v24  ;;  %v6286_v59 = vsel %vm845_vm9, %v803_v57, %v877_v39  ;;  %v7994_v45 = vmov %v7993_v19  ;;  %vm6317_vm9 = vmpackc.low %vm6220_vm13, %vm7889_vm5 }
 0x169   : > { %4560 = vmatpush3.bf16.msra.mxu0 %v5334_v3  ;;  %7991 = vst [vmem:[#allocation24_spill] sm:$0xff] %v6284_v46  ;;  %v7992_v3 = vrot.slane %v6167_v55, 1  ;;  %v7995_v28 = vrot.slane %v6057_v5, 1  ;;  %v1569_v57 = vrot.slane %v6259_v37, 1  ;;  %vm848_vm1 = vcmp.gt.f32.partialorder %v814_v18, 0.0  ;;  %vm6343_vm13 = vmpackc.low %vm6244_vm14, %vm7889_vm5 }
 0x16a   : > { %vm6280_vm12 = vcmp.ne.s32.totalorder %v7988_v51, 15  ;;  %4561 = vmatprep.subr.bf16.mxu0 %v5335_v40  ;;  %v7996_v40 = vand.u32 15, %v5940_v29  ;;  %vm830_vm8 = vcmp.gt.f32.partialorder %v742_v43, 0.0  ;;  %v7999_v29 = vmov 0  ;;  %vm6395_vm14 = vmpackc.low %vm7889_vm5, %vm6263_vm2 }
 0x16b   : > { %v1611_v56 = vsel %vm7886_vm3, %v7993_v19, %v7992_v3  ;;  %v1612_v51 = vsel %vm7886_vm3, %v7995_v28, %v7994_v45  ;;  %v1567_v19 = vrot.slane %v6284_v46, 1  ;;  %v6311_v3 = vsel %vm832_vm10, %v750_v27, %v864_v63  ;;  %v5338_v28 = vld [vmem:[#allocation6 + $0x38] sm:$0xff]  }
 0x16c   : > { %vm6302_vm15 = vcmp.ne.s32.totalorder %v7996_v40, 15  ;;  %v880_v45 = vmul.f32 %v814_v18, %v5779_v9  ;;  %v8000_v29 = vsel %vm6317_vm9, 4294967295, %v7999_v29  ;;  %v1570_v39 = vrot.slane %v6311_v3, 1 }
 0x16d   : > { %8001 = vst [vmem:[#allocation25_spill] sm:$0xff] %v8000_v29  ;;  %4562 = vmatpush3.bf16.msra.mxu0 %v5336_v21  ;;  %v862_v27 = vmul.f32 %v742_v43, %v5779_v9  ;;  %v6324_v63 = vpack.c.bf16 %v1611_v56, %v1612_v51  ;;  %v8003_v13 = vrot.slane %v6156_v44, 1  ;;  %v8005_v21 = vmov %v8004_v15 }
 0x16e   : > { %4563 = vmatprep.subr.bf16.mxu0 %v5337_v1  ;;  %v6326_v24 = vsel %vm848_vm1, %v814_v18, %v880_v45  ;;  %v8006_v40 = vrot.slane %v6167_v55, 1  ;;  %v8007_v18 = vmov 0  ;;  %v8010_v1 = vrot.slane %v6172_v12, 1  ;;  %v6357_v45 = vld [vmem:[#allocation6 + $0x80] sm:$0xff]  }
 0x16f   : > { %8002 = vst [vmem:[#allocation26_spill] sm:$0xff] %v6324_v63  ;;  %v1609_v54 = vsel %vm7886_vm3, %v8004_v15, %v8003_v13  ;;  %v8008_v18 = vsel %vm6343_vm13, 4294967295, %v8007_v18  ;;  %v8011_v13 = vand.u32 15, %v5946_v31  ;;  %v7873_v10 = vrot.slane %v6326_v24, 7  ;;  %4900 = vmatmul.mubr.msk.bf16.gmra.mrb[20].mxu0 %vm6317_vm9, %v6324_v63 }
 0x170   : > { %v1610_v37 = vsel %vm7886_vm3, %v8006_v40, %v8005_v21  ;;  %8009 = vst [vmem:[#allocation27_spill] sm:$0xff] %v8008_v18  ;;  %v1607_v56 = vsel %vm7886_vm3, %v8010_v1, %v1567_v19  ;;  %v6362_v15 = vsel %vm830_vm8, %v742_v43, %v862_v27  ;;  %v8016_v46 = vrot.slane %v6156_v44, 1  ;;  %vm6450_vm8 = vmpackc.low %vm6280_vm12, %vm7889_vm5 }
 0x171   : > { %vm6353_vm10 = vcmp.ne.s32.totalorder %v8011_v13, 0  ;;  %v6367_v21 = vpack.c.bf16 %v1609_v54, %v1610_v37  ;;  %v1568_v1 = vrot.slane %v6362_v15, 1  ;;  %v8015_v13 = vrot.slane %v6172_v12, 1  ;;  %4564 = vmatpush3.bf16.msra.mxu0 %v5338_v28  ;;  %vm6475_vm12 = vmpackc.low %vm6302_vm15, %vm7889_vm5 }
 0x172   : > { %v6379_v43 = vpack.c.bf16 %v6002_v8, %v5993_v6  ;;  %v8017_v27 = vrot.slane %v6000_v7, 7  ;;  %v8021_v28 = vrot.slane %v6054_v14, 1  ;;  %4927 = vmatprep.subr.bf16.mxu0 %v6357_v45  ;;  %v806_v36 = vadd.f32 %v5954_v33, %v6224_v41 }
 0x173   : > { %8014 = vst [vmem:[#allocation28_spill] sm:$0xff] %v6367_v21  ;;  %v1608_v40 = vsel %vm7886_vm3, %v8016_v46, %v8015_v13  ;;  %4903 = vmatprep.mubr.msk.bf16.mxu0 %vm6343_vm13, %v6367_v21  ;;  %v1606_v31 = vsel %vm7886_vm3, %v1567_v19, %v1568_v1  ;;  %v8115_v63 = vrot.slane %v6172_v12, 7  ;;  %v5360_v46 = vld [vmem:[#allocation6 + $0xa8] sm:$0xff]  }
 0x174   : > { %v1426_v54 = vsel %vm7885_vm4, %v7873_v10, %v8017_v27  ;;  %v6390_v37 = vpack.c.bf16 %v1607_v56, %v1608_v40  ;;  %v1603_v13 = vsel %vm7886_vm3, %v1570_v39, %v8021_v28  ;;  %v1604_v27 = vsel %vm7886_vm3, %v1569_v57, %v1570_v39 }
 0x175   : > { %v8022_v10 = vand.u32 15, %v5943_v30  ;;  %v6412_v42 = vpack.c.bf16 %v6041_v35, %v1426_v54  ;;  %v1605_v40 = vsel %vm7886_vm3, %v1568_v1, %v1569_v57  ;;  %v6418_v18 = vpack.c.bf16 %v1603_v13, %v1604_v27  ;;  %v5340_v30 = vld [vmem:[#allocation6 + $0x180] sm:$0xff]  }
 0x176   : > { %8018 = vst [vmem:[#allocation29_spill] sm:$0xff] %v6390_v37  ;;  %v8026_v28 = vand.u32 15, %v5949_v32  ;;  %v8030_v35 = vrot.slane %v6002_v8, 7  ;;  %v8031_v57 = vrot.slane %v5993_v6, 7  ;;  %v8033_v32 = vrot.slane %v6010_v16, 7 }
 0x177   : > { %vm6407_vm1 = vcmp.ne.s32.totalorder %v8022_v10, 15  ;;  %8025 = vst [vmem:[#allocation30_spill] sm:$0xff] %v6418_v18  ;;  %v6427_v10 = vpack.c.bf16 %v1605_v40, %v1606_v31  ;;  %v8034_v13 = vrot.slane %v6048_v61, 1  ;;  %v8035_v27 = vrot.slane %v6134_v11, 1  ;;  %3935 = vmatmul.mubr.msk.bf16.vlgmr.msra.gmra.mrb[16].mxu1 %vm6395_vm14, %v6412_v42  ;;  %4904 = vmatmul.mubr.msk.bf16.gmra.mrb[24].mxu0 %vm6450_vm8, %v6390_v37 }
 0x178   : > { %vm6422_vm2 = vcmp.ne.s32.totalorder %v8026_v28, 15  ;;  %v1423_v19 = vsel %vm7885_vm4, %v8031_v57, %v8030_v35  ;;  %v8032_v1 = vmov %v8031_v57  ;;  %v8036_v40 = vmov 0  ;;  %2045 = vmatprep.mubr.bf16.mxu1 %v6379_v43  ;;  %4686 = vmatpush3.bf16.msra.mxu1 %v5340_v30 }
 0x179   : > { %8029 = vst [vmem:[#allocation31_spill] sm:$0xff] %v6427_v10  ;;  %v1424_v54 = vsel %vm7885_vm4, %v8033_v32, %v8032_v1  ;;  %v1601_v31 = vsel %vm7886_vm3, %v8035_v27, %v8034_v13  ;;  %v8037_v40 = vsel %vm6450_vm8, 4294967295, %v8036_v40  ;;  %v8039_v16 = vmov %v8035_v27  ;;  %4907 = vmatprep.mubr.msk.bf16.mxu0 %vm6475_vm12, %v6427_v10 }
 0x17a   : > { %8038 = vst [vmem:[#allocation32_spill] sm:$0xff] %v8037_v40  ;;  %v6457_v6 = vpack.c.bf16 %v1423_v19, %v1424_v54  ;;  %v8040_v28 = vrot.slane %v6054_v14, 1  ;;  %v6469_v57 = vpack.c.bf16 %v6075_v17, %v6059_v0  ;;  %v8041_v19 = vmov 0 }
 0x17b   : > { %v8042_v19 = vsel %vm6475_vm12, 4294967295, %v8041_v19  ;;  %v8045_v32 = vrot.slane %v6160_v38, 1  ;;  %v8046_v54 = vrot.slane %v6119_v60, 1  ;;  %v8048_v27 = vrot.slane %v6075_v17, 7 }
 0x17c   : > { %v1602_v35 = vsel %vm7886_vm3, %v8040_v28, %v8039_v16  ;;  %8043 = vst [vmem:[#allocation33_spill] sm:$0xff] %v8042_v19  ;;  %v8049_v16 = vrot.slane %v6059_v0, 7  ;;  %v5342_v28 = vld [vmem:[#allocation6 + $0x1c8] sm:$0xff]   ;;  %vm846_vm15 = vcmp.gt.f32.partialorder %v806_v36, 0.0  ;;  %v8055_v0 = vrot.slane %v6137_v20, 1 }
 0x17d   : > { %v6479_v1 = vpack.c.bf16 %v1601_v31, %v1602_v35  ;;  %v1599_v33 = vsel %vm7886_vm3, %v8046_v54, %v8045_v32  ;;  %v8047_v41 = vmov %v8046_v54  ;;  %v878_v35 = vmul.f32 %v806_v36, %v5779_v9  ;;  %4687 = vmatprep.subr.bf16.mxu1 %v5342_v28 }
 0x17e   : > { %v1600_v50 = vsel %vm7886_vm3, %v8034_v13, %v8047_v41  ;;  %v1421_v31 = vsel %vm7885_vm4, %v8049_v16, %v8048_v27  ;;  %v8050_v32 = vmov %v8049_v16  ;;  %v8051_v54 = vrot.slane %v6002_v8, 7  ;;  %v5343_v27 = vld [vmem:[#allocation6 + $0x188] sm:$0xff]  }
 0x17f   : > { %8044 = vst [vmem:[#allocation34_spill] sm:$0xff] %v6479_v1  ;;  %v6500_v21 = vpack.c.bf16 %v1599_v33, %v1600_v50  ;;  %v8052_v13 = vand.u32 15, %v5975_v52  ;;  %v8056_v8 = vrot.slane %v6195_v2, 1  ;;  %v8058_v16 = vrot.slane %v6160_v38, 1  ;;  %4688 = vmatpush3.bf16.msra.mxu1 %v5343_v27 }
 0x180   : > { %v1422_v41 = vsel %vm7885_vm4, %v8051_v54, %v8050_v32  ;;  %v6533_v32 = vpack.c.bf16 %v6093_v23, %v6057_v5  ;;  %v6538_v54 = vsel %vm846_vm15, %v806_v36, %v878_v35  ;;  %v1375_v19 = vrot.slane %v6362_v15, 7  ;;  %vm6558_vm15 = vmpackc.low %vm7889_vm5, %vm6353_vm10  ;;  %v5365_v36 = vld [vmem:[#allocation6 + $0x210] sm:$0xff]  }
 0x181   : > { %vm6510_vm0 = vcmp.ne.s32.totalorder %v8052_v13, 0  ;;  %v6517_v33 = vpack.c.bf16 %v1421_v31, %v1422_v41  ;;  %v1597_v50 = vsel %vm7886_vm3, %v8056_v8, %v8055_v0  ;;  %v8057_v52 = vmov %v8056_v8  ;;  %v5345_v31 = vld [vmem:[#allocation6 + $0x1d0] sm:$0xff]   ;;  %3939 = vmatmul.mubr.msk.bf16.gmra.mrb[20].mxu1 %vm6558_vm15, %v6457_v6 }
 0x182   : > { %v1598_v30 = vsel %vm7886_vm3, %v8058_v16, %v8057_v52  ;;  %v8060_v13 = vrot.slane %v6233_v4, 1  ;;  %v8061_v0 = vrot.slane %v6181_v47, 1  ;;  %v8063_v16 = vrot.slane %v6137_v20, 1  ;;  %4689 = vmatprep.subr.bf16.mxu1 %v5345_v31  ;;  %2053 = vmatprep.mubr.bf16.mxu1 %v6469_v57 }
 0x183   : > { %v6540_v41 = vpack.c.bf16 %v1597_v50, %v1598_v30  ;;  %v1584_v35 = vrot.slane %v6538_v54, 1  ;;  %v8066_v50 = vand.u32 15, %v5971_v48  ;;  %v8079_v40 = vrot.slane %v6257_v62, 1 }
 0x184   : > { %v1595_v8 = vsel %vm7886_vm3, %v8061_v0, %v8060_v13  ;;  %v8062_v52 = vmov %v8061_v0  ;;  %v8069_v0 = vrot.slane %v6093_v23, 7  ;;  %v8091_v27 = vmov 0 }
 0x185   : > { %8059 = vst [vmem:[#allocation35_spill] sm:$0xff] %v6540_v41  ;;  %v1596_v9 = vsel %vm7886_vm3, %v8063_v16, %v8062_v52  ;;  %vm6565_vm4 = vcmp.ne.s32.totalorder %v8066_v50, 15  ;;  %v8070_v52 = vrot.slane %v6057_v5, 7  ;;  %vm8071_vm3 = vcmp.lt.s32.totalorder %v5919_v22, 1 }
 0x186   : > { %v6569_v13 = vpack.c.bf16 %v1595_v8, %v1596_v9  ;;  %v8072_v16 = vand.u32 15, %v5978_v53  ;;  %v8076_v50 = vrot.slane %v6075_v17, 7  ;;  %vm8077_vm5 = vmmov %vm8071_vm3  ;;  %v8078_v8 = vrot.slane %v6229_v49, 1  ;;  %v5346_v17 = vld [vmem:[#allocation6 + $0x190] sm:$0xff]  }
 0x187   : > { %v1419_v51 = vsel %vm8071_vm3, %v8070_v52, %v8069_v0  ;;  %v8075_v48 = vmov %v8070_v52  ;;  %vm8080_vm3 = vcmp.lt.s32.totalorder %v5919_v22, 7  ;;  %v8081_v53 = vmov %v8079_v40  ;;  %4690 = vmatpush3.bf16.msra.mxu1 %v5346_v17 }
 0x188   : > { %vm6579_vm10 = vcmp.ne.s32.totalorder %v8072_v16, 15  ;;  %v1420_v9 = vsel %vm8077_vm5, %v8076_v50, %v8075_v48  ;;  %v1593_v28 = vsel %vm8080_vm3, %v8079_v40, %v8078_v8  ;;  %v8082_v0 = vrot.slane %v6233_v4, 1  ;;  %vm8083_vm12 = vmmov %vm8080_vm3 }
 0x189   : > { %v6603_v5 = vpack.c.bf16 %v6190_v25, %v6167_v55  ;;  %v6605_v16 = vpack.c.bf16 %v1419_v51, %v1420_v9  ;;  %v8084_v50 = vrot.slane %v6286_v59, 1  ;;  %v8085_v40 = vrot.slane %v6236_v26, 1  ;;  %vm8086_vm5 = vmmov %vm8080_vm3 }
 0x18a   : > { %v1594_v52 = vsel %vm8083_vm12, %v8082_v0, %v8081_v53  ;;  %v8088_v53 = vrot.slane %v6229_v49, 1  ;;  %vm8089_vm12 = vmmov %vm8080_vm3  ;;  %vm8090_vm3 = vmmov 1   ;;  %v8094_v9 = vrot.slane %v6190_v25, 7 }
 0x18b   : > { %v6607_v48 = vpack.c.bf16 %v1593_v28, %v1594_v52  ;;  %v1591_v8 = vsel %vm8086_vm5, %v8085_v40, %v8084_v50  ;;  %v8087_v37 = vmov %v8085_v40  ;;  %vm6624_vm8 = vmpackc.low %vm6407_vm1, %vm8090_vm3  ;;  %v8095_v28 = vrot.slane %v6167_v55, 7 }
 0x18c   : > { %v1592_v0 = vsel %vm8089_vm12, %v8088_v53, %v8087_v37  ;;  %v8092_v27 = vsel %vm6624_vm8, 4294967295, %v8091_v27  ;;  %vm8096_vm5 = vcmp.lt.s32.totalorder %v5919_v22, 1  ;;  %v8098_v56 = vrot.slane %v6093_v23, 7  ;;  %vm6652_vm13 = vmpackc.low %vm6422_vm2, %vm8090_vm3  ;;  %4908 = vmatmul.mubr.msk.bf16.gmra.mrb[28].mxu0 %vm6624_vm8, %v6418_v18 }
 0x18d   : > { %8093 = vst [vmem:[#allocation36_spill] sm:$0xff] %v8092_v27  ;;  %v6631_v51 = vpack.c.bf16 %v1591_v8, %v1592_v0  ;;  %v1417_v37 = vsel %vm8096_vm5, %v8095_v28, %v8094_v9  ;;  %v8097_v31 = vmov %v8095_v28  ;;  %vm8099_vm1 = vmmov %vm8096_vm5  ;;  %v8100_v50 = vrot.slane %v6271_v34, 1  ;;  %4911 = vmatprep.mubr.msk.bf16.mxu0 %vm6652_vm13, %v6479_v1  ;;  %v5354_v27 = vld [vmem:[#allocation6 + $0x1e8] sm:$0xff]  }
 0x18e   : > { %v1418_v52 = vsel %vm8099_vm1, %v8098_v56, %v8097_v31  ;;  %v8101_v8 = vmov 0  ;;  %v8104_v23 = vrot.slane %v6286_v59, 1  ;;  %vm8105_vm5 = vmmov %vm8089_vm12  ;;  %v6665_v0 = vpack.c.bf16 %v6172_v12, %v6156_v44  ;;  %v5348_v31 = vld [vmem:[#allocation6 + $0x1d8] sm:$0xff]  }
 0x18f   : > { %v1589_v40 = vsel %vm8089_vm12, %v1584_v35, %v8100_v50  ;;  %v8102_v8 = vsel %vm6652_vm13, 4294967295, %v8101_v8  ;;  %v6657_v55 = vpack.c.bf16 %v1417_v37, %v1418_v52  ;;  %v8106_v9 = vrot.slane %v6326_v24, 1  ;;  %vm8108_vm2 = vmmov %vm8105_vm5  ;;  %4691 = vmatprep.subr.bf16.mxu1 %v5348_v31 }
 0x190   : > { %8103 = vst [vmem:[#allocation37_spill] sm:$0xff] %v8102_v8  ;;  %v1590_v53 = vsel %vm8105_vm5, %v8104_v23, %v1584_v35  ;;  %v8107_v39 = vmov %v8100_v50  ;;  %v8109_v37 = vand.u32 15, %v5986_v58  ;;  %v8112_v35 = vrot.slane %v6000_v7, 1  ;;  %vm8114_vm12 = vmmov %vm8108_vm2  ;;  %v5349_v7 = vld [vmem:[#allocation6 + $0x198] sm:$0xff]  }
 0x191   : > { %v1588_v28 = vsel %vm8108_vm2, %v8107_v39, %v8106_v9  ;;  %v6679_v52 = vpack.c.bf16 %v1589_v40, %v1590_v53  ;;  %v8113_v50 = vmov %v8106_v9  ;;  %v8116_v9 = vrot.slane %v6156_v44, 7  ;;  %4692 = vmatpush3.bf16.msra.mxu1 %v5349_v7 }
 0x192   : > { %vm6675_vm1 = vcmp.ne.s32.totalorder %v8109_v37, 0  ;;  %v1619_v23 = vsel %vm8114_vm12, %v8113_v50, %v8112_v35  ;;  %vm8117_vm5 = vcmp.lt.s32.totalorder %v5919_v22, 1  ;;  %v8119_v37 = vrot.slane %v6190_v25, 7  ;;  %v8121_v50 = vld [vmem:[#allocation24_spill] sm:$0xff] }
 0x193   : > { %v1415_v58 = vsel %vm8117_vm5, %v8116_v9, %v8115_v63  ;;  %v8118_v39 = vmov %v8116_v9  ;;  %vm8120_vm2 = vmmov %vm8117_vm5  ;;  %v6702_v53 = vpack.c.bf16 %v1619_v23, %v1588_v28  ;;  %v6708_v63 = vpack.c.bf16 %v6362_v15, %v8121_v50  ;;  %v5351_v9 = vld [vmem:[#allocation6 + $0x1e0] sm:$0xff]  }
 0x194   : > { %v1416_v40 = vsel %vm8120_vm2, %v8119_v37, %v8118_v39  ;;  %v8122_v44 = vrot.slane %v8121_v50, 7  ;;  %vm8123_vm12 = vmmov %vm8120_vm2  ;;  %v8125_v28 = vrot.slane %v6172_v12, 7  ;;  %v8128_v39 = vrot.slane %v6311_v3, 7  ;;  %4693 = vmatprep.subr.bf16.mxu1 %v5351_v9  ;;  %v8228_v12 = vld [vmem:[#allocation27_spill] sm:$0xff] }
 0x195   : > { %v6704_v35 = vpack.c.bf16 %v1415_v58, %v1416_v40  ;;  %vm8126_vm5 = vmmov %vm8120_vm2  ;;  %v8127_v58 = vld [vmem:[#allocation23_spill] sm:$0xff]  ;;  %v6750_v8 = vpack.c.bf16 %v6134_v11, %v6054_v14  ;;  %v6786_v1 = vpack.c.bf16 %v6195_v2, %v6160_v38  ;;  %v1387_v7 = vrot.slane %v6257_v62, 7 }
 0x196   : > { %v1413_v25 = vsel %vm8123_vm12, %v8122_v44, %v1375_v19  ;;  %v8124_v17 = vmov %v8122_v44  ;;  %v6725_v15 = vpack.c.bf16 %v6311_v3, %v8127_v58  ;;  %v8129_v37 = vrot.slane %v8127_v58, 7  ;;  %vm8131_vm12 = vmmov %vm8120_vm2 }
 0x197   : > { %v1414_v23 = vsel %vm8126_vm5, %v8125_v28, %v8124_v17  ;;  %vm6740_vm5 = vmpackc.low %vm8090_vm3, %vm6510_vm0  ;;  %v8134_v58 = vrot.slane %v6134_v11, 7  ;;  %v8148_v9 = vrot.slane %v6160_v38, 7  ;;  %v8151_v30 = vrot.slane %v6119_v60, 7 }
 0x198   : > { %v1411_v40 = vsel %vm8120_vm2, %v8129_v37, %v8128_v39  ;;  %v8130_v44 = vmov %v8129_v37  ;;  %v6744_v17 = vpack.c.bf16 %v1413_v25, %v1414_v23  ;;  %v8135_v39 = vrot.slane %v6054_v14, 7  ;;  %vm8138_vm0 = vmmov %vm8120_vm2  ;;  %3943 = vmatmul.mubr.msk.bf16.gmra.mrb[24].mxu1 %vm6740_vm5, %v6517_v33 }
 0x199   : > { %v1412_v50 = vsel %vm8131_vm12, %v1375_v19, %v8130_v44  ;;  %v1385_v19 = vrot.slane %v6181_v47, 7  ;;  %v8137_v25 = vrot.slane %v6311_v3, 7  ;;  %v8139_v44 = vrot.slane %v6119_v60, 7  ;;  %vm8141_vm12 = vmmov %vm8138_vm0  ;;  %2061 = vmatprep.mubr.bf16.mxu1 %v6533_v32 }
 0x19a   : > { %v6746_v28 = vpack.c.bf16 %v1411_v40, %v1412_v50  ;;  %v1409_v29 = vsel %vm8120_vm2, %v8135_v39, %v8134_v58  ;;  %v8136_v37 = vmov %v8135_v39  ;;  %v6767_v40 = vpack.c.bf16 %v6119_v60, %v6048_v61  ;;  %v5352_v58 = vld [vmem:[#allocation6 + $0x1a0] sm:$0xff]   ;;  %vm8144_vm2 = vmmov %vm8138_vm0 }
 0x19b   : > { %v1410_v23 = vsel %vm8138_vm0, %v8137_v25, %v8136_v37  ;;  %v8140_v50 = vrot.slane %v6048_v61, 7  ;;  %v1386_v14 = vrot.slane %v6233_v4, 7  ;;  %v8143_v37 = vrot.slane %v6134_v11, 7  ;;  %vm6792_vm0 = vmpackc.low %vm6565_vm4, %vm8090_vm3  ;;  %4694 = vmatpush3.bf16.msra.mxu1 %v5352_v58 }
 0x19c   : > { %v6776_v39 = vpack.c.bf16 %v1409_v29, %v1410_v23  ;;  %v8145_v29 = vmov 0  ;;  %v8147_v11 = vrot.slane %v6195_v2, 7  ;;  %vm8152_vm4 = vmmov %vm8144_vm2  ;;  %v6827_v38 = vpack.c.bf16 %v6181_v47, %v6137_v20  ;;  %v5355_v47 = vld [vmem:[#allocation6 + $0x1a8] sm:$0xff]   ;;  %4912 = vmatmul.mubr.msk.bf16.gmra.mrb[32].mxu0 %vm6792_vm0, %v6500_v21  ;;  %4695 = vmatprep.subr.bf16.mxu1 %v5354_v27 }
 0x19d   : > { %v1407_v31 = vsel %vm8141_vm12, %v8140_v50, %v8139_v44  ;;  %v8142_v3 = vmov %v8140_v50  ;;  %v8146_v29 = vsel %vm6792_vm0, 4294967295, %v8145_v29  ;;  %vm8149_vm12 = vmmov %vm8144_vm2  ;;  %v8150_v44 = vmov %v8148_v9  ;;  %v8236_v27 = vld [vmem:[#allocation30_spill] sm:$0xff] }
 0x19e   : > { %v1408_v25 = vsel %vm8144_vm2, %v8143_v37, %v8142_v3  ;;  %v1405_v23 = vsel %vm8149_vm12, %v8148_v9, %v8147_v11  ;;  %v1406_v50 = vsel %vm8152_vm4, %v8151_v30, %v8150_v44  ;;  %v1388_v3 = vrot.slane %v6229_v49, 7  ;;  %vm6818_vm2 = vmpackc.low %vm6579_vm10, %vm8090_vm3 }
 0x19f   : > { %v6799_v61 = vpack.c.bf16 %v1407_v31, %v1408_v25  ;;  %v1389_v37 = vrot.slane %v6236_v26, 7  ;;  %v8153_v31 = vmov 0  ;;  %v6823_v25 = vpack.c.bf16 %v1405_v23, %v1406_v50  ;;  %vm8157_vm12 = vmmov %vm8152_vm4  ;;  %4915 = vmatprep.mubr.msk.bf16.mxu0 %vm6818_vm2, %v6540_v41  ;;  %4696 = vmatpush3.bf16.msra.mxu1 %v5355_v47 }
 0x1a0   : > { %v8154_v31 = vsel %vm6818_vm2, 4294967295, %v8153_v31  ;;  %v922_v60 = vadd.s32 64, %v5919_v22  ;;  %v8156_v11 = vrot.slane %v6137_v20, 7  ;;  %v8159_v44 = vrot.slane %v6195_v2, 7  ;;  %vm8160_vm10 = vmmov %vm8152_vm4  ;;  %v8161_v20 = vld [vmem:[#allocation14_spill] sm:$0xff] }
 0x1a1   : > { %8155 = vst [vmem:[#allocation24_spill] sm:$0xff] %v8154_v31  ;;  %v6842_v23 = vpack.c.bf16 %v6257_v62, %v6233_v4  ;;  %v1390_v50 = vrot.slane %v6286_v59, 7  ;;  %v1391_v18 = vrot.slane %v6538_v54, 7  ;;  %v5356_v62 = vld [vmem:[#allocation6 + $0x1f0] sm:$0xff]   ;;  %v941_v4 = vadd.s32 216, %v5919_v22  ;;  %vm6873_vm0 = vmpackc.low %vm8090_vm3, %vm6675_vm1 }
 0x1a2   : > { %v1403_v9 = vsel %vm8157_vm12, %v8156_v11, %v1385_v19  ;;  %v8158_v10 = vmov %v8156_v11  ;;  %v8162_v11 = vand.u32 15, %v8161_v20  ;;  %vm8165_vm12 = vmmov %vm8160_vm10  ;;  %v6867_v20 = vpack.c.bf16 %v6236_v26, %v6229_v49  ;;  %4697 = vmatprep.subr.bf16.mxu1 %v5356_v62  ;;  %3947 = vmatmul.mubr.msk.bf16.gmra.mrb[28].mxu1 %vm6873_vm0, %v6605_v16 }
 0x1a3   : > { %v1404_v30 = vsel %vm8160_vm10, %v8159_v44, %v8158_v10  ;;  %v1401_v58 = vsel %vm8165_vm12, %v1386_v14, %v1387_v7  ;;  %v1402_v44 = vsel %vm8160_vm10, %v1385_v19, %v1386_v14  ;;  %vm8172_vm12 = vmmov %vm8160_vm10  ;;  %v1006_v26 = vand.u32 15, %v922_v60  ;;  %v5358_v60 = vld [vmem:[#allocation6 + $0x1f8] sm:$0xff]   ;;  %2069 = vmatprep.mubr.bf16.mxu1 %v6603_v5 }
 0x1a4   : > { %vm6851_vm4 = vcmp.ne.s32.totalorder %v8162_v11, 15  ;;  %v6855_v10 = vpack.c.bf16 %v1403_v9, %v1404_v30  ;;  %v1392_v9 = vrot.slane %v6271_v34, 7  ;;  %v8168_v30 = vld [vmem:[#allocation15_spill] sm:$0xff]  ;;  %v6883_v19 = vpack.c.bf16 %v1401_v58, %v1402_v44  ;;  %vm8173_vm1 = vmmov %vm8160_vm10 }
 0x1a5   : > { %v8169_v11 = vand.u32 15, %v8168_v30  ;;  %v1399_v49 = vsel %vm8172_vm12, %v1388_v3, %v1389_v37  ;;  %v943_v14 = vadd.s32 232, %v5919_v22  ;;  %v1400_v56 = vsel %vm8160_vm10, %v1387_v7, %v1388_v3  ;;  %v5357_v30 = vld [vmem:[#allocation6 + $0x1b0] sm:$0xff]   ;;  %vm8174_vm13 = vmmov %vm8173_vm1 }
 0x1a6   : > { %v6892_v41 = vpack.c.bf16 %v6538_v54, %v6286_v59  ;;  %v1397_v58 = vsel %vm8173_vm1, %v1390_v50, %v1391_v18  ;;  %v1398_v44 = vsel %vm8174_vm13, %v1389_v37, %v1390_v50  ;;  %vm6903_vm12 = vmpackc.low %vm6851_vm4, %vm8090_vm3  ;;  %v8175_v7 = vmov 0  ;;  %4698 = vmatpush3.bf16.msra.mxu1 %v5357_v30 }
 0x1a7   : > { %vm6879_vm2 = vcmp.ne.s32.totalorder %v8169_v11, 15  ;;  %v6894_v11 = vpack.c.bf16 %v1399_v49, %v1400_v56  ;;  %v8176_v7 = vsel %vm6903_vm12, 4294967295, %v8175_v7  ;;  %v6910_v59 = vpack.c.bf16 %v1397_v58, %v1398_v44  ;;  %vm8180_vm4 = vmmov %vm8173_vm1  ;;  %v5359_v49 = vld [vmem:[#allocation6 + $0x1b8] sm:$0xff]   ;;  %4916 = vmatmul.mubr.msk.bf16.gmra.mrb[36].mxu0 %vm6903_vm12, %v6569_v13  ;;  %4699 = vmatprep.subr.bf16.mxu1 %v5358_v60 }
 0x1a8   : > { %v6914_v54 = vpack.c.bf16 %v6326_v24, %v6271_v34  ;;  %vm6919_vm13 = vmpackc.low %vm6879_vm2, %vm8090_vm3  ;;  %v8177_v3 = vmov 0  ;;  %v1139_v37 = vand.u32 15, %v941_v4  ;;  %v8179_v47 = vrot.slane %v6326_v24, 7  ;;  %v8237_v24 = vld [vmem:[#allocation36_spill] sm:$0xff] }
 0x1a9   : > { %v8178_v3 = vsel %vm6919_vm13, 4294967295, %v8177_v3  ;;  %vm8181_vm10 = vmmov %vm8173_vm1  ;;  %vm4368_vm1 = vcmp.ne.s32.totalorder %v1006_v26, 0  ;;  %v1153_v34 = vand.u32 15, %v943_v14  ;;  %v924_v62 = vadd.s32 80, %v5919_v22  ;;  %4919 = vmatprep.mubr.msk.bf16.mxu0 %vm6919_vm13, %v6607_v48 }
 0x1aa   : > { %v1395_v50 = vsel %vm8180_vm4, %v1392_v9, %v8179_v47  ;;  %v1396_v2 = vsel %vm8181_vm10, %v1391_v18, %v1392_v9  ;;  %vm4393_vm2 = vcmp.ne.s32.totalorder %v1139_v37, 15  ;;  %vm6940_vm4 = vmpackc.low %vm8090_vm3, %vm4368_vm1  ;;  %v945_v18 = vadd.s32 248, %v5919_v22  ;;  %4700 = vmatpush3.bf16.msra.mxu1 %v5359_v49  ;;  %v5371_v49 = vld [vmem:[%s7842_s7] sm:$0xff]  }
 0x1ab   : > { %v6931_v31 = vpack.c.bf16 %v1395_v50, %v1396_v2  ;;  %vm4394_vm10 = vcmp.ne.s32.totalorder %v1153_v34, 15  ;;  %v1020_v4 = vand.u32 15, %v924_v62  ;;  %vm6946_vm8 = vmpackc.low %vm4393_vm2, %vm8090_vm3  ;;  %v8184_v9 = vmov 0  ;;  %3951 = vmatmul.mubr.msk.bf16.gmra.mrb[32].mxu1 %vm6940_vm4, %v6657_v55  ;;  %v5344_v2 = vld [vmem:[#allocation6 + $0x88] sm:$0xff]   ;;  %v8194_v62 = vld [vmem:[#allocation16_spill] sm:$0xff]  ;;  %5023 = vmatprep.subr.bf16.mxu1 %v5371_v49 }
 0x1ac   : > { %v8185_v9 = vsel %vm6946_vm8, 4294967295, %v8184_v9  ;;  %vm6954_vm13 = vmpackc.low %vm4394_vm10, %vm8090_vm3  ;;  %v8186_v26 = vmov 0  ;;  %2077 = vmatprep.mubr.bf16.mxu1 %v6665_v0  ;;  %v1167_v14 = vand.u32 15, %v945_v18  ;;  %v926_v56 = vadd.s32 96, %v5919_v22  ;;  %v5347_v18 = vld [vmem:[#allocation6 + $0x90] sm:$0xff]  }
 0x1ad   : > { %v8187_v26 = vsel %vm6954_vm13, 4294967295, %v8186_v26  ;;  %vm4369_vm1 = vcmp.ne.s32.totalorder %v1020_v4, 0  ;;  %v8190_v44 = vmov 0  ;;  %v928_v60 = vadd.s32 112, %v5919_v22 }
 0x1ae   : > { %vm4395_vm2 = vcmp.ne.s32.totalorder %v1167_v14, 15  ;;  %vm6967_vm10 = vmpackc.low %vm8090_vm3, %vm4369_vm1  ;;  %v1034_v58 = vand.u32 15, %v926_v56  ;;  %v5548_v37 = vmov 0   ;;  %v8192_v47 = vmov 0  ;;  %v5350_v14 = vld [vmem:[#allocation6 + $0x98] sm:$0xff]  }
 0x1af   : > { %4920 = vmatmul.mubr.msk.bf16.gmra.mrb[40].mxu0 %vm6946_vm8, %v6631_v51  ;;  %vm6972_vm12 = vmpackc.low %vm4395_vm2, %vm8090_vm3  ;;  %v1048_v50 = vand.u32 15, %v928_v60  ;;  %v930_v34 = vadd.s32 128, %v5919_v22 }
 0x1b0   : > { %4923 = vmatprep.mubr.msk.bf16.mxu0 %vm6954_vm13, %v6679_v52  ;;  %v8191_v44 = vsel %vm6972_vm12, 4294967295, %v8190_v44  ;;  %vm4370_vm8 = vcmp.ne.s32.totalorder %v1034_v58, 0  ;;  %v5353_v58 = vld [vmem:[#allocation6 + $0xa0] sm:$0xff]  }
 0x1b1   : > { %vm6986_vm1 = vmpackc.low %vm8090_vm3, %vm4370_vm8  ;;  %vm4371_vm2 = vcmp.ne.s32.totalorder %v1048_v50, 0  ;;  %v1062_v4 = vand.u32 15, %v930_v34 }
 0x1b2   : > { %v8193_v47 = vsel %vm6986_vm1, 4294967295, %v8192_v47  ;;  %vm6999_vm8 = vmpackc.low %vm8090_vm3, %vm4371_vm2 }
 0x1b3   : > { %3955 = vmatmul.mubr.msk.bf16.gmra.mrb[36].mxu1 %vm6967_vm10, %v6704_v35 }
 0x1b4   : > { %2085 = vmatprep.mubr.bf16.mxu1 %v6708_v63 }
 0x1b7   : > { %4924 = vmatmul.mubr.msk.bf16.gmra.mrb[44].mxu0 %vm6972_vm12, %v6702_v53  ;;  %vm4372_vm12 = vcmp.ne.s32.totalorder %v1062_v4, 0  ;;  %v8243_v4 = vld [vmem:[#allocation35_spill] sm:$0xff] }
 0x1b8   : > { %2503 = vmatprep.mubr.bf16.mxu0 %v5548_v37  ;;  %vm7013_vm2 = vmpackc.low %vm8090_vm3, %vm4372_vm12 }
 0x1bb   : > { %3959 = vmatmul.mubr.msk.bf16.gmra.mrb[40].mxu1 %vm6986_vm1, %v6744_v17 }
 0x1bc   : > { %2093 = vmatprep.mubr.bf16.mxu1 %v6725_v15 }
 0x1bf   : > { %2504 = vmatmul.mubr.bf16.vlgmr.msra.gmra.mrb[48].mxu0 %v5548_v37 }
 0x1c0   : > { %4928 = vmatpush3.bf16.msra.mxu0 %v6357_v45  ;;  %2511 = vmatprep.mubr.bf16.mxu0 %v8194_v62  ;;  %v932_v45 = vadd.s32 144, %v5919_v22  ;;  %v5362_v62 = vld [vmem:[#allocation6 + $0xb8] sm:$0xff]  }
 0x1c1   : > { %4929 = vmatprep.subr.bf16.mxu0 %v5344_v2 }
 0x1c2   : > { %v1076_v60 = vand.u32 15, %v932_v45 }
 0x1c3   : > { %3963 = vmatmul.mubr.msk.bf16.gmra.mrb[44].mxu1 %vm6999_vm8, %v6746_v28 }
 0x1c4   : > { %4930 = vmatpush3.bf16.msra.mxu0 %v5344_v2  ;;  %2101 = vmatprep.mubr.bf16.mxu1 %v6750_v8  ;;  %v5361_v2 = vld [vmem:[#allocation6 + $0xb0] sm:$0xff]  }
 0x1c5   : > { %4931 = vmatprep.subr.bf16.mxu0 %v5347_v18 }
 0x1c7   : > { %4087 = vmatmul.mubr.msk.bf16.gmra.mrb[52].mxu0 %vm6395_vm14, %v6412_v42  ;;  %vm4373_vm14 = vcmp.ne.s32.totalorder %v1076_v60, 0  ;;  %v934_v42 = vadd.s32 160, %v5919_v22 }
 0x1c8   : > { %2519 = vmatprep.mubr.bf16.mxu0 %v6379_v43  ;;  %4932 = vmatpush3.bf16.msra.mxu0 %v5347_v18  ;;  %vm7027_vm12 = vmpackc.low %vm8090_vm3, %vm4373_vm14  ;;  %v936_v18 = vadd.s32 176, %v5919_v22 }
 0x1c9   : > { %4933 = vmatprep.subr.bf16.mxu0 %v5350_v14  ;;  %v1090_v34 = vand.u32 15, %v934_v42  ;;  %v940_v42 = vadd.s32 208, %v5919_v22 }
 0x1ca   : > { %v1104_v45 = vand.u32 15, %v936_v18  ;;  %v8207_v18 = vmov 0 }
 0x1cb   : > { %3967 = vmatmul.mubr.msk.bf16.gmra.mrb[48].mxu1 %vm7013_vm2, %v6776_v39  ;;  %vm4374_vm13 = vcmp.ne.s32.totalorder %v1090_v34, 0  ;;  %v1132_v34 = vand.u32 15, %v940_v42 }
 0x1cc   : > { %4934 = vmatpush3.bf16.msra.mxu0 %v5350_v14  ;;  %2109 = vmatprep.mubr.bf16.mxu1 %v6767_v40  ;;  %vm7041_vm14 = vmpackc.low %vm8090_vm3, %vm4374_vm13  ;;  %v7045_v14 = vld [vmem:[#allocation6 + $0x200] sm:$0xff]   ;;  %vm4375_vm9 = vcmp.ne.s32.totalorder %v1104_v45, 0 }
 0x1cd   : > { %4935 = vmatprep.subr.bf16.mxu0 %v5353_v58  ;;  %vm7058_vm13 = vmpackc.low %vm8090_vm3, %vm4375_vm9  ;;  %vm4377_vm7 = vcmp.ne.s32.totalorder %v1132_v34, 0 }
 0x1cf   : > { %4091 = vmatmul.mubr.msk.bf16.gmra.mrb[56].mxu0 %vm6558_vm15, %v6457_v6 }
 0x1d0   : > { %2527 = vmatprep.mubr.bf16.mxu0 %v6469_v57  ;;  %4936 = vmatpush3.bf16.msra.mxu0 %v5353_v58  ;;  %v938_v58 = vadd.s32 192, %v5919_v22 }
 0x1d1   : > { %4937 = vmatprep.subr.bf16.mxu0 %v5360_v46 }
 0x1d3   : > { %3971 = vmatmul.mubr.msk.bf16.gmra.mrb[52].mxu1 %vm7027_vm12, %v6799_v61 }
 0x1d4   : > { %4938 = vmatpush3.bf16.msra.mxu0 %v5360_v46  ;;  %2117 = vmatprep.mubr.bf16.mxu1 %v6786_v1  ;;  %v1118_v46 = vand.u32 15, %v938_v58  ;;  %v944_v58 = vadd.s32 240, %v5919_v22 }
 0x1d5   : > { %4939 = vmatprep.subr.bf16.mxu0 %v5361_v2 }
 0x1d6   : > { %vm4376_vm11 = vcmp.ne.s32.totalorder %v1118_v46, 0  ;;  %v1160_v42 = vand.u32 15, %v944_v58  ;;  %v5373_v46 = vld [vmem:[%s7842_s7 + $0x10] sm:$0xff]  }
 0x1d7   : > { %4095 = vmatmul.mubr.msk.bf16.gmra.mrb[60].mxu0 %vm6740_vm5, %v6517_v33  ;;  %vm7072_vm9 = vmpackc.low %vm8090_vm3, %vm4376_vm11 }
 0x1d8   : > { %2535 = vmatprep.mubr.bf16.mxu0 %v6533_v32  ;;  %4940 = vmatpush3.bf16.msra.mxu0 %v5361_v2  ;;  %vm7086_vm11 = vmpackc.low %vm8090_vm3, %vm4377_vm7  ;;  %v5372_v2 = vld [vmem:[%s7842_s7 + $0x8] sm:$0xff]  }
 0x1d9   : > { %4941 = vmatprep.subr.bf16.mxu0 %v5362_v62  ;;  %v8208_v18 = vsel %vm7086_vm11, 4294967295, %v8207_v18 }
 0x1db   : > { %3975 = vmatmul.mubr.msk.bf16.gmra.mrb[56].mxu1 %vm7041_vm14, %v6823_v25 }
 0x1dc   : > { %4942 = vmatpush3.bf16.msra.mxu0 %v5362_v62  ;;  %2125 = vmatprep.mubr.bf16.mxu1 %v6827_v38  ;;  %v942_v62 = vadd.s32 224, %v5919_v22 }
 0x1dd   : > { %4975 = vmatprep.subr.bf16.mxu0 %v7045_v14 }
 0x1de   : > { %v1146_v45 = vand.u32 15, %v942_v62 }
 0x1df   : > { %4099 = vmatmul.mubr.msk.bf16.gmra.mrb[64].mxu0 %vm6873_vm0, %v6605_v16 }
 0x1e0   : > { %2543 = vmatprep.mubr.bf16.mxu0 %v6603_v5  ;;  %vm4378_vm6 = vcmp.ne.s32.totalorder %v1146_v45, 0 }
 0x1e1   : > { %vm7100_vm7 = vmpackc.low %vm8090_vm3, %vm4378_vm6  ;;  %vm8213_vm6 = vnez %v8208_v18 }
 0x1e3   : > { %3979 = vmatmul.mubr.msk.bf16.gmra.mrb[60].mxu1 %vm7058_vm13, %v6855_v10 }
 0x1e4   : > { %2133 = vmatprep.mubr.bf16.mxu1 %v6842_v23 }
 0x1e7   : > { %4103 = vmatmul.mubr.msk.bf16.gmra.mrb[68].mxu0 %vm6940_vm4, %v6657_v55 }
 0x1e8   : > { %2551 = vmatprep.mubr.bf16.mxu0 %v6665_v0 }
 0x1eb   : > { %3983 = vmatmul.mubr.msk.bf16.gmra.mrb[64].mxu1 %vm7072_vm9, %v6883_v19 }
 0x1ec   : > { %2141 = vmatprep.mubr.bf16.mxu1 %v6867_v20 }
 0x1ef   : > { %4107 = vmatmul.mubr.msk.bf16.gmra.mrb[72].mxu0 %vm6967_vm10, %v6704_v35 }
 0x1f0   : > { %2559 = vmatprep.mubr.bf16.mxu0 %v6708_v63 }
 0x1f3   : > { %3987 = vmatmul.mubr.msk.bf16.gmra.mrb[68].mxu1 %vm7086_vm11, %v6894_v11  ;;  %vm4379_vm11 = vcmp.ne.s32.totalorder %v1160_v42, 0 }
 0x1f4   : > { %2149 = vmatprep.mubr.bf16.mxu1 %v6892_v41 }
 0x1f7   : > { %4111 = vmatmul.mubr.msk.bf16.gmra.mrb[76].mxu0 %vm6986_vm1, %v6744_v17  ;;  %vm7113_vm1 = vmpackc.low %vm8090_vm3, %vm4379_vm11  ;;  %vm8242_vm11 = vnez %v8146_v29 }
 0x1f8   : > { %2567 = vmatprep.mubr.bf16.mxu0 %v6725_v15 }
 0x1fb   : > { %3991 = vmatmul.mubr.msk.bf16.gmra.mrb[72].mxu1 %vm7100_vm7, %v6910_v59 }
 0x1fc   : > { %2157 = vmatprep.mubr.bf16.mxu1 %v6914_v54 }
 0x1ff   : > { %4115 = vmatmul.mubr.msk.bf16.gmra.mrb[80].mxu0 %vm6999_vm8, %v6746_v28 }
 0x200   : > { %2575 = vmatprep.mubr.bf16.mxu0 %v6750_v8 }
 0x203   : > { %3995 = vmatmul.mubr.msk.bf16.gmra.mrb[76].mxu1 %vm7113_vm1, %v6931_v31 }
 0x204   : > { %3018 = vmatprep.mubr.bf16.mxu1 %v6379_v43  ;;  %v5364_v43 = vld [vmem:[#allocation6 + $0x208] sm:$0xff]  }
 0x207   : > { %4119 = vmatmul.mubr.msk.bf16.gmra.mrb[84].mxu0 %vm7013_vm2, %v6776_v39 }
 0x208   : > { %2583 = vmatprep.mubr.bf16.mxu0 %v6767_v40 }
 0x20b   : > { %4231 = vmatmul.mubr.msk.bf16.vlgmr.msra.gmra.mrb[80].mxu1 %vm6558_vm15, %v6457_v6  ;;  %vm8214_vm15 = vnez %v8193_v47  ;;  %v8215_v6 = vld [vmem:[#allocation19_spill] sm:$0xff] }
 0x20c   : > { %3026 = vmatprep.mubr.bf16.mxu1 %v6469_v57  ;;  %v8216_v57 = vld [vmem:[#allocation18_spill] sm:$0xff]  ;;  %5024 = vmatpush3.bf16.msra.mxu1 %v5371_v49 }
 0x20d   : > { %vm8217_vm3 = vnez %v8216_v57  ;;  %5025 = vmatprep.subr.bf16.mxu1 %v5372_v2 }
 0x20f   : > { %4123 = vmatmul.mubr.msk.bf16.gmra.mrb[88].mxu0 %vm7027_vm12, %v6799_v61 }
 0x210   : > { %2591 = vmatprep.mubr.bf16.mxu0 %v6786_v1  ;;  %5026 = vmatpush3.bf16.msra.mxu1 %v5372_v2 }
 0x211   : > { %5027 = vmatprep.subr.bf16.mxu1 %v5373_v46 }
 0x213   : > { %4235 = vmatmul.mubr.msk.bf16.gmra.mrb[84].mxu1 %vm6740_vm5, %v6517_v33  ;;  %v8218_v33 = vld [vmem:[#allocation17_spill] sm:$0xff] }
 0x214   : > { %3034 = vmatprep.mubr.bf16.mxu1 %v6533_v32  ;;  %v8219_v32 = vld [vmem:[#allocation20_spill] sm:$0xff]  ;;  %5028 = vmatpush3.bf16.msra.mxu1 %v5373_v46 }
 0x215   : > { %vm8220_vm5 = vnez %v8219_v32 }
 0x217   : > { %4127 = vmatmul.mubr.msk.bf16.gmra.mrb[92].mxu0 %vm7041_vm14, %v6823_v25 }
 0x218   : > { %2599 = vmatprep.mubr.bf16.mxu0 %v6827_v38 }
 0x21b   : > { %4239 = vmatmul.mubr.msk.bf16.gmra.mrb[88].mxu1 %vm6873_vm0, %v6605_v16  ;;  %v8221_v16 = vld [vmem:[#allocation22_spill] sm:$0xff] }
 0x21c   : > { %3042 = vmatprep.mubr.bf16.mxu1 %v6603_v5  ;;  %v5366_v5 = vld [vmem:[#allocation6 + $0x218] sm:$0xff]  }
 0x21f   : > { %4131 = vmatmul.mubr.msk.bf16.gmra.mrb[96].mxu0 %vm7058_vm13, %v6855_v10 }
 0x220   : > { %2607 = vmatprep.mubr.bf16.mxu0 %v6842_v23 }
 0x223   : > { %4243 = vmatmul.mubr.msk.bf16.gmra.mrb[92].mxu1 %vm6940_vm4, %v6657_v55  ;;  %v8224_v55 = vld [vmem:[#allocation26_spill] sm:$0xff] }
 0x224   : > { %3050 = vmatprep.mubr.bf16.mxu1 %v6665_v0  ;;  %v8225_v0 = vld [vmem:[#allocation25_spill] sm:$0xff] }
 0x225   : > { %vm8226_vm4 = vnez %v8225_v0 }
 0x227   : > { %4135 = vmatmul.mubr.msk.bf16.gmra.mrb[100].mxu0 %vm7072_vm9, %v6883_v19 }
 0x228   : > { %2615 = vmatprep.mubr.bf16.mxu0 %v6867_v20 }
 0x22b   : > { %4247 = vmatmul.mubr.msk.bf16.gmra.mrb[96].mxu1 %vm6967_vm10, %v6704_v35  ;;  %v5367_v35 = vld [vmem:[#allocation6 + $0x220] sm:$0xff]   ;;  %vm8229_vm10 = vnez %v8228_v12  ;;  %v5374_v12 = vld [vmem:[%s7842_s7 + $0x18] sm:$0xff]  }
 0x22c   : > { %3058 = vmatprep.mubr.bf16.mxu1 %v6708_v63  ;;  %v5368_v63 = vld [vmem:[#allocation6 + $0x228] sm:$0xff]   ;;  %5029 = vmatprep.subr.bf16.mxu1 %v5374_v12 }
 0x22d   : > { %5030 = vmatpush3.bf16.msra.mxu1 %v5374_v12 }
 0x22f   : > { %4139 = vmatmul.mubr.msk.bf16.gmra.mrb[104].mxu0 %vm8213_vm6, %v6894_v11 }
 0x230   : > { %2623 = vmatprep.mubr.bf16.mxu0 %v6892_v41 }
 0x233   : > { %4251 = vmatmul.mubr.msk.bf16.gmra.mrb[100].mxu1 %vm8214_vm15, %v6744_v17  ;;  %v8230_v17 = vld [vmem:[#allocation29_spill] sm:$0xff]  ;;  %vm8246_vm15 = vnez %v8176_v7 }
 0x234   : > { %3066 = vmatprep.mubr.bf16.mxu1 %v6725_v15  ;;  %v8227_v15 = vld [vmem:[#allocation28_spill] sm:$0xff] }
 0x237   : > { %4143 = vmatmul.mubr.msk.bf16.gmra.mrb[108].mxu0 %vm7100_vm7, %v6910_v59 }
 0x238   : > { %4943 = vmatprep.mubr.bf16.mxu0 %v5548_v37 }
 0x23b   : > { %4255 = vmatmul.mubr.msk.bf16.gmra.mrb[104].mxu1 %vm6999_vm8, %v6746_v28  ;;  %v8231_v28 = vld [vmem:[#allocation32_spill] sm:$0xff] }
 0x23c   : > { %3074 = vmatprep.mubr.bf16.mxu1 %v6750_v8  ;;  %v8222_v8 = vld [vmem:[#allocation21_spill] sm:$0xff]  ;;  %vm8232_vm8 = vnez %v8231_v28 }
 0x23d   : > { %vm8223_vm0 = vnez %v8222_v8 }
 0x23f   : > { %4944 = vmatmul.mubr.msk.bf16.vlgmr.msra.gmra.mrb[16].mxu0 %vm8217_vm3, %v8215_v6  ;;  %vm8248_vm3 = vnez %v8185_v9 }
 0x240   : > { %4976 = vmatpush3.bf16.msra.mxu0 %v7045_v14  ;;  %4947 = vmatprep.mubr.msk.bf16.mxu0 %vm8220_vm5, %v8218_v33  ;;  %v8244_v14 = vld [vmem:[#allocation24_spill] sm:$0xff] }
 0x241   : > { %4977 = vmatprep.subr.bf16.mxu0 %v5364_v43 }
 0x243   : > { %4259 = vmatmul.mubr.msk.bf16.gmra.mrb[108].mxu1 %vm7013_vm2, %v6776_v39  ;;  %v8233_v39 = vld [vmem:[#allocation31_spill] sm:$0xff] }
 0x244   : > { %4978 = vmatpush3.bf16.msra.mxu0 %v5364_v43  ;;  %3082 = vmatprep.mubr.bf16.mxu1 %v6767_v40  ;;  %v5369_v40 = vld [vmem:[#allocation6 + $0x230] sm:$0xff]  }
 0x245   : > { %4979 = vmatprep.subr.bf16.mxu0 %v5365_v36 }
 0x247   : > { %4948 = vmatmul.mubr.msk.bf16.gmra.mrb[20].mxu0 %vm8223_vm0, %v8221_v16 }
 0x248   : > { %4951 = vmatprep.mubr.msk.bf16.mxu0 %vm8226_vm4, %v8224_v55  ;;  %4980 = vmatpush3.bf16.msra.mxu0 %v5365_v36 }
 0x249   : > { %4981 = vmatprep.subr.bf16.mxu0 %v5366_v5 }
 0x24a   : > { %v4429_v30 = vpop.f32.mrb[16].mxu1 }
 0x24b   : > { %4263 = vmatmul.mubr.msk.bf16.gmra.mrb[112].mxu1 %vm7027_vm12, %v6799_v61  ;;  %v8234_v61 = vld [vmem:[#allocation33_spill] sm:$0xff]  ;;  %vm8238_vm12 = vnez %v8237_v24  ;;  %v4430_v47 = vpop.f32.mrb[17].mxu1 }
 0x24c   : > { %4982 = vmatpush3.bf16.msra.mxu0 %v5366_v5  ;;  %3090 = vmatprep.mubr.bf16.mxu1 %v6786_v1  ;;  %v5370_v1 = vld [vmem:[#allocation6 + $0x238] sm:$0xff]   ;;  %vm8235_vm2 = vnez %v8234_v61  ;;  %v7227_v56 = vadd.f32 %v4430_v47, %v4429_v30 }
 0x24d   : > { %4983 = vmatprep.subr.bf16.mxu0 %v5367_v35 }
 0x24f   : > { %4952 = vmatmul.mubr.msk.bf16.gmra.mrb[24].mxu0 %vm8229_vm10, %v8227_v15 }
 0x250   : > { %4955 = vmatprep.mubr.msk.bf16.mxu0 %vm8232_vm8, %v8230_v17  ;;  %4984 = vmatpush3.bf16.msra.mxu0 %v5367_v35 }
 0x251   : > { %4985 = vmatprep.subr.bf16.mxu0 %v5368_v63 }
 0x253   : > { %4267 = vmatmul.mubr.msk.bf16.gmra.mrb[116].mxu1 %vm7041_vm14, %v6823_v25  ;;  %v8239_v25 = vld [vmem:[#allocation34_spill] sm:$0xff] }
 0x254   : > { %4986 = vmatpush3.bf16.msra.mxu0 %v5368_v63  ;;  %3098 = vmatprep.mubr.bf16.mxu1 %v6827_v38  ;;  %v8240_v38 = vld [vmem:[#allocation37_spill] sm:$0xff] }
 0x255   : > { %4987 = vmatprep.subr.bf16.mxu0 %v5369_v40  ;;  %vm8241_vm14 = vnez %v8240_v38 }
 0x257   : > { %4956 = vmatmul.mubr.msk.bf16.gmra.mrb[28].mxu0 %vm8235_vm2, %v8233_v39 }
 0x258   : > { %4959 = vmatprep.mubr.msk.bf16.mxu0 %vm8238_vm12, %v8236_v27  ;;  %4988 = vmatpush3.bf16.msra.mxu0 %v5369_v40 }
 0x259   : > { %4989 = vmatprep.subr.bf16.mxu0 %v5370_v1 }
 0x25b   : > { %4271 = vmatmul.mubr.msk.bf16.gmra.mrb[120].mxu1 %vm7058_vm13, %v6855_v10  ;;  %v4432_v10 = vpop.f32.mrb[18].mxu1  ;;  %vm8245_vm13 = vnez %v8244_v14 }
 0x25c   : > { %4990 = vmatpush3.bf16.msra.mxu0 %v5370_v1  ;;  %3106 = vmatprep.mubr.bf16.mxu1 %v6842_v23  ;;  %v4433_v50 = vpop.f32.mrb[19].mxu1 }
 0x25d   : > { %v7229_v23 = vadd.f32 %v4433_v50, %v4432_v10  ;;  %v4435_v60 = vpop.f32.mrb[20].mxu1 }
 0x25e   : > { %v4436_v34 = vpop.f32.mrb[21].mxu1 }
 0x25f   : > { %4960 = vmatmul.mubr.msk.bf16.gmra.mrb[32].mxu0 %vm8241_vm14, %v8239_v25  ;;  %v7241_v62 = vadd.f32 %v4436_v34, %v4435_v60  ;;  %v4438_v45 = vpop.f32.mrb[22].mxu1 }
 0x260   : > { %4963 = vmatprep.mubr.msk.bf16.mxu0 %vm8242_vm11, %v6500_v21  ;;  %v4439_v58 = vpop.f32.mrb[23].mxu1 }
 0x261   : > { %v7243_v42 = vadd.f32 %v4439_v58, %v4438_v45 }
 0x263   : > { %4275 = vmatmul.mubr.msk.bf16.gmra.mrb[124].mxu1 %vm7072_vm9, %v6883_v19  ;;  %vm8247_vm9 = vnez %v8178_v3 }
 0x264   : > { %3114 = vmatprep.mubr.bf16.mxu1 %v6867_v20 }
 0x267   : > { %4964 = vmatmul.mubr.msk.bf16.gmra.mrb[36].mxu0 %vm8245_vm13, %v8243_v4 }
 0x268   : > { %4967 = vmatprep.mubr.msk.bf16.mxu0 %vm8246_vm15, %v6569_v13 }
 0x26b   : > { %4279 = vmatmul.mubr.msk.bf16.gmra.mrb[128].mxu1 %vm8213_vm6, %v6894_v11  ;;  %v4441_v20 = vpop.f32.mrb[24].mxu1  ;;  %vm8249_vm6 = vnez %v8187_v26 }
 0x26c   : > { %3122 = vmatprep.mubr.bf16.mxu1 %v6892_v41  ;;  %v4442_v19 = vpop.f32.mrb[25].mxu1 }
 0x26d   : > { %v7258_v43 = vadd.f32 %v4442_v19, %v4441_v20  ;;  %v4444_v18 = vpop.f32.mrb[26].mxu1 }
 0x26e   : > { %v4445_v11 = vpop.f32.mrb[27].mxu1 }
 0x26f   : > { %4968 = vmatmul.mubr.msk.bf16.gmra.mrb[40].mxu0 %vm8247_vm9, %v6607_v48  ;;  %v7260_v41 = vadd.f32 %v4445_v11, %v4444_v18 }
 0x270   : > { %4971 = vmatprep.mubr.msk.bf16.mxu0 %vm8248_vm3, %v6631_v51 }
 0x273   : > { %4283 = vmatmul.mubr.msk.bf16.gmra.mrb[132].mxu1 %vm7100_vm7, %v6910_v59 }
 0x274   : > { %3130 = vmatprep.mubr.bf16.mxu1 %v6914_v54 }
 0x275   : > { %v4447_v6 = vpop.f32.mrb[28].mxu1 }
 0x276   : > { %v4448_v57 = vpop.f32.mrb[29].mxu1 }
 0x277   : > { %4972 = vmatmul.mubr.msk.bf16.gmra.mrb[44].mxu0 %vm8249_vm6, %v6679_v52  ;;  %v7272_v36 = vadd.f32 %v4448_v57, %v4447_v6  ;;  %v4450_v5 = vpop.f32.mrb[30].mxu1 }
 0x278   : > { %4991 = vmatprep.mubr.msk.bf16.mxu0 %vm8220_vm5, %v8218_v33  ;;  %v4451_v35 = vpop.f32.mrb[31].mxu1 }
 0x279   : > { %v7274_v63 = vadd.f32 %v4451_v35, %v4450_v5 }
 0x27b   : > { %4287 = vmatmul.mubr.msk.bf16.gmra.mrb[136].mxu1 %vm7113_vm1, %v6931_v31  ;;  %vm8250_vm1 = vnez %v8191_v44 }
 0x27c   : > { %3138 = vmatprep.mubr.bf16.mxu1 %v5548_v37 }
 0x27e   : > { %v4453_v59 = vpop.f32.mrb[32].mxu1 }
 0x27f   : > { %4992 = vmatmul.mubr.msk.bf16.vlgmr.msra.gmra.mrb[16].mxu0 %vm8223_vm0, %v8221_v16  ;;  %v4454_v54 = vpop.f32.mrb[33].mxu1 }
 0x280   : > { %4995 = vmatprep.mubr.msk.bf16.mxu0 %vm8226_vm4, %v8224_v55  ;;  %v7289_v33 = vadd.f32 %v4454_v54, %v4453_v59  ;;  %v4456_v22 = vpop.f32.mrb[34].mxu1 }
 0x281   : > { %v4457_v31 = vpop.f32.mrb[35].mxu1 }
 0x282   : > { %v7291_v32 = vadd.f32 %v4457_v31, %v4456_v22 }
 0x283   : > { %3139 = vmatmul.mubr.bf16.gmra.mrb[140].mxu1 %v5548_v37 }
 0x286   : > { %v4459_v16 = vpop.f32.mrb[36].mxu1 }
 0x287   : > { %4996 = vmatmul.mubr.msk.bf16.gmra.mrb[20].mxu0 %vm8229_vm10, %v8227_v15  ;;  %v4460_v8 = vpop.f32.mrb[37].mxu1 }
 0x288   : > { %4999 = vmatprep.mubr.msk.bf16.mxu0 %vm8232_vm8, %v8230_v17  ;;  %v7300_v55 = vadd.f32 %v4460_v8, %v4459_v16  ;;  %v4462_v0 = vpop.f32.mrb[38].mxu1 }
 0x289   : > { %v4463_v40 = vpop.f32.mrb[39].mxu1 }
 0x28a   : > { %v7302_v1 = vadd.f32 %v4463_v40, %v4462_v0 }
 0x28e   : > { %v4465_v30 = vpop.f32.mrb[40].mxu1 }
 0x28f   : > { %5000 = vmatmul.mubr.msk.bf16.gmra.mrb[24].mxu0 %vm8235_vm2, %v8233_v39  ;;  %v4466_v15 = vpop.f32.mrb[41].mxu1 }
 0x290   : > { %5003 = vmatprep.mubr.msk.bf16.mxu0 %vm8238_vm12, %v8236_v27  ;;  %v7313_v17 = vadd.f32 %v4466_v15, %v4465_v30  ;;  %v4468_v28 = vpop.f32.mrb[42].mxu1 }
 0x291   : > { %v4469_v49 = vpop.f32.mrb[43].mxu1 }
 0x292   : > { %v4565_v47 = vpop.f32.mrb[48].mxu0  ;;  %v7315_v50 = vadd.f32 %v4469_v49, %v4468_v28 }
 0x293   : > { %v4566_v10 = vpop.f32.mrb[49].mxu0 }
 0x294   : > { %v4567_v39 = vadd.f32 %v4566_v10, %v4565_v47  ;;  %v4568_v61 = vpop.f32.mrb[50].mxu0 }
 0x295   : > { %v4569_v60 = vpop.f32.mrb[51].mxu0 }
 0x296   : > { %v7318_v27 = vadd.f32 %v4567_v39, %v7227_v56  ;;  %v4570_v24 = vadd.f32 %v4569_v60, %v4568_v61  ;;  %v4471_v34 = vpop.f32.mrb[44].mxu1 }
 0x297   : > { %5004 = vmatmul.mubr.msk.bf16.gmra.mrb[28].mxu0 %vm8241_vm14, %v8239_v25  ;;  %v4472_v58 = vpop.f32.mrb[45].mxu1  ;;  %v5375_v25 = vld [vmem:[%s7842_s7 + $0x20] sm:$0xff]  }
 0x298   : > { %v7324_v45 = vadd.f32 %v4570_v24, %v7229_v23  ;;  %5007 = vmatprep.mubr.msk.bf16.mxu0 %vm8242_vm11, %v6500_v21  ;;  %v7329_v20 = vadd.f32 %v4472_v58, %v4471_v34  ;;  %v4474_v19 = vpop.f32.mrb[46].mxu1  ;;  %5031 = vmatprep.subr.bf16.mxu1 %v5375_v25 }
 0x299   : > { %v4475_v56 = vpop.f32.mrb[47].mxu1  ;;  %5032 = vmatpush3.bf16.msra.mxu1 %v5375_v25 }
 0x29a   : > { %v4571_v2 = vpop.f32.mrb[52].mxu0  ;;  %v7331_v11 = vadd.f32 %v4475_v56, %v4474_v19 }
 0x29b   : > { %v4572_v18 = vpop.f32.mrb[53].mxu0 }
 0x29c   : > { %v4573_v38 = vadd.f32 %v4572_v18, %v4571_v2  ;;  %v4574_v23 = vpop.f32.mrb[54].mxu0 }
 0x29d   : > { %v4575_v6 = vpop.f32.mrb[55].mxu0 }
 0x29e   : > { %v7337_v29 = vadd.f32 %v4573_v38, %v7241_v62  ;;  %v4576_v21 = vadd.f32 %v4575_v6, %v4574_v23  ;;  %v4477_v57 = vpop.f32.mrb[48].mxu1 }
 0x29f   : > { %5008 = vmatmul.mubr.msk.bf16.gmra.mrb[32].mxu0 %vm8245_vm13, %v8243_v4  ;;  %v4478_v35 = vpop.f32.mrb[49].mxu1 }
 0x2a0   : > { %v7343_v5 = vadd.f32 %v4576_v21, %v7243_v42  ;;  %5011 = vmatprep.mubr.msk.bf16.mxu0 %vm8246_vm15, %v6569_v13  ;;  %v7348_v59 = vadd.f32 %v4478_v35, %v4477_v57  ;;  %v4480_v54 = vpop.f32.mrb[50].mxu1 }
 0x2a1   : > { %v4481_v46 = vpop.f32.mrb[51].mxu1 }
 0x2a2   : > { %v4577_v62 = vpop.f32.mrb[56].mxu0  ;;  %v7350_v31 = vadd.f32 %v4481_v46, %v4480_v54 }
 0x2a3   : > { %v4578_v22 = vpop.f32.mrb[57].mxu0 }
 0x2a4   : > { %v4579_v16 = vadd.f32 %v4578_v22, %v4577_v62  ;;  %v4580_v14 = vpop.f32.mrb[58].mxu0 }
 0x2a5   : > { %v4581_v4 = vpop.f32.mrb[59].mxu0 }
 0x2a6   : > { %v7353_v8 = vadd.f32 %v4579_v16, %v7258_v43  ;;  %v4582_v42 = vadd.f32 %v4581_v4, %v4580_v14  ;;  %v4483_v13 = vpop.f32.mrb[52].mxu1 }
 0x2a7   : > { %5012 = vmatmul.mubr.msk.bf16.gmra.mrb[36].mxu0 %vm8247_vm9, %v6607_v48  ;;  %v4484_v0 = vpop.f32.mrb[53].mxu1  ;;  %v5376_v48 = vld [vmem:[%s7842_s7 + $0x28] sm:$0xff]  }
 0x2a8   : > { %v7359_v7 = vadd.f32 %v4582_v42, %v7260_v41  ;;  %5015 = vmatprep.mubr.msk.bf16.mxu0 %vm8248_vm3, %v6631_v51  ;;  %v7364_v40 = vadd.f32 %v4484_v0, %v4483_v13  ;;  %v4486_v30 = vpop.f32.mrb[54].mxu1  ;;  %5033 = vmatprep.subr.bf16.mxu1 %v5376_v48 }
 0x2a9   : > { %v4487_v43 = vpop.f32.mrb[55].mxu1  ;;  %5034 = vmatpush3.bf16.msra.mxu1 %v5376_v48 }
 0x2aa   : > { %v4583_v15 = vpop.f32.mrb[60].mxu0  ;;  %v7366_v28 = vadd.f32 %v4487_v43, %v4486_v30 }
 0x2ab   : > { %v4584_v12 = vpop.f32.mrb[61].mxu0 }
 0x2ac   : > { %v4585_v3 = vadd.f32 %v4584_v12, %v4583_v15  ;;  %v4586_v41 = vpop.f32.mrb[62].mxu0 }
 0x2ad   : > { %v4587_v47 = vpop.f32.mrb[63].mxu0 }
 0x2ae   : > { %v7372_v9 = vadd.f32 %v4585_v3, %v7272_v36  ;;  %v4588_v51 = vadd.f32 %v4587_v47, %v4586_v41  ;;  %v4489_v49 = vpop.f32.mrb[56].mxu1 }
 0x2af   : > { %5016 = vmatmul.mubr.msk.bf16.gmra.mrb[40].mxu0 %vm8249_vm6, %v6679_v52  ;;  %v4490_v39 = vpop.f32.mrb[57].mxu1 }
 0x2b0   : > { %v7378_v10 = vadd.f32 %v4588_v51, %v7274_v63  ;;  %5019 = vmatprep.mubr.msk.bf16.mxu0 %vm8250_vm1, %v6702_v53  ;;  %v7383_v61 = vadd.f32 %v4490_v39, %v4489_v49  ;;  %v4492_v60 = vpop.f32.mrb[58].mxu1 }
 0x2b1   : > { %v4493_v24 = vpop.f32.mrb[59].mxu1 }
 0x2b2   : > { %v4589_v36 = vpop.f32.mrb[64].mxu0  ;;  %v7385_v58 = vadd.f32 %v4493_v24, %v4492_v60 }
 0x2b3   : > { %v4590_v34 = vpop.f32.mrb[65].mxu0 }
 0x2b4   : > { %v4591_v19 = vadd.f32 %v4590_v34, %v4589_v36  ;;  %v4592_v26 = vpop.f32.mrb[66].mxu0  ;;  %v5378_v36 = vld [vmem:[%s7842_s7 + $0x38] sm:$0xff]  }
 0x2b5   : > { %v4593_v52 = vpop.f32.mrb[67].mxu0 }
 0x2b6   : > { %v7388_v2 = vadd.f32 %v4591_v19, %v7289_v33  ;;  %v4594_v63 = vadd.f32 %v4593_v52, %v4592_v26  ;;  %v4495_v44 = vpop.f32.mrb[60].mxu1  ;;  %v5377_v33 = vld [vmem:[%s7842_s7 + $0x30] sm:$0xff]  }
 0x2b7   : > { %5020 = vmatmul.mubr.bf16.gmra.mrb[44].mxu0 %v5548_v37  ;;  %v4496_v56 = vpop.f32.mrb[61].mxu1  ;;  %5035 = vmatprep.subr.bf16.mxu1 %v5377_v33 }
 0x2b8   : > { %v7392_v53 = vadd.f32 %v4594_v63, %v7291_v32  ;;  %v7394_v18 = vadd.f32 %v4496_v56, %v4495_v44  ;;  %v4498_v25 = vpop.f32.mrb[62].mxu1  ;;  %5036 = vmatpush3.bf16.msra.mxu1 %v5377_v33 }
 0x2b9   : > { %v4499_v23 = vpop.f32.mrb[63].mxu1  ;;  %5037 = vmatprep.subr.bf16.mxu1 %v5378_v36 }
 0x2ba   : > { %v4595_v38 = vpop.f32.mrb[68].mxu0  ;;  %v7396_v21 = vadd.f32 %v4499_v23, %v4498_v25 }
 0x2bb   : > { %v4596_v6 = vpop.f32.mrb[69].mxu0 }
 0x2bc   : > { %v4597_v57 = vadd.f32 %v4596_v6, %v4595_v38  ;;  %v4598_v35 = vpop.f32.mrb[70].mxu0  ;;  %5038 = vmatpush3.bf16.msra.mxu1 %v5378_v36 }
 0x2bd   : > { %v4599_v37 = vpop.f32.mrb[71].mxu0 }
 0x2be   : > { %v7402_v32 = vadd.f32 %v4597_v57, %v7300_v55  ;;  %v4600_v54 = vadd.f32 %v4599_v37, %v4598_v35  ;;  %v4501_v62 = vpop.f32.mrb[64].mxu1 }
 0x2bf   : > { %v4502_v22 = vpop.f32.mrb[65].mxu1 }
 0x2c0   : > { %v7405_v46 = vadd.f32 %v4600_v54, %v7302_v1  ;;  %v7407_v16 = vadd.f32 %v4502_v22, %v4501_v62  ;;  %v4504_v14 = vpop.f32.mrb[66].mxu1 }
 0x2c1   : > { %v4505_v42 = vpop.f32.mrb[67].mxu1 }
 0x2c2   : > { %v4601_v4 = vpop.f32.mrb[72].mxu0  ;;  %v7409_v0 = vadd.f32 %v4505_v42, %v4504_v14 }
 0x2c3   : > { %v4602_v13 = vpop.f32.mrb[73].mxu0 }
 0x2c4   : > { %v4603_v30 = vadd.f32 %v4602_v13, %v4601_v4  ;;  %v4604_v15 = vpop.f32.mrb[74].mxu0 }
 0x2c5   : > { %v4605_v43 = vpop.f32.mrb[75].mxu0 }
 0x2c6   : > { %v7412_v55 = vadd.f32 %v4603_v30, %v7313_v17  ;;  %v4606_v12 = vadd.f32 %v4605_v43, %v4604_v15  ;;  %v4507_v48 = vpop.f32.mrb[68].mxu1 }
 0x2c7   : > { %v4508_v3 = vpop.f32.mrb[69].mxu1 }
 0x2c8   : > { %v7415_v1 = vadd.f32 %v4606_v12, %v7315_v50  ;;  %v7417_v41 = vadd.f32 %v4508_v3, %v4507_v48  ;;  %v4510_v47 = vpop.f32.mrb[70].mxu1 }
 0x2c9   : > { %v4511_v49 = vpop.f32.mrb[71].mxu1 }
 0x2ca   : > { %v4607_v51 = vpop.f32.mrb[76].mxu0  ;;  %v7419_v60 = vadd.f32 %v4511_v49, %v4510_v47 }
 0x2cb   : > { %v4608_v39 = vpop.f32.mrb[77].mxu0 }
 0x2cc   : > { %v4609_v17 = vadd.f32 %v4608_v39, %v4607_v51  ;;  %v4610_v24 = vpop.f32.mrb[78].mxu0 }
 0x2cd   : > { %v4611_v34 = vpop.f32.mrb[79].mxu0 }
 0x2ce   : > { %v7425_v50 = vadd.f32 %v4609_v17, %v7329_v20  ;;  %v4612_v19 = vadd.f32 %v4611_v34, %v4610_v24  ;;  %v4513_v26 = vpop.f32.mrb[72].mxu1 }
 0x2cf   : > { %v4514_v63 = vpop.f32.mrb[73].mxu1 }
 0x2d0   : > { %v7428_v52 = vadd.f32 %v4612_v19, %v7331_v11  ;;  %v7430_v44 = vadd.f32 %v4514_v63, %v4513_v26  ;;  %v4516_v56 = vpop.f32.mrb[74].mxu1 }
 0x2d1   : > { %v4517_v38 = vpop.f32.mrb[75].mxu1 }
 0x2d2   : > { %v4613_v25 = vpop.f32.mrb[80].mxu0  ;;  %v7432_v6 = vadd.f32 %v4517_v38, %v4516_v56 }
 0x2d3   : > { %v4614_v23 = vpop.f32.mrb[81].mxu0 }
 0x2d4   : > { %v4615_v33 = vadd.f32 %v4614_v23, %v4613_v25  ;;  %v4616_v57 = vpop.f32.mrb[82].mxu0 }
 0x2d5   : > { %v4617_v35 = vpop.f32.mrb[83].mxu0 }
 0x2d6   : > { %v7435_v20 = vadd.f32 %v4615_v33, %v7348_v59  ;;  %v4618_v37 = vadd.f32 %v4617_v35, %v4616_v57  ;;  %v4519_v54 = vpop.f32.mrb[76].mxu1 }
 0x2d7   : > { %v4520_v62 = vpop.f32.mrb[77].mxu1 }
 0x2d8   : > { %v7438_v11 = vadd.f32 %v4618_v37, %v7350_v31  ;;  %v7440_v22 = vadd.f32 %v4520_v62, %v4519_v54  ;;  %v4522_v14 = vpop.f32.mrb[78].mxu1 }
 0x2d9   : > { %v4523_v42 = vpop.f32.mrb[79].mxu1 }
 0x2da   : > { %v4619_v4 = vpop.f32.mrb[84].mxu0  ;;  %v7442_v30 = vadd.f32 %v4523_v42, %v4522_v14 }
 0x2db   : > { %v4620_v13 = vpop.f32.mrb[85].mxu0 }
 0x2dc   : > { %v4621_v15 = vadd.f32 %v4620_v13, %v4619_v4  ;;  %v4622_v43 = vpop.f32.mrb[86].mxu0 }
 0x2dd   : > { %v4623_v12 = vpop.f32.mrb[87].mxu0 }
 0x2de   : > { %v7445_v59 = vadd.f32 %v4621_v15, %v7364_v40  ;;  %v4624_v48 = vadd.f32 %v4623_v12, %v4622_v43  ;;  %v4701_v3 = vpop.f32.mrb[80].mxu1 }
 0x2df   : > { %v4702_v47 = vpop.f32.mrb[81].mxu1 }
 0x2e0   : > { %v7448_v31 = vadd.f32 %v4624_v48, %v7366_v28  ;;  %v4703_v51 = vadd.f32 %v4702_v47, %v4701_v3  ;;  %v4704_v49 = vpop.f32.mrb[82].mxu1 }
 0x2e1   : > { %v4705_v36 = vpop.f32.mrb[83].mxu1 }
 0x2e2   : > { %v4625_v39 = vpop.f32.mrb[88].mxu0  ;;  %v4706_v24 = vadd.f32 %v4705_v36, %v4704_v49  ;;  %v7451_v34 = vadd.f32 %v7318_v27, %v4703_v51 }
 0x2e3   : > { %v4626_v17 = vpop.f32.mrb[89].mxu0 }
 0x2e4   : > { %v4627_v19 = vadd.f32 %v4626_v17, %v4625_v39  ;;  %v4628_v26 = vpop.f32.mrb[90].mxu0  ;;  %v7454_v40 = vadd.f32 %v7324_v45, %v4706_v24 }
 0x2e5   : > { %v4629_v63 = vpop.f32.mrb[91].mxu0 }
 0x2e6   : > { %v7457_v56 = vadd.f32 %v4627_v19, %v7383_v61  ;;  %v4630_v28 = vadd.f32 %v4629_v63, %v4628_v26  ;;  %v4707_v25 = vpop.f32.mrb[84].mxu1 }
 0x2e7   : > { %v4708_v23 = vpop.f32.mrb[85].mxu1 }
 0x2e8   : > { %v7460_v38 = vadd.f32 %v4630_v28, %v7385_v58  ;;  %v4709_v33 = vadd.f32 %v4708_v23, %v4707_v25  ;;  %v4710_v57 = vpop.f32.mrb[86].mxu1 }
 0x2e9   : > { %v4711_v27 = vpop.f32.mrb[87].mxu1 }
 0x2ea   : > { %v4631_v35 = vpop.f32.mrb[92].mxu0  ;;  %v4712_v54 = vadd.f32 %v4711_v27, %v4710_v57  ;;  %v7463_v62 = vadd.f32 %v7337_v29, %v4709_v33 }
 0x2eb   : > { %v4632_v37 = vpop.f32.mrb[93].mxu0 }
 0x2ec   : > { %v4633_v45 = vadd.f32 %v4632_v37, %v4631_v35  ;;  %v4634_v14 = vpop.f32.mrb[94].mxu0  ;;  %v7466_v61 = vadd.f32 %v7343_v5, %v4712_v54 }
 0x2ed   : > { %v4635_v4 = vpop.f32.mrb[95].mxu0 }
 0x2ee   : > { %v7469_v42 = vadd.f32 %v4633_v45, %v7394_v18  ;;  %v4636_v58 = vadd.f32 %v4635_v4, %v4634_v14  ;;  %v4713_v13 = vpop.f32.mrb[88].mxu1 }
 0x2ef   : > { %v4714_v43 = vpop.f32.mrb[89].mxu1 }
 0x2f0   : > { %v7472_v15 = vadd.f32 %v4636_v58, %v7396_v21  ;;  %v4715_v12 = vadd.f32 %v4714_v43, %v4713_v13  ;;  %v4716_v48 = vpop.f32.mrb[90].mxu1 }
 0x2f1   : > { %v4717_v29 = vpop.f32.mrb[91].mxu1 }
 0x2f2   : > { %v4637_v3 = vpop.f32.mrb[96].mxu0  ;;  %v4718_v51 = vadd.f32 %v4717_v29, %v4716_v48  ;;  %v7475_v49 = vadd.f32 %v7353_v8, %v4715_v12 }
 0x2f3   : > { %v4638_v47 = vpop.f32.mrb[97].mxu0 }
 0x2f4   : > { %v4639_v5 = vadd.f32 %v4638_v47, %v4637_v3  ;;  %v4640_v39 = vpop.f32.mrb[98].mxu0  ;;  %v7478_v18 = vadd.f32 %v7359_v7, %v4718_v51 }
 0x2f5   : > { %v4641_v36 = vpop.f32.mrb[99].mxu0 }
 0x2f6   : > { %v7481_v17 = vadd.f32 %v4639_v5, %v7407_v16  ;;  %v4642_v21 = vadd.f32 %v4641_v36, %v4640_v39  ;;  %v4719_v24 = vpop.f32.mrb[92].mxu1 }
 0x2f7   : > { %v4720_v26 = vpop.f32.mrb[93].mxu1 }
 0x2f8   : > { %v7484_v19 = vadd.f32 %v4642_v21, %v7409_v0  ;;  %v4721_v63 = vadd.f32 %v4720_v26, %v4719_v24  ;;  %v4722_v28 = vpop.f32.mrb[94].mxu1 }
 0x2f9   : > { %v4723_v8 = vpop.f32.mrb[95].mxu1 }
 0x2fa   : > { %v4643_v25 = vpop.f32.mrb[100].mxu0  ;;  %v4724_v33 = vadd.f32 %v4723_v8, %v4722_v28  ;;  %v7487_v57 = vadd.f32 %v7372_v9, %v4721_v63 }
 0x2fb   : > { %v4644_v23 = vpop.f32.mrb[101].mxu0 }
 0x2fc   : > { %v4645_v7 = vadd.f32 %v4644_v23, %v4643_v25  ;;  %v4646_v35 = vpop.f32.mrb[102].mxu0  ;;  %v7490_v16 = vadd.f32 %v7378_v10, %v4724_v33 }
 0x2fd   : > { %v4647_v27 = vpop.f32.mrb[103].mxu0 }
 0x2fe   : > { %v7493_v37 = vadd.f32 %v4645_v7, %v7417_v41  ;;  %v4648_v0 = vadd.f32 %v4647_v27, %v4646_v35  ;;  %v4725_v54 = vpop.f32.mrb[96].mxu1 }
 0x2ff   : > { %v4726_v14 = vpop.f32.mrb[97].mxu1 }
 0x300   : > { %v7496_v45 = vadd.f32 %v4648_v0, %v7419_v60  ;;  %v4727_v4 = vadd.f32 %v4726_v14, %v4725_v54  ;;  %v4728_v58 = vpop.f32.mrb[98].mxu1 }
 0x301   : > { %v4729_v9 = vpop.f32.mrb[99].mxu1 }
 0x302   : > { %v4649_v13 = vpop.f32.mrb[104].mxu0  ;;  %v4730_v12 = vadd.f32 %v4729_v9, %v4728_v58  ;;  %v7499_v48 = vadd.f32 %v7388_v2, %v4727_v4 }
 0x303   : > { %v4650_v43 = vpop.f32.mrb[105].mxu0 }
 0x304   : > { %v4651_v10 = vadd.f32 %v4650_v43, %v4649_v13  ;;  %v4652_v3 = vpop.f32.mrb[106].mxu0  ;;  %v7502_v41 = vadd.f32 %v7392_v53, %v4730_v12 }
 0x305   : > { %v4653_v29 = vpop.f32.mrb[107].mxu0 }
 0x306   : > { %v7505_v47 = vadd.f32 %v4651_v10, %v7430_v44  ;;  %v4654_v60 = vadd.f32 %v4653_v29, %v4652_v3  ;;  %v4731_v51 = vpop.f32.mrb[100].mxu1 }
 0x307   : > { %v4732_v39 = vpop.f32.mrb[101].mxu1 }
 0x308   : > { %v7508_v5 = vadd.f32 %v4654_v60, %v7432_v6  ;;  %v4733_v36 = vadd.f32 %v4732_v39, %v4731_v51  ;;  %v4734_v21 = vpop.f32.mrb[102].mxu1 }
 0x309   : > { %v4735_v2 = vpop.f32.mrb[103].mxu1 }
 0x30a   : > { %v4655_v24 = vpop.f32.mrb[108].mxu0  ;;  %v4736_v63 = vadd.f32 %v4735_v2, %v4734_v21  ;;  %v7511_v28 = vadd.f32 %v7402_v32, %v4733_v36 }
 0x30b   : > { %v4656_v26 = vpop.f32.mrb[109].mxu0 }
 0x30c   : > { %v4657_v53 = vadd.f32 %v4656_v26, %v4655_v24  ;;  %v4658_v25 = vpop.f32.mrb[110].mxu0  ;;  %v7514_v44 = vadd.f32 %v7405_v46, %v4736_v63 }
 0x30d   : > { %v4659_v8 = vpop.f32.mrb[111].mxu0 }
 0x30e   : > { %v7517_v23 = vadd.f32 %v4657_v53, %v7440_v22  ;;  %v4660_v6 = vadd.f32 %v4659_v8, %v4658_v25  ;;  %v4737_v33 = vpop.f32.mrb[104].mxu1 }
 0x30f   : > { %v4738_v35 = vpop.f32.mrb[105].mxu1 }
 0x310   : > { %v7520_v7 = vadd.f32 %v4660_v6, %v7442_v30  ;;  %v4739_v27 = vadd.f32 %v4738_v35, %v4737_v33  ;;  %v4740_v0 = vpop.f32.mrb[106].mxu1 }
 0x311   : > { %v4741_v54 = vpop.f32.mrb[107].mxu1 }
 0x312   : > { %v4742_v32 = vadd.f32 %v4741_v54, %v4740_v0  ;;  %v7523_v14 = vadd.f32 %v7412_v55, %v4739_v27 }
 0x314   : > { %v7526_v4 = vadd.f32 %v7415_v1, %v4742_v32 }
 0x316   : > { %v4743_v46 = vpop.f32.mrb[108].mxu1 }
 0x317   : > { %v4744_v58 = vpop.f32.mrb[109].mxu1 }
 0x318   : > { %v4745_v22 = vadd.f32 %v4744_v58, %v4743_v46  ;;  %v4746_v13 = vpop.f32.mrb[110].mxu1 }
 0x319   : > { %v4747_v9 = vpop.f32.mrb[111].mxu1 }
 0x31a   : > { %v4748_v43 = vadd.f32 %v4747_v9, %v4746_v13  ;;  %v7529_v30 = vadd.f32 %v7425_v50, %v4745_v22 }
 0x31c   : > { %v7532_v12 = vadd.f32 %v7428_v52, %v4748_v43 }
 0x31e   : > { %v4749_v10 = vpop.f32.mrb[112].mxu1 }
 0x31f   : > { %v4750_v3 = vpop.f32.mrb[113].mxu1 }
 0x320   : > { %v4751_v29 = vadd.f32 %v4750_v3, %v4749_v10  ;;  %v4752_v55 = vpop.f32.mrb[114].mxu1 }
 0x321   : > { %v4753_v60 = vpop.f32.mrb[115].mxu1 }
 0x322   : > { %v4754_v51 = vadd.f32 %v4753_v60, %v4752_v55  ;;  %v7535_v1 = vadd.f32 %v7435_v20, %v4751_v29 }
 0x324   : > { %v7538_v39 = vadd.f32 %v7438_v11, %v4754_v51 }
 0x326   : > { %v4755_v36 = vpop.f32.mrb[116].mxu1 }
 0x327   : > { %v4756_v21 = vpop.f32.mrb[117].mxu1 }
 0x328   : > { %v4757_v24 = vadd.f32 %v4756_v21, %v4755_v36  ;;  %v4758_v50 = vpop.f32.mrb[118].mxu1 }
 0x329   : > { %v4759_v2 = vpop.f32.mrb[119].mxu1 }
 0x32a   : > { %v4760_v26 = vadd.f32 %v4759_v2, %v4758_v50  ;;  %v7541_v52 = vadd.f32 %v7445_v59, %v4757_v24 }
 0x32c   : > { %v7544_v63 = vadd.f32 %v7448_v31, %v4760_v26 }
 0x32e   : > { %v4761_v53 = vpop.f32.mrb[120].mxu1 }
 0x32f   : > { %v4762_v25 = vpop.f32.mrb[121].mxu1 }
 0x330   : > { %v4763_v8 = vadd.f32 %v4762_v25, %v4761_v53  ;;  %v4764_v20 = vpop.f32.mrb[122].mxu1 }
 0x331   : > { %v4765_v6 = vpop.f32.mrb[123].mxu1 }
 0x332   : > { %v4766_v33 = vadd.f32 %v4765_v6, %v4764_v20  ;;  %v7547_v11 = vadd.f32 %v7457_v56, %v4763_v8 }
 0x334   : > { %v7550_v35 = vadd.f32 %v7460_v38, %v4766_v33 }
 0x336   : > { %v4767_v27 = vpop.f32.mrb[124].mxu1 }
 0x337   : > { %v4768_v0 = vpop.f32.mrb[125].mxu1 }
 0x338   : > { %v4769_v54 = vadd.f32 %v4768_v0, %v4767_v27  ;;  %v4770_v59 = vpop.f32.mrb[126].mxu1 }
 0x339   : > { %v4771_v32 = vpop.f32.mrb[127].mxu1 }
 0x33a   : > { %v4772_v46 = vadd.f32 %v4771_v32, %v4770_v59  ;;  %v7553_v31 = vadd.f32 %v7469_v42, %v4769_v54  ;;  %v8251_v32 = vld [vmem:[#allocation13_spill] sm:$0xff] }
 0x33c   : > { %v7556_v58 = vadd.f32 %v7472_v15, %v4772_v46 }
 0x33e   : > { %v4773_v22 = vpop.f32.mrb[128].mxu1 }
 0x33f   : > { %v4774_v13 = vpop.f32.mrb[129].mxu1 }
 0x340   : > { %v4775_v9 = vadd.f32 %v4774_v13, %v4773_v22  ;;  %v4776_v56 = vpop.f32.mrb[130].mxu1 }
 0x341   : > { %v4777_v43 = vpop.f32.mrb[131].mxu1 }
 0x342   : > { %v4778_v10 = vadd.f32 %v4777_v43, %v4776_v56  ;;  %v7559_v38 = vadd.f32 %v7481_v17, %v4775_v9 }
 0x344   : > { %v7562_v3 = vadd.f32 %v7484_v19, %v4778_v10  ;;  %v7573_v19 = vld [vmem:[%s7841_s6] ss:$0 sm:$0xff] }
 0x346   : > { %v4779_v29 = vpop.f32.mrb[132].mxu1 }
 0x347   : > { %v4780_v55 = vpop.f32.mrb[133].mxu1 }
 0x348   : > { %v4781_v60 = vadd.f32 %v4780_v55, %v4779_v29  ;;  %v4782_v42 = vpop.f32.mrb[134].mxu1 }
 0x349   : > { %v4783_v51 = vpop.f32.mrb[135].mxu1 }
 0x34a   : > { %v4784_v36 = vadd.f32 %v4783_v51, %v4782_v42  ;;  %v7565_v15 = vadd.f32 %v7493_v37, %v4781_v60 }
 0x34c   : > { %v7568_v21 = vadd.f32 %v7496_v45, %v4784_v36 }
 0x34e   : > { %v4785_v24 = vpop.f32.mrb[136].mxu1 }
 0x34f   : > { %v4786_v50 = vpop.f32.mrb[137].mxu1 }
 0x350   : > { %v4787_v2 = vadd.f32 %v4786_v50, %v4785_v24  ;;  %v4788_v17 = vpop.f32.mrb[138].mxu1 }
 0x351   : > { %v4789_v53 = vpop.f32.mrb[139].mxu1 }
 0x352   : > { %v4993_v26 = vpop.f32.mrb[16].mxu0  ;;  %v4790_v20 = vadd.f32 %v4789_v53, %v4788_v17  ;;  %v7577_v37 = vadd.f32 %v7505_v47, %v4787_v2 }
 0x353   : > { %v5075_v25 = vadd.f32 %v7463_v62, %v4993_v26  ;;  %v3181_v8 = vpop.f32.mrb[17].mxu0 }
 0x354   : > { %v5078_v45 = vadd.f32 %v7451_v34, %v3181_v8  ;;  %v4994_v6 = vpop.f32.mrb[18].mxu0  ;;  %v7583_v54 = vadd.f32 %v7508_v5, %v4790_v20 }
 0x355   : > { %v3349_v33 = vadd.f32 %v5075_v25, %v7573_v19  ;;  %v5081_v27 = vadd.f32 %v7466_v61, %v4994_v6  ;;  %v3184_v0 = vpop.f32.mrb[19].mxu0 }
 0x356   : > { %v3347_v59 = vadd.f32 %v5078_v45, %v7573_v19  ;;  %v5084_v62 = vadd.f32 %v7454_v40, %v3184_v0  ;;  %v4791_v22 = vpop.f32.mrb[140].mxu1 }
 0x357   : > { %vm3381_vm7 = vcmp.gt.f32.partialorder %v3349_v33, 0.0  ;;  %v3413_v46 = vmul.f32 %v3349_v33, %v8251_v32  ;;  %v3350_v47 = vadd.f32 %v5081_v27, %v7573_v19  ;;  %v4792_v9 = vpop.f32.mrb[141].mxu1 }
 0x358   : > { %v3411_v34 = vmul.f32 %v3347_v59, %v8251_v32  ;;  %v3348_v13 = vadd.f32 %v5084_v62, %v7573_v19  ;;  %vm3379_vm5 = vcmp.gt.f32.partialorder %v3347_v59, 0.0  ;;  %v4793_v5 = vadd.f32 %v4792_v9, %v4791_v22  ;;  %v4794_v56 = vpop.f32.mrb[142].mxu1 }
 0x359   : > { %vm3382_vm0 = vcmp.gt.f32.partialorder %v3350_v47, 0.0  ;;  %v3414_v61 = vmul.f32 %v3350_v47, %v8251_v32  ;;  %v3445_v43 = vsel %vm3381_vm7, %v3349_v33, %v3413_v46  ;;  %v4795_v29 = vpop.f32.mrb[143].mxu1 }
 0x35a   : > { %vm3380_vm4 = vcmp.gt.f32.partialorder %v3348_v13, 0.0  ;;  %v3412_v40 = vmul.f32 %v3348_v13, %v8251_v32  ;;  %v4997_v10 = vpop.f32.mrb[20].mxu0  ;;  %v4796_v51 = vadd.f32 %v4795_v29, %v4794_v56  ;;  %v7595_v36 = vadd.f32 %v7517_v23, %v4793_v5 }
 0x35b   : > { %v3446_v55 = vsel %vm3382_vm0, %v3350_v47, %v3414_v61  ;;  %v5087_v60 = vadd.f32 %v7487_v57, %v4997_v10  ;;  %v3197_v42 = vpop.f32.mrb[21].mxu0  ;;  %v3443_v17 = vsel %vm3379_vm5, %v3347_v59, %v3411_v34 }
 0x35c   : > { %v3476_v24 = vpack.c.bf16 %v3446_v55, %v3445_v43  ;;  %v5090_v50 = vadd.f32 %v7475_v49, %v3197_v42  ;;  %v4998_v2 = vpop.f32.mrb[22].mxu0  ;;  %v3444_v26 = vsel %vm3380_vm4, %v3348_v13, %v3412_v40  ;;  %v7602_v57 = vadd.f32 %v7520_v7, %v4796_v51 }
 0x35d   : > { %v3353_v53 = vadd.f32 %v5087_v60, %v7573_v19  ;;  %v5093_v25 = vadd.f32 %v7490_v16, %v4998_v2  ;;  %v3200_v8 = vpop.f32.mrb[23].mxu0  ;;  %v3475_v20 = vpack.c.bf16 %v3444_v26, %v3443_v17 }
 0x35e   : > { %v3351_v45 = vadd.f32 %v5090_v50, %v7573_v19  ;;  %v5096_v23 = vadd.f32 %v7478_v18, %v3200_v8 }
 0x35f   : > { %v3417_v6 = vmul.f32 %v3353_v53, %v8251_v32  ;;  %v3354_v49 = vadd.f32 %v5093_v25, %v7573_v19  ;;  %5039 = vmatprep.mubr.bf16.mxu1 %v3475_v20  ;;  %vm3385_vm10 = vcmp.gt.f32.partialorder %v3353_v53, 0.0 }
 0x360   : > { %v3415_v33 = vmul.f32 %v3351_v45, %v8251_v32  ;;  %v3352_v27 = vadd.f32 %v5096_v23, %v7573_v19  ;;  %5040 = vmatmul.mubr.bf16.vlgmr.msra.gmra.mrb[144].mxu1 %v3476_v24  ;;  %vm3383_vm8 = vcmp.gt.f32.partialorder %v3351_v45, 0.0 }
 0x361   : > { %vm3386_vm2 = vcmp.gt.f32.partialorder %v3354_v49, 0.0  ;;  %v3418_v16 = vmul.f32 %v3354_v49, %v8251_v32  ;;  %v3449_v62 = vsel %vm3385_vm10, %v3353_v53, %v3417_v6 }
 0x362   : > { %vm3384_vm12 = vcmp.gt.f32.partialorder %v3352_v27, 0.0  ;;  %v3416_v7 = vmul.f32 %v3352_v27, %v8251_v32  ;;  %v5001_v0 = vpop.f32.mrb[24].mxu0  ;;  %v3447_v34 = vsel %vm3383_vm8, %v3351_v45, %v3415_v33 }
 0x363   : > { %v5099_v18 = vadd.f32 %v7511_v28, %v5001_v0  ;;  %v3213_v59 = vpop.f32.mrb[25].mxu0  ;;  %v3450_v46 = vsel %vm3386_vm2, %v3354_v49, %v3418_v16 }
 0x364   : > { %v5102_v47 = vadd.f32 %v7499_v48, %v3213_v59  ;;  %v5002_v22 = vpop.f32.mrb[26].mxu0  ;;  %v3448_v13 = vsel %vm3384_vm12, %v3352_v27, %v3416_v7  ;;  %v3478_v9 = vpack.c.bf16 %v3450_v46, %v3449_v62 }
 0x365   : > { %v3357_v61 = vadd.f32 %v5099_v18, %v7573_v19  ;;  %v5105_v5 = vadd.f32 %v7514_v44, %v5002_v22  ;;  %v3216_v56 = vpop.f32.mrb[27].mxu0  ;;  %v3477_v43 = vpack.c.bf16 %v3448_v13, %v3447_v34 }
 0x366   : > { %v3355_v40 = vadd.f32 %v5102_v47, %v7573_v19  ;;  %v5108_v10 = vadd.f32 %v7502_v41, %v3216_v56 }
 0x367   : > { %v3421_v28 = vmul.f32 %v3357_v61, %v8251_v32  ;;  %v3358_v29 = vadd.f32 %v5105_v5, %v7573_v19  ;;  %5043 = vmatprep.mubr.bf16.mxu1 %v3477_v43  ;;  %vm3389_vm14 = vcmp.gt.f32.partialorder %v3357_v61, 0.0 }
 0x368   : > { %v3419_v48 = vmul.f32 %v3355_v40, %v8251_v32  ;;  %v3356_v55 = vadd.f32 %v5108_v10, %v7573_v19  ;;  %5044 = vmatmul.mubr.bf16.gmra.mrb[148].mxu1 %v3478_v9  ;;  %vm3387_vm11 = vcmp.gt.f32.partialorder %v3355_v40, 0.0 }
 0x369   : > { %vm3390_vm13 = vcmp.gt.f32.partialorder %v3358_v29, 0.0  ;;  %v3422_v44 = vmul.f32 %v3358_v29, %v8251_v32  ;;  %v3453_v24 = vsel %vm3389_vm14, %v3357_v61, %v3421_v28 }
 0x36a   : > { %vm3388_vm15 = vcmp.gt.f32.partialorder %v3356_v55, 0.0  ;;  %v3420_v60 = vmul.f32 %v3356_v55, %v8251_v32  ;;  %v5005_v42 = vpop.f32.mrb[28].mxu0  ;;  %v3451_v26 = vsel %vm3387_vm11, %v3355_v40, %v3419_v48 }
 0x36b   : > { %v5111_v41 = vadd.f32 %v7529_v30, %v5005_v42  ;;  %v3229_v51 = vpop.f32.mrb[29].mxu0  ;;  %v3454_v50 = vsel %vm3390_vm13, %v3358_v29, %v3422_v44 }
 0x36c   : > { %v5114_v2 = vadd.f32 %v7523_v14, %v3229_v51  ;;  %v5006_v17 = vpop.f32.mrb[30].mxu0  ;;  %v3452_v53 = vsel %vm3388_vm15, %v3356_v55, %v3420_v60  ;;  %v3480_v25 = vpack.c.bf16 %v3454_v50, %v3453_v24 }
 0x36d   : > { %v3361_v8 = vadd.f32 %v5111_v41, %v7573_v19  ;;  %v5117_v20 = vadd.f32 %v7532_v12, %v5006_v17  ;;  %v3232_v45 = vpop.f32.mrb[31].mxu0  ;;  %v3479_v23 = vpack.c.bf16 %v3452_v53, %v3451_v26 }
 0x36e   : > { %v3359_v6 = vadd.f32 %v5114_v2, %v7573_v19  ;;  %v5120_v49 = vadd.f32 %v7526_v4, %v3232_v45 }
 0x36f   : > { %v3425_v30 = vmul.f32 %v3361_v8, %v8251_v32  ;;  %v3362_v33 = vadd.f32 %v5117_v20, %v7573_v19  ;;  %5047 = vmatprep.mubr.bf16.mxu1 %v3479_v23  ;;  %vm3393_vm9 = vcmp.gt.f32.partialorder %v3361_v8, 0.0 }
 0x370   : > { %v3423_v14 = vmul.f32 %v3359_v6, %v8251_v32  ;;  %v3360_v27 = vadd.f32 %v5120_v49, %v7573_v19  ;;  %5048 = vmatmul.mubr.bf16.gmra.mrb[152].mxu1 %v3480_v25  ;;  %vm3391_vm3 = vcmp.gt.f32.partialorder %v3359_v6, 0.0 }
 0x371   : > { %vm3394_vm6 = vcmp.gt.f32.partialorder %v3362_v33, 0.0  ;;  %v3426_v12 = vmul.f32 %v3362_v33, %v8251_v32  ;;  %v3457_v18 = vsel %vm3393_vm9, %v3361_v8, %v3425_v30 }
 0x372   : > { %vm3392_vm1 = vcmp.gt.f32.partialorder %v3360_v27, 0.0  ;;  %v3424_v16 = vmul.f32 %v3360_v27, %v8251_v32  ;;  %v5009_v7 = vpop.f32.mrb[32].mxu0  ;;  %v3455_v47 = vsel %vm3391_vm3, %v3359_v6, %v3423_v14 }
 0x373   : > { %v5123_v4 = vadd.f32 %v7541_v52, %v5009_v7  ;;  %v3245_v0 = vpop.f32.mrb[33].mxu0  ;;  %v3458_v59 = vsel %vm3394_vm6, %v3362_v33, %v3426_v12 }
 0x374   : > { %v5126_v62 = vadd.f32 %v7535_v1, %v3245_v0  ;;  %v5010_v46 = vpop.f32.mrb[34].mxu0  ;;  %v3456_v22 = vsel %vm3392_vm1, %v3360_v27, %v3424_v16  ;;  %v3482_v34 = vpack.c.bf16 %v3458_v59, %v3457_v18 }
 0x375   : > { %v3365_v13 = vadd.f32 %v5123_v4, %v7573_v19  ;;  %v5129_v9 = vadd.f32 %v7544_v63, %v5010_v46  ;;  %v3248_v61 = vpop.f32.mrb[35].mxu0  ;;  %v3481_v5 = vpack.c.bf16 %v3456_v22, %v3455_v47 }
 0x376   : > { %v3363_v56 = vadd.f32 %v5126_v62, %v7573_v19  ;;  %v5132_v43 = vadd.f32 %v7538_v39, %v3248_v61 }
 0x377   : > { %v3429_v52 = vmul.f32 %v3365_v13, %v8251_v32  ;;  %v3366_v40 = vadd.f32 %v5129_v9, %v7573_v19  ;;  %5051 = vmatprep.mubr.bf16.mxu1 %v3481_v5  ;;  %vm3397_vm7 = vcmp.gt.f32.partialorder %v3365_v13, 0.0 }
 0x378   : > { %v3427_v1 = vmul.f32 %v3363_v56, %v8251_v32  ;;  %v3364_v10 = vadd.f32 %v5132_v43, %v7573_v19  ;;  %5052 = vmatmul.mubr.bf16.gmra.mrb[156].mxu1 %v3482_v34  ;;  %vm3395_vm5 = vcmp.gt.f32.partialorder %v3363_v56, 0.0 }
 0x379   : > { %vm3398_vm0 = vcmp.gt.f32.partialorder %v3366_v40, 0.0  ;;  %v3430_v63 = vmul.f32 %v3366_v40, %v8251_v32  ;;  %v3461_v55 = vsel %vm3397_vm7, %v3365_v13, %v3429_v52  ;;  %vm8252_vm7 = vcmask 130048  }
 0x37a   : > { %vm3396_vm4 = vcmp.gt.f32.partialorder %v3364_v10, 0.0  ;;  %v3428_v28 = vmul.f32 %v3364_v10, %v8251_v32  ;;  %v5013_v29 = vpop.f32.mrb[36].mxu0  ;;  %v3459_v41 = vsel %vm3395_vm5, %v3363_v56, %v3427_v1  ;;  %vm8253_vm5 = vmmov %vm8252_vm7 }
 0x37b   : > { %v5135_v39 = vadd.f32 %v7553_v31, %v5013_v29  ;;  %v3261_v48 = vpop.f32.mrb[37].mxu0  ;;  %v3462_v44 = vsel %vm3398_vm0, %v3366_v40, %v3430_v63  ;;  %vm8254_vm0 = vmmov %vm8253_vm5 }
 0x37c   : > { %v5138_v60 = vadd.f32 %v7547_v11, %v3261_v48  ;;  %v5014_v42 = vpop.f32.mrb[38].mxu0  ;;  %v3460_v51 = vsel %vm3396_vm4, %v3364_v10, %v3428_v28  ;;  %v3484_v24 = vpack.c.bf16 %v3462_v44, %v3461_v55  ;;  %vm8255_vm4 = vmmov %vm8254_vm0 }
 0x37d   : > { %v3369_v50 = vadd.f32 %v5135_v39, %v7573_v19  ;;  %v5141_v2 = vadd.f32 %v7556_v58, %v5014_v42  ;;  %v3264_v17 = vpop.f32.mrb[39].mxu0  ;;  %v3483_v26 = vpack.c.bf16 %v3460_v51, %v3459_v41 }
 0x37e   : > { %v3367_v53 = vadd.f32 %v5138_v60, %v7573_v19  ;;  %v5144_v25 = vadd.f32 %v7550_v35, %v3264_v17 }
 0x37f   : > { %v3433_v31 = vmul.f32 %v3369_v50, %v8251_v32  ;;  %v3370_v8 = vadd.f32 %v5141_v2, %v7573_v19  ;;  %5055 = vmatprep.mubr.bf16.mxu1 %v3483_v26  ;;  %vm3401_vm10 = vcmp.gt.f32.partialorder %v3369_v50, 0.0  ;;  %v5380_v26 = vld [vmem:[%s5750_s20] sm:$0xff] }
 0x380   : > { %v3431_v11 = vmul.f32 %v3367_v53, %v8251_v32  ;;  %v3368_v20 = vadd.f32 %v5144_v25, %v7573_v19  ;;  %5056 = vmatmul.mubr.bf16.gmra.mrb[160].mxu1 %v3484_v24  ;;  %vm3399_vm8 = vcmp.gt.f32.partialorder %v3367_v53, 0.0  ;;  %v5381_v25 = vld [vmem:[%s5750_s20 + $0x18] sm:$0xff] }
 0x381   : > { %vm3402_vm2 = vcmp.gt.f32.partialorder %v3370_v8, 0.0  ;;  %v3434_v58 = vmul.f32 %v3370_v8, %v8251_v32  ;;  %v3465_v49 = vsel %vm3401_vm10, %v3369_v50, %v3433_v31  ;;  %v5379_v50 = vld [vmem:[%s5750_s20 + $0x10] sm:$0xff]  ;;  %vm8256_vm10 = vmmov %vm8254_vm0 }
 0x382   : > { %vm3400_vm12 = vcmp.gt.f32.partialorder %v3368_v20, 0.0  ;;  %v3432_v45 = vmul.f32 %v3368_v20, %v8251_v32  ;;  %v5017_v23 = vpop.f32.mrb[40].mxu0  ;;  %v3463_v27 = vsel %vm3399_vm8, %v3367_v53, %v3431_v11  ;;  %v5382_v11 = vld [vmem:[%s5750_s20 + $0x8] sm:$0xff]  ;;  %vm8257_vm8 = vmmov %vm8254_vm0 }
 0x383   : > { %v5147_v35 = vadd.f32 %v7565_v15, %v5017_v23  ;;  %v3277_v6 = vpop.f32.mrb[41].mxu0  ;;  %v3466_v30 = vsel %vm3402_vm2, %v3370_v8, %v3434_v58  ;;  %vm8258_vm2 = vmmov %vm8254_vm0 }
 0x384   : > { %v5150_v33 = vadd.f32 %v7559_v38, %v3277_v6  ;;  %v5018_v14 = vpop.f32.mrb[42].mxu0  ;;  %v3464_v12 = vsel %vm3400_vm12, %v3368_v20, %v3432_v45  ;;  %v3486_v16 = vpack.c.bf16 %v3466_v30, %v3465_v49  ;;  %v5383_v45 = vld [vmem:[%s5750_s20 + $0x30] sm:$0xff]  ;;  %v5384_v6 = vld [vmem:[%s5750_s20 + $0x20] sm:$0xff]  ;;  %vm8259_vm12 = vmmov %vm8254_vm0 }
 0x385   : > { %v3373_v7 = vadd.f32 %v5147_v35, %v7573_v19  ;;  %v5153_v4 = vadd.f32 %v7568_v21, %v5018_v14  ;;  %v3280_v0 = vpop.f32.mrb[43].mxu0  ;;  %v3485_v18 = vpack.c.bf16 %v3464_v12, %v3463_v27  ;;  %v5386_v12 = vld [vmem:[%s5750_s20 + $0x28] sm:$0xff] }
 0x386   : > { %v3371_v59 = vadd.f32 %v5150_v33, %v7573_v19  ;;  %v5156_v62 = vadd.f32 %v7562_v3, %v3280_v0  ;;  %v5385_v33 = vld [vmem:[%s5750_s20 + $0x38] sm:$0xff] }
 0x387   : > { %v3437_v15 = vmul.f32 %v3373_v7, %v8251_v32  ;;  %v3374_v46 = vadd.f32 %v5153_v4, %v7573_v19  ;;  %5059 = vmatprep.mubr.bf16.mxu1 %v3485_v18  ;;  %vm3405_vm14 = vcmp.gt.f32.partialorder %v3373_v7, 0.0  ;;  %v5387_v4 = vld [vmem:[%s5750_s20 + $0x50] sm:$0xff] }
 0x388   : > { %v3435_v38 = vmul.f32 %v3371_v59, %v8251_v32  ;;  %v3372_v47 = vadd.f32 %v5156_v62, %v7573_v19  ;;  %5060 = vmatmul.mubr.bf16.gmra.mrb[164].mxu1 %v3486_v16  ;;  %vm3403_vm11 = vcmp.gt.f32.partialorder %v3371_v59, 0.0 }
 0x389   : > { %vm3406_vm13 = vcmp.gt.f32.partialorder %v3374_v46, 0.0  ;;  %v3438_v21 = vmul.f32 %v3374_v46, %v8251_v32  ;;  %v3469_v9 = vsel %vm3405_vm14, %v3373_v7, %v3437_v15  ;;  %vm8260_vm14 = vmmov %vm8254_vm0 }
 0x38a   : > { %vm3404_vm15 = vcmp.gt.f32.partialorder %v3372_v47, 0.0  ;;  %v3436_v22 = vmul.f32 %v3372_v47, %v8251_v32  ;;  %v5021_v34 = vpop.f32.mrb[44].mxu0  ;;  %v3467_v43 = vsel %vm3403_vm11, %v3371_v59, %v3435_v38  ;;  %v5388_v59 = vld [vmem:[%s5750_s20 + $0x40] sm:$0xff]  ;;  %vm8261_vm11 = vmmov %vm8254_vm0 }
 0x38b   : > { %v5159_v3 = vadd.f32 %v7595_v36, %v5021_v34  ;;  %v3293_v13 = vpop.f32.mrb[45].mxu0  ;;  %v3470_v61 = vsel %vm3406_vm13, %v3374_v46, %v3438_v21  ;;  %v5389_v46 = vld [vmem:[%s5750_s20 + $0x58] sm:$0xff]  ;;  %v5390_v21 = vld [vmem:[%s5750_s20 + $0x48] sm:$0xff]  ;;  %vm8262_vm13 = vmmov %vm8254_vm0 }
 0x38c   : > { %v5162_v5 = vadd.f32 %v7577_v37, %v3293_v13  ;;  %v5022_v56 = vpop.f32.mrb[46].mxu0  ;;  %v3468_v52 = vsel %vm3404_vm15, %v3372_v47, %v3436_v22  ;;  %v3488_v40 = vpack.c.bf16 %v3470_v61, %v3469_v9  ;;  %vm8263_vm15 = vmmov %vm8254_vm0  ;;  %v5392_v61 = vld [vmem:[%s5750_s20 + $0x60] sm:$0xff] }
 0x38d   : > { %v3377_v1 = vadd.f32 %v5159_v3, %v7573_v19  ;;  %v5165_v10 = vadd.f32 %v7602_v57, %v5022_v56  ;;  %v3296_v63 = vpop.f32.mrb[47].mxu0  ;;  %v3487_v28 = vpack.c.bf16 %v3468_v52, %v3467_v43  ;;  %v5391_v3 = vld [vmem:[%s5750_s20 + $0x70] sm:$0xff]  ;;  %v5393_v43 = vld [vmem:[%s5750_s20 + $0x78] sm:$0xff] }
 0x38e   : > { %v3375_v29 = vadd.f32 %v5162_v5, %v7573_v19  ;;  %v5168_v39 = vadd.f32 %v7583_v54, %v3296_v63 }
 0x38f   : > { %v3441_v36 = vmul.f32 %v3377_v1, %v8251_v32  ;;  %v3378_v48 = vadd.f32 %v5165_v10, %v7573_v19  ;;  %5063 = vmatprep.mubr.bf16.mxu1 %v3487_v28  ;;  %vm3409_vm9 = vcmp.gt.f32.partialorder %v3377_v1, 0.0  ;;  %v5395_v28 = vld [vmem:[%s5750_s20 + $0x90] sm:$0xff] }
 0x390   : > { %v3439_v37 = vmul.f32 %v3375_v29, %v8251_v32  ;;  %v3376_v55 = vadd.f32 %v5168_v39, %v7573_v19  ;;  %5064 = vmatmul.mubr.bf16.gmra.mrb[168].mxu1 %v3488_v40  ;;  %vm3407_vm3 = vcmp.gt.f32.partialorder %v3375_v29, 0.0 }
 0x391   : > { %vm3410_vm6 = vcmp.gt.f32.partialorder %v3378_v48, 0.0  ;;  %v3442_v57 = vmul.f32 %v3378_v48, %v8251_v32  ;;  %v3473_v44 = vsel %vm3409_vm9, %v3377_v1, %v3441_v36  ;;  %vm8264_vm9 = vmmov %vm8254_vm0  ;;  %v5394_v1 = vld [vmem:[%s5750_s20 + $0x68] sm:$0xff]  ;;  %v5396_v36 = vld [vmem:[%s5750_s20 + $0x80] sm:$0xff] }
 0x392   : > { %vm3408_vm1 = vcmp.gt.f32.partialorder %v3376_v55, 0.0  ;;  %v3440_v54 = vmul.f32 %v3376_v55, %v8251_v32  ;;  %v3471_v42 = vsel %vm3407_vm3, %v3375_v29, %v3439_v37  ;;  %vm8265_vm3 = vmmov %vm8254_vm0 }
 0x393   : > { %v3474_v60 = vsel %vm3410_vm6, %v3378_v48, %v3442_v57  ;;  %vm8266_vm6 = vmmov %vm8254_vm0 }
 0x394   : > { %v3472_v41 = vsel %vm3408_vm1, %v3376_v55, %v3440_v54  ;;  %v3490_v51 = vpack.c.bf16 %v3474_v60, %v3473_v44  ;;  %vm8267_vm1 = vmmov %vm8254_vm0  ;;  %v5397_v55 = vld [vmem:[%s5750_s20 + $0x98] sm:$0xff]  ;;  %v5398_v44 = vld [vmem:[%s5750_s20 + $0x88] sm:$0xff] }
 0x395   : > { %v3489_v24 = vpack.c.bf16 %v3472_v41, %v3471_v42  ;;  %v5399_v41 = vld [vmem:[%s5750_s20 + $0xb0] sm:$0xff] }
 0x397   : > { %5067 = vmatprep.mubr.bf16.mxu1 %v3489_v24 }
 0x398   : > { %5068 = vmatmul.mubr.bf16.gmra.mrb[172].mxu1 %v3490_v51 }
 0x433   : > { %v5041_v19 = vpop.f32.mrb[144].mxu1 }
 0x434   : > { %v3718_v2 = vadd.f32 %v5379_v50, %v5041_v19  ;;  %v3589_v17 = vpop.f32.mrb[145].mxu1  ;;  %v5400_v19 = vld [vmem:[%s5750_s20 + $0xa0] sm:$0xff] }
 0x435   : > { %v3716_v53 = vadd.f32 %v5380_v26, %v3589_v17  ;;  %v5042_v32 = vpop.f32.mrb[146].mxu1  ;;  %v5401_v17 = vld [vmem:[%s5750_s20 + $0xb8] sm:$0xff] }
 0x436   : > { %3750 = vst.msk [vmem:[%s7688_s19 + $0x10] sm:$0xff] %vm8252_vm7, %v3718_v2  ;;  %v3719_v31 = vadd.f32 %v5381_v25, %v5042_v32  ;;  %v3592_v8 = vpop.f32.mrb[147].mxu1  ;;  %vm8268_vm7 = vmmov %vm8254_vm0  ;;  %v5402_v32 = vld [vmem:[%s5750_s20 + $0xa8] sm:$0xff] }
 0x437   : > { %3748 = vst.msk [vmem:[%s7688_s19] sm:$0xff] %vm8253_vm5, %v3716_v53  ;;  %v3717_v20 = vadd.f32 %v5382_v11, %v3592_v8  ;;  %vm8269_vm5 = vmmov %vm8254_vm0  ;;  %v5403_v8 = vld [vmem:[%s5750_s20 + $0xd0] sm:$0xff] }
 0x438   : > { %3751 = vst.msk [vmem:[%s7688_s19 + $0x18] sm:$0xff] %vm8254_vm0, %v3719_v31 }
 0x439   : > { %3749 = vst.msk [vmem:[%s7688_s19 + $0x8] sm:$0xff] %vm8255_vm4, %v3717_v20  ;;  %vm8270_vm4 = vmmov %vm8254_vm0 }
 0x43b   : > { %v5045_v58 = vpop.f32.mrb[148].mxu1 }
 0x43c   : > { %v3722_v23 = vadd.f32 %v5383_v45, %v5045_v58  ;;  %v3605_v35 = vpop.f32.mrb[149].mxu1  ;;  %v5404_v58 = vld [vmem:[%s5750_s20 + $0xc0] sm:$0xff] }
 0x43d   : > { %v3720_v49 = vadd.f32 %v5384_v6, %v3605_v35  ;;  %v5046_v30 = vpop.f32.mrb[150].mxu1  ;;  %v5405_v35 = vld [vmem:[%s5750_s20 + $0xd8] sm:$0xff] }
 0x43e   : > { %3754 = vst.msk [vmem:[%s7688_s19 + $0x30] sm:$0xff] %vm8256_vm10, %v3722_v23  ;;  %v3723_v14 = vadd.f32 %v5385_v33, %v5046_v30  ;;  %v3608_v27 = vpop.f32.mrb[151].mxu1  ;;  %vm8271_vm10 = vmmov %vm8254_vm0  ;;  %v5406_v30 = vld [vmem:[%s5750_s20 + $0xc8] sm:$0xff] }
 0x43f   : > { %3752 = vst.msk [vmem:[%s7688_s19 + $0x20] sm:$0xff] %vm8257_vm8, %v3720_v49  ;;  %v3721_v16 = vadd.f32 %v5386_v12, %v3608_v27  ;;  %vm8272_vm8 = vmmov %vm8254_vm0  ;;  %v5407_v27 = vld [vmem:[%s5750_s20 + $0xf0] sm:$0xff] }
 0x440   : > { %3755 = vst.msk [vmem:[%s7688_s19 + $0x38] sm:$0xff] %vm8258_vm2, %v3723_v14  ;;  %vm8273_vm2 = vmmov %vm8254_vm0 }
 0x441   : > { %3753 = vst.msk [vmem:[%s7688_s19 + $0x28] sm:$0xff] %vm8259_vm12, %v3721_v16  ;;  %vm8274_vm12 = vmmov %vm8254_vm0 }
 0x443   : > { %v5049_v7 = vpop.f32.mrb[152].mxu1 }
 0x444   : > { %v3726_v0 = vadd.f32 %v5387_v4, %v5049_v7  ;;  %v3621_v18 = vpop.f32.mrb[153].mxu1  ;;  %v5408_v7 = vld [vmem:[%s5750_s20 + $0xe0] sm:$0xff] }
 0x445   : > { %v3724_v62 = vadd.f32 %v5388_v59, %v3621_v18  ;;  %v5050_v15 = vpop.f32.mrb[154].mxu1  ;;  %v5409_v18 = vld [vmem:[%s5750_s20 + $0xf8] sm:$0xff] }
 0x446   : > { %3758 = vst.msk [vmem:[%s7688_s19 + $0x50] sm:$0xff] %vm8260_vm14, %v3726_v0  ;;  %v3727_v38 = vadd.f32 %v5389_v46, %v5050_v15  ;;  %v3624_v47 = vpop.f32.mrb[155].mxu1  ;;  %vm8275_vm14 = vmmov %vm8254_vm0  ;;  %v5410_v15 = vld [vmem:[%s5750_s20 + $0xe8] sm:$0xff] }
 0x447   : > { %3756 = vst.msk [vmem:[%s7688_s19 + $0x40] sm:$0xff] %vm8261_vm11, %v3724_v62  ;;  %v3725_v22 = vadd.f32 %v5390_v21, %v3624_v47  ;;  %vm8276_vm11 = vmmov %vm8254_vm0 }
 0x448   : > { %3759 = vst.msk [vmem:[%s7688_s19 + $0x58] sm:$0xff] %vm8262_vm13, %v3727_v38  ;;  %vm8277_vm13 = vmmov %vm8254_vm0 }
 0x449   : > { %3757 = vst.msk [vmem:[%s7688_s19 + $0x48] sm:$0xff] %vm8263_vm15, %v3725_v22  ;;  %vm8278_vm15 = vmmov %vm8254_vm0 }
 0x44b   : > { %v5053_v34 = vpop.f32.mrb[156].mxu1 }
 0x44c   : > { %v3730_v13 = vadd.f32 %v5391_v3, %v5053_v34  ;;  %v3637_v9 = vpop.f32.mrb[157].mxu1 }
 0x44d   : > { %v3728_v5 = vadd.f32 %v5392_v61, %v3637_v9  ;;  %v5054_v56 = vpop.f32.mrb[158].mxu1 }
 0x44e   : > { %3762 = vst.msk [vmem:[%s7688_s19 + $0x70] sm:$0xff] %vm8264_vm9, %v3730_v13  ;;  %v3731_v52 = vadd.f32 %v5393_v43, %v5054_v56  ;;  %v3640_v40 = vpop.f32.mrb[159].mxu1  ;;  %vm8279_vm9 = vmmov %vm8254_vm0 }
 0x44f   : > { %3760 = vst.msk [vmem:[%s7688_s19 + $0x60] sm:$0xff] %vm8265_vm3, %v3728_v5  ;;  %v3729_v10 = vadd.f32 %v5394_v1, %v3640_v40  ;;  %vm8280_vm3 = vmmov %vm8254_vm0 }
 0x450   : > { %3763 = vst.msk [vmem:[%s7688_s19 + $0x78] sm:$0xff] %vm8266_vm6, %v3731_v52  ;;  %vm8281_vm6 = vmmov %vm8254_vm0 }
 0x451   : > { %3761 = vst.msk [vmem:[%s7688_s19 + $0x68] sm:$0xff] %vm8267_vm1, %v3729_v10  ;;  %vm8282_vm1 = vmmov %vm8254_vm0 }
 0x453   : > { %v5057_v63 = vpop.f32.mrb[160].mxu1 }
 0x454   : > { %v3734_v29 = vadd.f32 %v5395_v28, %v5057_v63  ;;  %v3653_v39 = vpop.f32.mrb[161].mxu1 }
 0x455   : > { %v3732_v48 = vadd.f32 %v5396_v36, %v3653_v39  ;;  %v5058_v37 = vpop.f32.mrb[162].mxu1 }
 0x456   : > { %3766 = vst.msk [vmem:[%s7688_s19 + $0x90] sm:$0xff] %vm8268_vm7, %v3734_v29  ;;  %v3735_v57 = vadd.f32 %v5397_v55, %v5058_v37  ;;  %v3656_v54 = vpop.f32.mrb[163].mxu1 }
 0x457   : > { %3764 = vst.msk [vmem:[%s7688_s19 + $0x80] sm:$0xff] %vm8269_vm5, %v3732_v48  ;;  %v3733_v60 = vadd.f32 %v5398_v44, %v3656_v54 }
 0x458   : > { %3767 = vst.msk [vmem:[%s7688_s19 + $0x98] sm:$0xff] %vm8254_vm0, %v3735_v57 }
 0x459   : > { %3765 = vst.msk [vmem:[%s7688_s19 + $0x88] sm:$0xff] %vm8270_vm4, %v3733_v60 }
 0x45b   : > { %v5061_v42 = vpop.f32.mrb[164].mxu1 }
 0x45c   : > { %v3738_v51 = vadd.f32 %v5399_v41, %v5061_v42  ;;  %v3669_v24 = vpop.f32.mrb[165].mxu1 }
 0x45d   : > { %v3736_v50 = vadd.f32 %v5400_v19, %v3669_v24  ;;  %v5062_v2 = vpop.f32.mrb[166].mxu1 }
 0x45e   : > { %3770 = vst.msk [vmem:[%s7688_s19 + $0xb0] sm:$0xff] %vm8271_vm10, %v3738_v51  ;;  %v3739_v26 = vadd.f32 %v5401_v17, %v5062_v2  ;;  %v3672_v53 = vpop.f32.mrb[167].mxu1 }
 0x45f   : > { %3768 = vst.msk [vmem:[%s7688_s19 + $0xa0] sm:$0xff] %vm8272_vm8, %v3736_v50  ;;  %v3737_v25 = vadd.f32 %v5402_v32, %v3672_v53 }
 0x460   : > { %3771 = vst.msk [vmem:[%s7688_s19 + $0xb8] sm:$0xff] %vm8273_vm2, %v3739_v26 }
 0x461   : > { %3769 = vst.msk [vmem:[%s7688_s19 + $0xa8] sm:$0xff] %vm8274_vm12, %v3737_v25 }
 0x463   : > { %v5065_v31 = vpop.f32.mrb[168].mxu1 }
 0x464   : > { %v3742_v11 = vadd.f32 %v5403_v8, %v5065_v31  ;;  %v3685_v20 = vpop.f32.mrb[169].mxu1 }
 0x465   : > { %v3740_v45 = vadd.f32 %v5404_v58, %v3685_v20  ;;  %v5066_v23 = vpop.f32.mrb[170].mxu1 }
 0x466   : > { %3774 = vst.msk [vmem:[%s7688_s19 + $0xd0] sm:$0xff] %vm8275_vm14, %v3742_v11  ;;  %v3743_v6 = vadd.f32 %v5405_v35, %v5066_v23  ;;  %v3688_v49 = vpop.f32.mrb[171].mxu1 }
 0x467   : > { %3772 = vst.msk [vmem:[%s7688_s19 + $0xc0] sm:$0xff] %vm8276_vm11, %v3740_v45  ;;  %v3741_v33 = vadd.f32 %v5406_v30, %v3688_v49 }
 0x468   : > { %3775 = vst.msk [vmem:[%s7688_s19 + $0xd8] sm:$0xff] %vm8277_vm13, %v3743_v6 }
 0x469   : > { %3773 = vst.msk [vmem:[%s7688_s19 + $0xc8] sm:$0xff] %vm8278_vm15, %v3741_v33 }
 0x46b   : > { %v5069_v14 = vpop.f32.mrb[172].mxu1 }
 0x46c   : > { %v3746_v12 = vadd.f32 %v5407_v27, %v5069_v14  ;;  %v3701_v16 = vpop.f32.mrb[173].mxu1 }
 0x46d   : > { %v3744_v4 = vadd.f32 %v5408_v7, %v3701_v16  ;;  %v5070_v0 = vpop.f32.mrb[174].mxu1 }
 0x46e   : > { %3778 = vst.msk [vmem:[%s7688_s19 + $0xf0] sm:$0xff] %vm8279_vm9, %v3746_v12  ;;  %v3747_v59 = vadd.f32 %v5409_v18, %v5070_v0  ;;  %v3704_v62 = vpop.f32.mrb[175].mxu1 }
 0x46f   : > { %3776 = vst.msk [vmem:[%s7688_s19 + $0xe0] sm:$0xff] %vm8280_vm3, %v3744_v4  ;;  %v3745_v46 = vadd.f32 %v5410_v15, %v3704_v62 }
 0x470   : > { %3779 = vst.msk [vmem:[%s7688_s19 + $0xf8] sm:$0xff] %vm8281_vm6, %v3747_v59 }
 0x471   : > { %3777 = vst.msk [vmem:[%s7688_s19 + $0xe8] sm:$0xff] %vm8282_vm1, %v3745_v46 }
 0x472   : > { %5482 = shalt.err (!%p5479_p7)
}
 0x473   : > { %s5483_s20 = scalar_lea.hbm %s7782_s8, 4096  ;;  %s5487_s19 = scalar_lea.hbm %s7844_s9, 8192 }
 0x474   : > { %p5484_p9 = scmp.ne.s32.totalorder %s7782_s8, %s5483_s20  ;;  %p5488_p5 = scmp.lt.u32.totalorder %s7782_s8, %s7844_s9 }
 0x475   : > { %p5489_p11 = scmp.lt.u32.totalorder %s5487_s19, %s5483_s20  ;;  %p5491_p4 = scmp.lt.u32.totalorder %s5483_s20, %s7782_s8 }
 0x476   : > { %p5485_p2 = pnand %p5484_p9, %p5696_p12 }
 0x477   : > { %p5490_p1 = por %p5489_p11, %p5488_p5 }
 0x478   : > { %p5486_p0 = pneg %p5485_p2 }
 0x479   : > { %p5492_p6 = por %p5491_p4, %p5490_p1 }
 0x47b   : > { %p5493_p8 = pnand %p5492_p6, %p5486_p0 }
 0x47d   : > { %5496 = shalt.err (!%p5493_p8)
}
 0x47e   : > { %s5550_s25 = smov 128   ;;  %s5551_s30 = smov 8  }
 0x47f   : > { %5239 = dma.vmem_to_hbm [thread:$0]  (%p5696_p12), %s7784_s22, 4096, %s7782_s8, %s3781_s10, %s5550_s25, %s5550_s25, %s5551_s30  }
 0x480 PF: > { %s3809_s18 = sand.u32 1, %s5527_s11   ;;  %p8283_p10 = scmp.ne.s32.totalorder %s7943_s17, 0 }
 0x481   : > { %p8284_p13 = scmp.ge.s32.totalorder %s5539_s14, 2  ;;  %s3810_s26 = scalar_lea.sflag [#allocation5], %s3809_s18 }
 0x483   : > { %p5250_p3 = pnand %p8284_p13, %p8283_p10 }
 0x485   : > { %5522 = dma.done.wait (!%p5250_p3), %s3810_s26, 4096  }
 0x486   : > { %5524 = vsyncadd (!%p5250_p3), %s3810_s26, 4294963200  ;;  %s8285_s14 = sld [smem:[#allocation12_spill]]  ;;  %s8286_s11 = smov %s5531_s12 }
 0x487   : > { %s8287_s12 = smov %s5535_s13  ;;  %s8288_s13 = smov %s5692_s28 }
 0x48c   : > { %p24_p7 = scmp.ge.s32.totalorder %s8285_s14, 4  }
 0x48e   :  { %26 = sbr.rel (!%p24_p7) target bundleno = 8 (0x8), region = 107 }
 0x495   :  { %3815 = vsyncpa [#allocation4], 1 }
 0x496   :  { %3817 = vsyncpa [#allocation4 + $0x1], 1 }
 0x497   :  { %3818 = vsyncpa [#allocation7], 1 }
 0x498   :  { %3819 = vsyncpa [#allocation5], 1 }
 0x499   :  { %3821 = vsyncpa [#allocation5 + $0x1], 1 }

</bundles_post_ra>
